<compile_context>
chip_gen: v7x
topology: tpu7x:2x2x1
jax: 0.10.0
libtpu: 0.0.40
codegen_flags: <defaults>
</compile_context>

<pallas_src>
import functools

import jax
import jax.numpy as jnp
from jax.experimental import pallas as pl
from jax.experimental.pallas import tpu as pltpu


def _round_up(n, m):
    return ((n + m - 1) // m) * m


# ---------------------------------------------------------------------------
# Fused kernel (one grid step == one image)
# ---------------------------------------------------------------------------
def _fused_sandglass_kernel(x_ref, w1_ref, s1_ref, b1_ref, wdw_ref, b2_ref,
                            wse1_ref, wse2_ref, w3_ref, s3_ref, b3_ref,
                            o_ref, hpad_ref, *, H, W, stride, use_res):
    C = hpad_ref.shape[-1]                       # lane-padded hidden width
    Ho = (H - 1) // stride + 1
    Wo = (W - 1) // stride + 1

    x = x_ref[...]                               # (H*W, Cin) f32

    # --- stage 1: 1x1 expand conv (MXU, bf16 in / f32 acc) + folded BN + ReLU6
    h = jnp.dot(x.astype(jnp.bfloat16), w1_ref[...],
                preferred_element_type=jnp.float32)              # (H*W, C)
    h = jnp.clip(h * s1_ref[...] + b1_ref[...], 0.0, 6.0)

    # --- stage 2: 3x3 depthwise conv (padding=1, stride) with BN scale
    #     pre-folded into the taps. Halo handled in a VMEM scratch buffer.
    hpad_ref[...] = jnp.zeros_like(hpad_ref)
    hpad_ref[1:H + 1, 1:W + 1, :] = h.reshape(H, W, C)
    xp = hpad_ref[...]                                           # (H+2, W+2, C)

    wdw = wdw_ref[...]                                           # (9, C)
    acc = jnp.zeros((Ho, Wo, C), jnp.float32)
    for kh in range(3):
        for kw in range(3):
            lim_h = kh + stride * (Ho - 1) + 1
            lim_w = kw + stride * (Wo - 1) + 1
            tap = xp[kh:lim_h:stride, kw:lim_w:stride, :]
            acc = acc + tap * wdw[kh * 3 + kw]
    a = jnp.clip(acc + b2_ref[...], 0.0, 6.0)                    # (Ho, Wo, C)

    # --- Squeeze-Excite: global avgpool -> FC -> ReLU -> FC -> sigmoid -> scale
    y = jnp.mean(a, axis=(0, 1)).reshape(1, C)
    y = jnp.maximum(jnp.dot(y, wse1_ref[...],
                            preferred_element_type=jnp.float32), 0.0)
    y = jax.nn.sigmoid(jnp.dot(y, wse2_ref[...],
                               preferred_element_type=jnp.float32))
    a = a * y.reshape(1, 1, C)

    # --- stage 3: 1x1 project conv (MXU, bf16/f32) + folded BN (+ residual)
    z = jnp.dot(a.reshape(Ho * Wo, C).astype(jnp.bfloat16), w3_ref[...],
                preferred_element_type=jnp.float32)              # (Ho*Wo, oup)
    z = z * s3_ref[...] + b3_ref[...]
    if use_res:
        z = z + x            # wrapper guarantees stride==1 and Cin==oup here
    o_ref[...] = z


# ---------------------------------------------------------------------------
# Wrapper
# ---------------------------------------------------------------------------
def sandglass_block(x_nchw, params, *, stride, use_res_connect):
    B, Cin, H, W = x_nchw.shape
    hid = params["w1"].shape[1]
    oup = params["w3"].shape[1]
    cr = params["wse1"].shape[1]
    Ho = (H - 1) // stride + 1
    Wo = (W - 1) // stride + 1
    if use_res_connect:
        assert stride == 1 and Cin == oup, "residual requires stride=1, inp==oup"

    hid_p = _round_up(hid, 128)
    cr_p = _round_up(cr, 128)

    def padc(a, axis, new):
        pad = [(0, 0)] * a.ndim
        pad[axis] = (0, new - a.shape[axis])
        return jnp.pad(a, pad)

    # Parameter prep (tiny, once): lane-pad hidden/SE dims, fold BN scale s2
    # into the depthwise taps, cast the big matmul weights to bf16.
    w1 = padc(params["w1"], 1, hid_p).astype(jnp.bfloat16)        # (Cin, hid_p)
    s1 = padc(params["s1"], 1, hid_p)
    b1 = padc(params["b1"], 1, hid_p)
    wdw = padc(params["wdw"] * params["s2"], 1, hid_p)            # (9, hid_p)
    b2 = padc(params["b2"], 1, hid_p)
    wse1 = padc(padc(params["wse1"], 0, hid_p), 1, cr_p)          # (hid_p, cr_p)
    wse2 = padc(padc(params["wse2"], 0, cr_p), 1, hid_p)          # (cr_p, hid_p)
    w3 = padc(params["w3"], 0, hid_p).astype(jnp.bfloat16)        # (hid_p, oup)
    s3, b3 = params["s3"], params["b3"]

    x = jnp.transpose(x_nchw, (0, 2, 3, 1)).astype(jnp.float32)   # NHWC
    x = x.reshape(B, H * W, Cin)

    kernel = functools.partial(_fused_sandglass_kernel, H=H, W=W,
                               stride=stride, use_res=use_res_connect)

    out = pl.pallas_call(
        kernel,
        out_shape=jax.ShapeDtypeStruct((B, Ho * Wo, oup), jnp.float32),
        grid=(B,),
        in_specs=[
            pl.BlockSpec((None, H * W, Cin), lambda b: (b, 0, 0)),   # x
            pl.BlockSpec((Cin, hid_p), lambda b: (0, 0)),            # w1 (bf16)
            pl.BlockSpec((1, hid_p), lambda b: (0, 0)),              # s1
            pl.BlockSpec((1, hid_p), lambda b: (0, 0)),              # b1
            pl.BlockSpec((9, hid_p), lambda b: (0, 0)),              # wdw * s2
            pl.BlockSpec((1, hid_p), lambda b: (0, 0)),              # b2
            pl.BlockSpec((hid_p, cr_p), lambda b: (0, 0)),           # SE fc1
            pl.BlockSpec((cr_p, hid_p), lambda b: (0, 0)),           # SE fc2
            pl.BlockSpec((hid_p, oup), lambda b: (0, 0)),            # w3 (bf16)
            pl.BlockSpec((1, oup), lambda b: (0, 0)),                # s3
            pl.BlockSpec((1, oup), lambda b: (0, 0)),                # b3
        ],
        out_specs=pl.BlockSpec((None, Ho * Wo, oup), lambda b: (b, 0, 0)),
        scratch_shapes=[pltpu.VMEM((H + 2, W + 2, hid_p), jnp.float32)],
        compiler_params=pltpu.CompilerParams(
            dimension_semantics=("parallel",)),
    )(x, w1, s1, b1, wdw, b2, wse1, wse2, w3, s3, b3)

    out = out.reshape(B, Ho, Wo, oup)
    return jnp.transpose(out, (0, 3, 1, 2))                       # back to NCHW


# ---------------------------------------------------------------------------
# Deterministic parameter construction (shapes match the PyTorch __init__)
# ---------------------------------------------------------------------------
def make_params(key, inp, oup, expand_ratio):
    hid = int(round(inp * expand_ratio))
    cr = max(8, hid // 16)
    eps = 1e-5
    ks = list(jax.random.split(key, 20))

    def bn_fold(c):
        gamma = 1.0 + 0.1 * jax.random.normal(ks.pop(), (c,), jnp.float32)
        beta = 0.1 * jax.random.normal(ks.pop(), (c,), jnp.float32)
        mean = 0.1 * jax.random.normal(ks.pop(), (c,), jnp.float32)
        var = jax.random.uniform(ks.pop(), (c,), jnp.float32, minval=0.5, maxval=1.5)
        scale = gamma / jnp.sqrt(var + eps)
        bias = beta - mean * scale
        return scale[None, :], bias[None, :]

    def bf16_repr(w):
        # store the pointwise-conv weights as bf16-representable f32 values so
        # the bf16 MXU path and the f32 reference see identical weights
        return w.astype(jnp.bfloat16).astype(jnp.float32)

    w1 = bf16_repr(0.3 * jax.random.normal(ks.pop(), (inp, hid), jnp.float32))
    s1, b1 = bn_fold(hid)
    wdw = 0.3 * jax.random.normal(ks.pop(), (3, 3, hid), jnp.float32)
    wdw = wdw.reshape(9, hid)
    s2, b2 = bn_fold(hid)
    wse1 = 0.3 * jax.random.normal(ks.pop(), (hid, cr), jnp.float32)
    wse2 = 0.3 * jax.random.normal(ks.pop(), (cr, hid), jnp.float32)
    w3 = bf16_repr(0.3 * jax.random.normal(ks.pop(), (hid, oup), jnp.float32))
    s3, b3 = bn_fold(oup)

    return dict(w1=w1, s1=s1, b1=b1, wdw=wdw, s2=s2, b2=b2,
                wse1=wse1, wse2=wse2, w3=w3, s3=s3, b3=b3)


# ---------------------------------------------------------------------------
# Pure-JAX f32 reference (PyTorch semantics, used only for the sanity check)
# ---------------------------------------------------------------------------
def ref_forward(x_nchw, p, *, stride, use_res_connect):
    x = jnp.transpose(x_nchw, (0, 2, 3, 1)).astype(jnp.float32)
    B, H, W, _ = x.shape
    hid = p["w1"].shape[1]
    Ho = (H - 1) // stride + 1
    Wo = (W - 1) // stride + 1
    h = jnp.clip(jnp.einsum("bhwc,cd->bhwd", x, p["w1"]) * p["s1"][0] + p["b1"][0], 0, 6)
    hp = jnp.pad(h, ((0, 0), (1, 1), (1, 1), (0, 0)))
    wdw = p["wdw"].reshape(3, 3, hid)
    acc = jnp.zeros((B, Ho, Wo, hid), jnp.float32)
    for kh in range(3):
        for kw in range(3):
            acc = acc + hp[:, kh:kh + stride * (Ho - 1) + 1:stride,
                           kw:kw + stride * (Wo - 1) + 1:stride, :] * wdw[kh, kw]
    a = jnp.clip(acc * p["s2"][0] + p["b2"][0], 0, 6)
    y = a.mean(axis=(1, 2))
    y = jnp.maximum(y @ p["wse1"], 0.0)
    y = jax.nn.sigmoid(y @ p["wse2"])
    a = a * y[:, None, None, :]
    z = jnp.einsum("bhwc,cd->bhwd", a, p["w3"]) * p["s3"][0] + p["b3"][0]
    out = jnp.transpose(z, (0, 3, 1, 2))
    if use_res_connect:
        out = out + x_nchw
    return out


if __name__ == "__main__":
    key = jax.random.PRNGKey(0)
    kx, kp = jax.random.split(key)

    B, inp, H, W = 2, 4, 16, 16
    oup, stride, expand_ratio = 4, 1, 6
    use_res = (stride == 1 and inp == oup)

    x = jax.random.normal(kx, (B, inp, H, W), jnp.float32)
    params = make_params(kp, inp, oup, expand_ratio)

    out = sandglass_block(x, params, stride=stride, use_res_connect=use_res)
    out = jax.block_until_ready(out)

    ref = ref_forward(x, params, stride=stride, use_res_connect=use_res)
    assert out.shape == ref.shape, (out.shape, ref.shape)
    # kernel casts activations to bf16 at the two MXU matmuls (f32 accumulate);
    # the reference is pure f32, hence the slightly loosened tolerance.
    assert jnp.allclose(out, ref, atol=7e-2, rtol=5e-2), \
        float(jnp.max(jnp.abs(out - ref)))

    print("KERNEL_OK")
</pallas_src>

<mosaic_0001>
module attributes {stable_mosaic.version = 11 : i64} {
  func.func @_fused_sandglass_kernel(%arg0: i32, %arg1: memref<1x256x4xf32, #tpu.memory_space<vmem>>, %arg2: memref<4x128xbf16, #tpu.memory_space<vmem>>, %arg3: memref<1x128xf32, #tpu.memory_space<vmem>>, %arg4: memref<1x128xf32, #tpu.memory_space<vmem>>, %arg5: memref<9x128xf32, #tpu.memory_space<vmem>>, %arg6: memref<1x128xf32, #tpu.memory_space<vmem>>, %arg7: memref<128x128xf32, #tpu.memory_space<vmem>>, %arg8: memref<128x128xf32, #tpu.memory_space<vmem>>, %arg9: memref<128x4xbf16, #tpu.memory_space<vmem>>, %arg10: memref<1x4xf32, #tpu.memory_space<vmem>>, %arg11: memref<1x4xf32, #tpu.memory_space<vmem>>, %arg12: memref<1x256x4xf32, #tpu.memory_space<vmem>>, %arg13: memref<18x18x128xf32, #tpu.memory_space<vmem>>) attributes {dimension_semantics = [#tpu.dimension_semantics<parallel>], iteration_bounds = array<i64: 2>, scalar_prefetch = 0 : i64, scratch_operands = 1 : i64, tpu.core_type = #tpu.core_type<tc>, window_params = [{transform_indices = @transform_0, window_bounds = array<i64: 1, 256, 4>}, {pipeline_mode = #tpu.pipeline_mode<synchronous>, transform_indices = @transform_1, window_bounds = array<i64: 4, 128>}, {pipeline_mode = #tpu.pipeline_mode<synchronous>, transform_indices = @transform_2, window_bounds = array<i64: 1, 128>}, {pipeline_mode = #tpu.pipeline_mode<synchronous>, transform_indices = @transform_3, window_bounds = array<i64: 1, 128>}, {pipeline_mode = #tpu.pipeline_mode<synchronous>, transform_indices = @transform_4, window_bounds = array<i64: 9, 128>}, {pipeline_mode = #tpu.pipeline_mode<synchronous>, transform_indices = @transform_5, window_bounds = array<i64: 1, 128>}, {pipeline_mode = #tpu.pipeline_mode<synchronous>, transform_indices = @transform_6, window_bounds = array<i64: 128, 128>}, {pipeline_mode = #tpu.pipeline_mode<synchronous>, transform_indices = @transform_7, window_bounds = array<i64: 128, 128>}, {pipeline_mode = #tpu.pipeline_mode<synchronous>, transform_indices = @transform_8, window_bounds = array<i64: 128, 4>}, {pipeline_mode = #tpu.pipeline_mode<synchronous>, transform_indices = @transform_9, window_bounds = array<i64: 1, 4>}, {pipeline_mode = #tpu.pipeline_mode<synchronous>, transform_indices = @transform_10, window_bounds = array<i64: 1, 4>}, {transform_indices = @transform_11, window_bounds = array<i64: 1, 256, 4>}]} {
    %c0 = arith.constant 0 : index
    %c0_0 = arith.constant 0 : index
    %c0_1 = arith.constant 0 : index
    %0 = vector.load %arg1[%c0, %c0_0, %c0_1] : memref<1x256x4xf32, #tpu.memory_space<vmem>>, vector<1x256x4xf32>
    %1 = vector.shape_cast %0 : vector<1x256x4xf32> to vector<256x4xf32>
    %2 = arith.truncf %1 : vector<256x4xf32> to vector<256x4xbf16>
    %c0_2 = arith.constant 0 : index
    %c0_3 = arith.constant 0 : index
    %3 = vector.load %arg2[%c0_2, %c0_3] : memref<4x128xbf16, #tpu.memory_space<vmem>>, vector<4x128xbf16>
    %cst = arith.constant dense<0.000000e+00> : vector<256x128xf32>
    %4 = tpu.matmul %2, %3, %cst {dimension_numbers = #tpu.dot_dimension_numbers<[1], [0], [0], [1], [0, 0, 1, 1], [], []>} : vector<256x4xbf16>, vector<4x128xbf16>, vector<256x128xf32> -> vector<256x128xf32>
    %c0_4 = arith.constant 0 : index
    %c0_5 = arith.constant 0 : index
    %5 = vector.load %arg3[%c0_4, %c0_5] : memref<1x128xf32, #tpu.memory_space<vmem>>, vector<1x128xf32>
    %6 = vector.broadcast %5 : vector<1x128xf32> to vector<256x128xf32>
    %7 = arith.mulf %4, %6 : vector<256x128xf32>
    %c0_6 = arith.constant 0 : index
    %c0_7 = arith.constant 0 : index
    %8 = vector.load %arg4[%c0_6, %c0_7] : memref<1x128xf32, #tpu.memory_space<vmem>>, vector<1x128xf32>
    %9 = vector.broadcast %8 : vector<1x128xf32> to vector<256x128xf32>
    %10 = arith.addf %7, %9 : vector<256x128xf32>
    %cst_8 = arith.constant 0.000000e+00 : f32
    %cst_9 = arith.constant 6.000000e+00 : f32
    %11 = vector.broadcast %cst_8 : f32 to vector<256x128xf32>
    %12 = arith.maximumf %11, %10 : vector<256x128xf32>
    %13 = vector.broadcast %cst_9 : f32 to vector<256x128xf32>
    %14 = arith.minimumf %13, %12 : vector<256x128xf32>
    %cst_10 = arith.constant 0.000000e+00 : f32
    %15 = vector.broadcast %cst_10 : f32 to vector<18x18x128xf32>
    %c0_11 = arith.constant 0 : index
    %c0_12 = arith.constant 0 : index
    %c0_13 = arith.constant 0 : index
    %16 = vector.load %arg13[%c0_11, %c0_12, %c0_13] : memref<18x18x128xf32, #tpu.memory_space<vmem>>, vector<18x18x128xf32>
    tpu.vector_store %arg13[%c0_11, %c0_12, %c0_13], %15 {strides = array<i32>} : memref<18x18x128xf32, #tpu.memory_space<vmem>>, vector<18x18x128xf32>,
    %17 = vector.shape_cast %14 : vector<256x128xf32> to vector<16x16x128xf32>
    %c1 = arith.constant 1 : index
    %c1_14 = arith.constant 1 : index
    %c0_15 = arith.constant 0 : index
    %18 = vector.load %arg13[%c1, %c1_14, %c0_15] : memref<18x18x128xf32, #tpu.memory_space<vmem>>, vector<16x16x128xf32>
    tpu.vector_store %arg13[%c1, %c1_14, %c0_15], %17 {strides = array<i32>} : memref<18x18x128xf32, #tpu.memory_space<vmem>>, vector<16x16x128xf32>,
    %c0_16 = arith.constant 0 : index
    %c0_17 = arith.constant 0 : index
    %c0_18 = arith.constant 0 : index
    %19 = vector.load %arg13[%c0_16, %c0_17, %c0_18] : memref<18x18x128xf32, #tpu.memory_space<vmem>>, vector<18x18x128xf32>
    %c0_19 = arith.constant 0 : index
    %c0_20 = arith.constant 0 : index
    %20 = vector.load %arg5[%c0_19, %c0_20] : memref<9x128xf32, #tpu.memory_space<vmem>>, vector<9x128xf32>
    %cst_21 = arith.constant 0.000000e+00 : f32
    %21 = vector.broadcast %cst_21 : f32 to vector<16x16x128xf32>
    %22 = vector.extract_strided_slice %19 {offsets = [0, 0, 0], sizes = [16, 16, 128], strides = [1, 1, 1]} : vector<18x18x128xf32> to vector<16x16x128xf32>
    %23 = vector.extract_strided_slice %20 {offsets = [0, 0], sizes = [1, 128], strides = [1, 1]} : vector<9x128xf32> to vector<1x128xf32>
    %24 = vector.shape_cast %23 : vector<1x128xf32> to vector<128xf32>
    %25 = vector.shape_cast %24 : vector<128xf32> to vector<1x1x128xf32>
    %26 = vector.broadcast %25 : vector<1x1x128xf32> to vector<16x16x128xf32>
    %27 = arith.mulf %22, %26 : vector<16x16x128xf32>
    %28 = arith.addf %21, %27 : vector<16x16x128xf32>
    %29 = vector.extract_strided_slice %19 {offsets = [0, 1, 0], sizes = [16, 16, 128], strides = [1, 1, 1]} : vector<18x18x128xf32> to vector<16x16x128xf32>
    %30 = vector.extract_strided_slice %20 {offsets = [1, 0], sizes = [1, 128], strides = [1, 1]} : vector<9x128xf32> to vector<1x128xf32>
    %31 = vector.shape_cast %30 : vector<1x128xf32> to vector<128xf32>
    %32 = vector.shape_cast %31 : vector<128xf32> to vector<1x1x128xf32>
    %33 = vector.broadcast %32 : vector<1x1x128xf32> to vector<16x16x128xf32>
    %34 = arith.mulf %29, %33 : vector<16x16x128xf32>
    %35 = arith.addf %28, %34 : vector<16x16x128xf32>
    %36 = vector.extract_strided_slice %19 {offsets = [0, 2, 0], sizes = [16, 16, 128], strides = [1, 1, 1]} : vector<18x18x128xf32> to vector<16x16x128xf32>
    %37 = vector.extract_strided_slice %20 {offsets = [2, 0], sizes = [1, 128], strides = [1, 1]} : vector<9x128xf32> to vector<1x128xf32>
    %38 = vector.shape_cast %37 : vector<1x128xf32> to vector<128xf32>
    %39 = vector.shape_cast %38 : vector<128xf32> to vector<1x1x128xf32>
    %40 = vector.broadcast %39 : vector<1x1x128xf32> to vector<16x16x128xf32>
    %41 = arith.mulf %36, %40 : vector<16x16x128xf32>
    %42 = arith.addf %35, %41 : vector<16x16x128xf32>
    %43 = vector.extract_strided_slice %19 {offsets = [1, 0, 0], sizes = [16, 16, 128], strides = [1, 1, 1]} : vector<18x18x128xf32> to vector<16x16x128xf32>
    %44 = vector.extract_strided_slice %20 {offsets = [3, 0], sizes = [1, 128], strides = [1, 1]} : vector<9x128xf32> to vector<1x128xf32>
    %45 = vector.shape_cast %44 : vector<1x128xf32> to vector<128xf32>
    %46 = vector.shape_cast %45 : vector<128xf32> to vector<1x1x128xf32>
    %47 = vector.broadcast %46 : vector<1x1x128xf32> to vector<16x16x128xf32>
    %48 = arith.mulf %43, %47 : vector<16x16x128xf32>
    %49 = arith.addf %42, %48 : vector<16x16x128xf32>
    %50 = vector.extract_strided_slice %19 {offsets = [1, 1, 0], sizes = [16, 16, 128], strides = [1, 1, 1]} : vector<18x18x128xf32> to vector<16x16x128xf32>
    %51 = vector.extract_strided_slice %20 {offsets = [4, 0], sizes = [1, 128], strides = [1, 1]} : vector<9x128xf32> to vector<1x128xf32>
    %52 = vector.shape_cast %51 : vector<1x128xf32> to vector<128xf32>
    %53 = vector.shape_cast %52 : vector<128xf32> to vector<1x1x128xf32>
    %54 = vector.broadcast %53 : vector<1x1x128xf32> to vector<16x16x128xf32>
    %55 = arith.mulf %50, %54 : vector<16x16x128xf32>
    %56 = arith.addf %49, %55 : vector<16x16x128xf32>
    %57 = vector.extract_strided_slice %19 {offsets = [1, 2, 0], sizes = [16, 16, 128], strides = [1, 1, 1]} : vector<18x18x128xf32> to vector<16x16x128xf32>
    %58 = vector.extract_strided_slice %20 {offsets = [5, 0], sizes = [1, 128], strides = [1, 1]} : vector<9x128xf32> to vector<1x128xf32>
    %59 = vector.shape_cast %58 : vector<1x128xf32> to vector<128xf32>
    %60 = vector.shape_cast %59 : vector<128xf32> to vector<1x1x128xf32>
    %61 = vector.broadcast %60 : vector<1x1x128xf32> to vector<16x16x128xf32>
    %62 = arith.mulf %57, %61 : vector<16x16x128xf32>
    %63 = arith.addf %56, %62 : vector<16x16x128xf32>
    %64 = vector.extract_strided_slice %19 {offsets = [2, 0, 0], sizes = [16, 16, 128], strides = [1, 1, 1]} : vector<18x18x128xf32> to vector<16x16x128xf32>
    %65 = vector.extract_strided_slice %20 {offsets = [6, 0], sizes = [1, 128], strides = [1, 1]} : vector<9x128xf32> to vector<1x128xf32>
    %66 = vector.shape_cast %65 : vector<1x128xf32> to vector<128xf32>
    %67 = vector.shape_cast %66 : vector<128xf32> to vector<1x1x128xf32>
    %68 = vector.broadcast %67 : vector<1x1x128xf32> to vector<16x16x128xf32>
    %69 = arith.mulf %64, %68 : vector<16x16x128xf32>
    %70 = arith.addf %63, %69 : vector<16x16x128xf32>
    %71 = vector.extract_strided_slice %19 {offsets = [2, 1, 0], sizes = [16, 16, 128], strides = [1, 1, 1]} : vector<18x18x128xf32> to vector<16x16x128xf32>
    %72 = vector.extract_strided_slice %20 {offsets = [7, 0], sizes = [1, 128], strides = [1, 1]} : vector<9x128xf32> to vector<1x128xf32>
    %73 = vector.shape_cast %72 : vector<1x128xf32> to vector<128xf32>
    %74 = vector.shape_cast %73 : vector<128xf32> to vector<1x1x128xf32>
    %75 = vector.broadcast %74 : vector<1x1x128xf32> to vector<16x16x128xf32>
    %76 = arith.mulf %71, %75 : vector<16x16x128xf32>
    %77 = arith.addf %70, %76 : vector<16x16x128xf32>
    %78 = vector.extract_strided_slice %19 {offsets = [2, 2, 0], sizes = [16, 16, 128], strides = [1, 1, 1]} : vector<18x18x128xf32> to vector<16x16x128xf32>
    %79 = vector.extract_strided_slice %20 {offsets = [8, 0], sizes = [1, 128], strides = [1, 1]} : vector<9x128xf32> to vector<1x128xf32>
    %80 = vector.shape_cast %79 : vector<1x128xf32> to vector<128xf32>
    %81 = vector.shape_cast %80 : vector<128xf32> to vector<1x1x128xf32>
    %82 = vector.broadcast %81 : vector<1x1x128xf32> to vector<16x16x128xf32>
    %83 = arith.mulf %78, %82 : vector<16x16x128xf32>
    %84 = arith.addf %77, %83 : vector<16x16x128xf32>
    %c0_22 = arith.constant 0 : index
    %c0_23 = arith.constant 0 : index
    %85 = vector.load %arg6[%c0_22, %c0_23] : memref<1x128xf32, #tpu.memory_space<vmem>>, vector<1x128xf32>
    %86 = vector.shape_cast %85 : vector<1x128xf32> to vector<1x1x128xf32>
    %87 = vector.broadcast %86 : vector<1x1x128xf32> to vector<16x16x128xf32>
    %88 = arith.addf %84, %87 : vector<16x16x128xf32>
    %cst_24 = arith.constant 0.000000e+00 : f32
    %cst_25 = arith.constant 6.000000e+00 : f32
    %89 = vector.broadcast %cst_24 : f32 to vector<16x16x128xf32>
    %90 = arith.maximumf %89, %88 : vector<16x16x128xf32>
    %91 = vector.broadcast %cst_25 : f32 to vector<16x16x128xf32>
    %92 = arith.minimumf %91, %90 : vector<16x16x128xf32>
    %cst_26 = arith.constant dense<0.000000e+00> : vector<128xf32>
    %93 = vector.multi_reduction <add>, %92, %cst_26 [0, 1] : vector<16x16x128xf32> to vector<128xf32>
    %cst_27 = arith.constant 2.560000e+02 : f32
    %94 = vector.broadcast %cst_27 : f32 to vector<128xf32>
    %95 = arith.divf %93, %94 : vector<128xf32>
    %96 = vector.shape_cast %95 : vector<128xf32> to vector<1x128xf32>
    %c0_28 = arith.constant 0 : index
    %c0_29 = arith.constant 0 : index
    %97 = vector.load %arg7[%c0_28, %c0_29] : memref<128x128xf32, #tpu.memory_space<vmem>>, vector<128x128xf32>
    %cst_30 = arith.constant dense<0.000000e+00> : vector<1x128xf32>
    %98 = tpu.matmul %96, %97, %cst_30 {dimension_numbers = #tpu.dot_dimension_numbers<[1], [0], [0], [1], [0, 0, 1, 1], [], []>} : vector<1x128xf32>, vector<128x128xf32>, vector<1x128xf32> -> vector<1x128xf32>
    %cst_31 = arith.constant 0.000000e+00 : f32
    %99 = vector.broadcast %cst_31 : f32 to vector<1x128xf32>
    %100 = arith.maximumf %98, %99 : vector<1x128xf32>
    %c0_32 = arith.constant 0 : index
    %c0_33 = arith.constant 0 : index
    %101 = vector.load %arg8[%c0_32, %c0_33] : memref<128x128xf32, #tpu.memory_space<vmem>>, vector<128x128xf32>
    %cst_34 = arith.constant dense<0.000000e+00> : vector<1x128xf32>
    %102 = tpu.matmul %100, %101, %cst_34 {dimension_numbers = #tpu.dot_dimension_numbers<[1], [0], [0], [1], [0, 0, 1, 1], [], []>} : vector<1x128xf32>, vector<128x128xf32>, vector<1x128xf32> -> vector<1x128xf32>
    %103 = arith.negf %102 : vector<1x128xf32>
    %104 = math.exp %103 : vector<1x128xf32>
    %cst_35 = arith.constant 1.000000e+00 : f32
    %105 = vector.broadcast %cst_35 : f32 to vector<1x128xf32>
    %106 = arith.addf %105, %104 : vector<1x128xf32>
    %107 = arith.divf %105, %106 : vector<1x128xf32>
    %108 = vector.shape_cast %107 : vector<1x128xf32> to vector<1x1x128xf32>
    %109 = vector.broadcast %108 : vector<1x1x128xf32> to vector<16x16x128xf32>
    %110 = arith.mulf %92, %109 : vector<16x16x128xf32>
    %111 = vector.shape_cast %110 : vector<16x16x128xf32> to vector<256x128xf32>
    %112 = arith.truncf %111 : vector<256x128xf32> to vector<256x128xbf16>
    %c0_36 = arith.constant 0 : index
    %c0_37 = arith.constant 0 : index
    %113 = vector.load %arg9[%c0_36, %c0_37] : memref<128x4xbf16, #tpu.memory_space<vmem>>, vector<128x4xbf16>
    %cst_38 = arith.constant dense<0.000000e+00> : vector<256x4xf32>
    %114 = tpu.matmul %112, %113, %cst_38 {dimension_numbers = #tpu.dot_dimension_numbers<[1], [0], [0], [1], [0, 0, 1, 1], [], []>} : vector<256x128xbf16>, vector<128x4xbf16>, vector<256x4xf32> -> vector<256x4xf32>
    %c0_39 = arith.constant 0 : index
    %c0_40 = arith.constant 0 : index
    %115 = vector.load %arg10[%c0_39, %c0_40] : memref<1x4xf32, #tpu.memory_space<vmem>>, vector<1x4xf32>
    %116 = vector.broadcast %115 : vector<1x4xf32> to vector<256x4xf32>
    %117 = arith.mulf %114, %116 : vector<256x4xf32>
    %c0_41 = arith.constant 0 : index
    %c0_42 = arith.constant 0 : index
    %118 = vector.load %arg11[%c0_41, %c0_42] : memref<1x4xf32, #tpu.memory_space<vmem>>, vector<1x4xf32>
    %119 = vector.broadcast %118 : vector<1x4xf32> to vector<256x4xf32>
    %120 = arith.addf %117, %119 : vector<256x4xf32>
    %121 = arith.addf %120, %1 : vector<256x4xf32>
    %c0_43 = arith.constant 0 : index
    %c0_44 = arith.constant 0 : index
    %c0_45 = arith.constant 0 : index
    %122 = vector.load %arg12[%c0_43, %c0_44, %c0_45] : memref<1x256x4xf32, #tpu.memory_space<vmem>>, vector<1x256x4xf32>
    %123 = vector.shape_cast %122 : vector<1x256x4xf32> to vector<256x4xf32>
    %124 = vector.shape_cast %121 : vector<256x4xf32> to vector<1x256x4xf32>
    tpu.vector_store %arg12[%c0_43, %c0_44, %c0_45], %124 {strides = array<i32>} : memref<1x256x4xf32, #tpu.memory_space<vmem>>, vector<1x256x4xf32>,
    return
  }
  func.func @transform_0(%arg0: i32) -> (i32, i32, i32) {
    %c0_i32 = arith.constant 0 : i32
    %c0_i32_0 = arith.constant 0 : i32
    %c0_i32_1 = arith.constant 0 : i32
    return %arg0, %c0_i32, %c0_i32_0 : i32, i32, i32
  }
  func.func @transform_1(%arg0: i32) -> (i32, i32) {
    %c0_i32 = arith.constant 0 : i32
    %c0_i32_0 = arith.constant 0 : i32
    %c0_i32_1 = arith.constant 0 : i32
    return %c0_i32, %c0_i32_0 : i32, i32
  }
  func.func @transform_2(%arg0: i32) -> (i32, i32) {
    %c0_i32 = arith.constant 0 : i32
    %c0_i32_0 = arith.constant 0 : i32
    %c0_i32_1 = arith.constant 0 : i32
    return %c0_i32, %c0_i32_0 : i32, i32
  }
  func.func @transform_3(%arg0: i32) -> (i32, i32) {
    %c0_i32 = arith.constant 0 : i32
    %c0_i32_0 = arith.constant 0 : i32
    %c0_i32_1 = arith.constant 0 : i32
    return %c0_i32, %c0_i32_0 : i32, i32
  }
  func.func @transform_4(%arg0: i32) -> (i32, i32) {
    %c0_i32 = arith.constant 0 : i32
    %c0_i32_0 = arith.constant 0 : i32
    %c0_i32_1 = arith.constant 0 : i32
    return %c0_i32, %c0_i32_0 : i32, i32
  }
  func.func @transform_5(%arg0: i32) -> (i32, i32) {
    %c0_i32 = arith.constant 0 : i32
    %c0_i32_0 = arith.constant 0 : i32
    %c0_i32_1 = arith.constant 0 : i32
    return %c0_i32, %c0_i32_0 : i32, i32
  }
  func.func @transform_6(%arg0: i32) -> (i32, i32) {
    %c0_i32 = arith.constant 0 : i32
    %c0_i32_0 = arith.constant 0 : i32
    %c0_i32_1 = arith.constant 0 : i32
    return %c0_i32, %c0_i32_0 : i32, i32
  }
  func.func @transform_7(%arg0: i32) -> (i32, i32) {
    %c0_i32 = arith.constant 0 : i32
    %c0_i32_0 = arith.constant 0 : i32
    %c0_i32_1 = arith.constant 0 : i32
    return %c0_i32, %c0_i32_0 : i32, i32
  }
  func.func @transform_8(%arg0: i32) -> (i32, i32) {
    %c0_i32 = arith.constant 0 : i32
    %c0_i32_0 = arith.constant 0 : i32
    %c0_i32_1 = arith.constant 0 : i32
    return %c0_i32, %c0_i32_0 : i32, i32
  }
  func.func @transform_9(%arg0: i32) -> (i32, i32) {
    %c0_i32 = arith.constant 0 : i32
    %c0_i32_0 = arith.constant 0 : i32
    %c0_i32_1 = arith.constant 0 : i32
    return %c0_i32, %c0_i32_0 : i32, i32
  }
  func.func @transform_10(%arg0: i32) -> (i32, i32) {
    %c0_i32 = arith.constant 0 : i32
    %c0_i32_0 = arith.constant 0 : i32
    %c0_i32_1 = arith.constant 0 : i32
    return %c0_i32, %c0_i32_0 : i32, i32
  }
  func.func @transform_11(%arg0: i32) -> (i32, i32, i32) {
    %c0_i32 = arith.constant 0 : i32
    %c0_i32_0 = arith.constant 0 : i32
    %c0_i32_1 = arith.constant 0 : i32
    return %arg0, %c0_i32, %c0_i32_0 : i32, i32, i32
  }
}

</mosaic_0001>

<bundles_post_ra>
// kernel: tpu_custom_call.1
= control target key start
LH: loop header
LB: loop body
LE: loop exit
PB: predicated region body
PF: predicated region fallthrough
CT: control target
= control target key end

     0   :  { %s3860_s17 = smov 0   ;;  %s6505_s0 = inlined_call_operand.vmem [shape: f32[2,256,4], index: 0, kind: input, shape index: {}]   ;;  %s6506_s1 = inlined_call_operand.vmem [shape: bf16[4,128], index: 1, kind: input, shape index: {}]   ;;  %s6507_s2 = inlined_call_operand.vmem [shape: f32[1,128], index: 2, kind: input, shape index: {}]   ;;  %s6508_s3 = inlined_call_operand.vmem [shape: f32[1,128], index: 3, kind: input, shape index: {}]   ;;  %s6509_s4 = inlined_call_operand.vmem [shape: f32[9,128], index: 4, kind: input, shape index: {}]   ;;  %s6510_s5 = inlined_call_operand.vmem [shape: f32[1,128], index: 5, kind: input, shape index: {}]   ;;  %s6511_s6 = inlined_call_operand.vmem [shape: f32[128,128], index: 6, kind: input, shape index: {}]   ;;  %s6512_s7 = inlined_call_operand.vmem [shape: f32[128,128], index: 7, kind: input, shape index: {}]   ;;  %s6513_s8 = inlined_call_operand.vmem [shape: bf16[128,4], index: 8, kind: input, shape index: {}]   ;;  %s6514_s9 = inlined_call_operand.vmem [shape: f32[1,4], index: 9, kind: input, shape index: {}]   ;;  %s6515_s10 = inlined_call_operand.vmem [shape: f32[1,4], index: 10, kind: input, shape index: {}]   ;;  %s6516_s11 = inlined_call_operand.vmem [shape: f32[2,256,4], index: 11, kind: output, shape index: {}]  }
   0x1 LB: > { %s3401_s18 = sadd.s32 4294967295, %s3795_s17   ;;  %p3405_p0 = scmp.ge.s32.totalorder %s3795_s17, 1  ;;  %s3795_s17 = sphi %s3860_s17, %s21_s17  }
   0x2   : > { %p337_p1 = scmp.lt.s32.totalorder %s3795_s17, 3 }
   0x4   : > { %p338_p2 = pnand %p3405_p0, %p337_p1 }
   0x6   : > { %341 = sbr.rel (%p338_p2) target bundleno = 1351 (0x547), region = 64 }
   0xd   : > { %v436_v0 = vld [vmem:[%s6506_s1] sm:$0x3]  ;;  %vm486_vm0 = vcmask 1041408   ;;  %p377_p3 = scmp.lt.s32.totalorder %s3401_s18, 1  ;;  %vm437_vm1 = vcmask 31744   ;;  %v3797_v50 = vmov 0.0  }
   0xe   : > { %3722 = vmatprep.subr.msk.bf16.mxu0 %vm486_vm0, %v436_v0  ;;  %v488_v1 = vsel %vm486_vm0, %v436_v0, 0  ;;  %3723 = vmatprep.subr.msk.bf16.mxu1 %vm486_vm0, %v436_v0  ;;  %799 = vst [vmem:[#allocation2 + $0x30] sm:$0xff] %v3797_v50  ;;  %800 = vst [vmem:[#allocation2 + $0x38] sm:$0xff] %v3797_v50  ;;  %v3932_v51 = vld [vmem:[%s6507_s2] ss:$0 sm:$0xff]  ;;  %vm1104_vm2 = vcmask 1046528  }
   0xf   : > { %3521 = vmatpush3.bf16.msra.mxu0 %v488_v1  ;;  %s6961_s18 = smov (!%p377_p3, %s3401_s18), 1  ;;  %3721 = vmatpush3.bf16.msra.mxu1 %v488_v1  ;;  %793 = vst [vmem:[#allocation2] sm:$0xff] %v3797_v50  ;;  %795 = vst [vmem:[#allocation2 + $0x10] sm:$0x3] %v3797_v50  ;;  %v3937_v53 = vld [vmem:[%s6508_s3] ss:$0 sm:$0xff] }
  0x10   : > { %s3443_s21 = sshll.u32 %s6961_s18, 8  ;;  %796 = vst [vmem:[#allocation2 + $0x18] sm:$0xff] %v3797_v50  ;;  %797 = vst [vmem:[#allocation2 + $0x20] sm:$0xff] %v3797_v50  ;;  %vm1349_vm3 = vcmask 1045504   ;;  %vm3799_vm4 = vmmov 0  }
  0x11   : > { %s3879_s24 = scalar_lea.vmem %s6505_s0, %s3443_s21  ;;  %798 = vst [vmem:[#allocation2 + $0x28] sm:$0x3] %v3797_v50  ;;  %801 = vst [vmem:[#allocation2 + $0x40] sm:$0x3] %v3797_v50  ;;  %s6344_s28 = scalar_lea.vmem %s6516_s11, %s3443_s21 }
  0x12   : > { %v388_v2 = vld [vmem:[%s3879_s24] sm:$0xff]  ;;  %v389_v3 = vld [vmem:[%s3879_s24 + $0x8] sm:$0xff]  ;;  %v390_v4 = vld [vmem:[%s3879_s24 + $0x10] sm:$0xff]  ;;  %802 = vst [vmem:[#allocation2 + $0x48] sm:$0xff] %v3797_v50 }
  0x13   : > { %v420_v5 = vpack.c.bf16 %v389_v3, %v388_v2  ;;  %v391_v6 = vld [vmem:[%s3879_s24 + $0x18] sm:$0xff]  ;;  %v392_v7 = vld [vmem:[%s3879_s24 + $0x20] sm:$0xff]  ;;  %v393_v8 = vld [vmem:[%s3879_s24 + $0x28] sm:$0xff]  ;;  %803 = vst [vmem:[#allocation2 + $0x50] sm:$0xff] %v3797_v50 }
  0x14   : > { %v421_v9 = vpack.c.bf16 %v391_v6, %v390_v4  ;;  %v422_v10 = vpack.c.bf16 %v393_v8, %v392_v7  ;;  %v404_v11 = vld [vmem:[%s3879_s24 + $0x80] sm:$0xff]  ;;  %v405_v12 = vld [vmem:[%s3879_s24 + $0x88] sm:$0xff]  ;;  %v406_v13 = vld [vmem:[%s3879_s24 + $0x90] sm:$0xff]  ;;  %804 = vst [vmem:[#allocation2 + $0x58] sm:$0x3] %v3797_v50 }
  0x15   : > { %3522 = vmatprep.mubr.msk.bf16.mxu0 %vm437_vm1, %v420_v5  ;;  %v394_v14 = vld [vmem:[%s3879_s24 + $0x30] sm:$0xff]  ;;  %v395_v15 = vld [vmem:[%s3879_s24 + $0x38] sm:$0xff]  ;;  %v428_v16 = vpack.c.bf16 %v405_v12, %v404_v11  ;;  %v396_v18 = vld [vmem:[%s3879_s24 + $0x40] sm:$0xff]  ;;  %805 = vst [vmem:[#allocation2 + $0x60] sm:$0xff] %v3797_v50 }
  0x16   : > { %3523 = vmatmul.mubr.msk.bf16.vlgmr.msra.gmra.mrb[0].mxu0 %vm437_vm1, %v421_v9  ;;  %v407_v17 = vld [vmem:[%s3879_s24 + $0x98] sm:$0xff]  ;;  %v397_v19 = vld [vmem:[%s3879_s24 + $0x48] sm:$0xff]  ;;  %v408_v21 = vld [vmem:[%s3879_s24 + $0xa0] sm:$0xff]  ;;  %v423_v23 = vpack.c.bf16 %v395_v15, %v394_v14  ;;  %806 = vst [vmem:[#allocation2 + $0x68] sm:$0xff] %v3797_v50 }
  0x17   : > { %3526 = vmatprep.mubr.msk.bf16.mxu0 %vm437_vm1, %v422_v10  ;;  %v429_v20 = vpack.c.bf16 %v407_v17, %v406_v13  ;;  %3538 = vmatprep.mubr.msk.bf16.mxu1 %vm437_vm1, %v428_v16  ;;  %v409_v22 = vld [vmem:[%s3879_s24 + $0xa8] sm:$0xff]  ;;  %v424_v25 = vpack.c.bf16 %v397_v19, %v396_v18  ;;  %v410_v26 = vld [vmem:[%s3879_s24 + $0xb0] sm:$0xff]  ;;  %v411_v27 = vld [vmem:[%s3879_s24 + $0xb8] sm:$0xff]  ;;  %807 = vst [vmem:[#allocation2 + $0x70] sm:$0x3] %v3797_v50 }
  0x18   : > { %v430_v24 = vpack.c.bf16 %v409_v22, %v408_v21  ;;  %v412_v28 = vld [vmem:[%s3879_s24 + $0xc0] sm:$0xff]  ;;  %v413_v29 = vld [vmem:[%s3879_s24 + $0xc8] sm:$0xff]  ;;  %v431_v30 = vpack.c.bf16 %v411_v27, %v410_v26  ;;  %v398_v31 = vld [vmem:[%s3879_s24 + $0x50] sm:$0xff]  ;;  %808 = vst [vmem:[#allocation2 + $0x78] sm:$0xff] %v3797_v50 }
  0x19   : > { %3539 = vmatmul.mubr.msk.bf16.vlgmr.msra.gmra.mrb[0].mxu1 %vm437_vm1, %v429_v20  ;;  %v399_v32 = vld [vmem:[%s3879_s24 + $0x58] sm:$0xff]  ;;  %v432_v33 = vpack.c.bf16 %v413_v29, %v412_v28  ;;  %v400_v34 = vld [vmem:[%s3879_s24 + $0x60] sm:$0xff]  ;;  %v401_v35 = vld [vmem:[%s3879_s24 + $0x68] sm:$0xff]  ;;  %809 = vst [vmem:[#allocation2 + $0x80] sm:$0xff] %v3797_v50 }
  0x1a   : > { %3542 = vmatprep.mubr.msk.bf16.mxu1 %vm437_vm1, %v430_v24  ;;  %v425_v36 = vpack.c.bf16 %v399_v32, %v398_v31  ;;  %v426_v37 = vpack.c.bf16 %v401_v35, %v400_v34  ;;  %v414_v38 = vld [vmem:[%s3879_s24 + $0xd0] sm:$0xff]  ;;  %v415_v39 = vld [vmem:[%s3879_s24 + $0xd8] sm:$0xff]  ;;  %v416_v40 = vld [vmem:[%s3879_s24 + $0xe0] sm:$0xff]  ;;  %810 = vst [vmem:[#allocation2 + $0x88] sm:$0x3] %v3797_v50 }
  0x1b   : > { %v417_v41 = vld [vmem:[%s3879_s24 + $0xe8] sm:$0xff]  ;;  %v433_v42 = vpack.c.bf16 %v415_v39, %v414_v38  ;;  %v402_v43 = vld [vmem:[%s3879_s24 + $0x70] sm:$0xff]  ;;  %v403_v44 = vld [vmem:[%s3879_s24 + $0x78] sm:$0xff]  ;;  %811 = vst [vmem:[#allocation2 + $0x90] sm:$0xff] %v3797_v50 }
  0x1c   : > { %v434_v45 = vpack.c.bf16 %v417_v41, %v416_v40  ;;  %v427_v46 = vpack.c.bf16 %v403_v44, %v402_v43  ;;  %v418_v47 = vld [vmem:[%s3879_s24 + $0xf0] sm:$0xff]  ;;  %v419_v48 = vld [vmem:[%s3879_s24 + $0xf8] sm:$0xff]  ;;  %812 = vst [vmem:[#allocation2 + $0x98] sm:$0xff] %v3797_v50  ;;  %813 = vst [vmem:[#allocation2 + $0xa0] sm:$0x3] %v3797_v50 }
  0x1d   : > { %v435_v49 = vpack.c.bf16 %v419_v48, %v418_v47  ;;  %814 = vst [vmem:[#allocation2 + $0xa8] sm:$0xff] %v3797_v50  ;;  %815 = vst [vmem:[#allocation2 + $0xb0] sm:$0xff] %v3797_v50  ;;  %v934_v43 = vld [vmem:[%s6509_s4] sm:$0xff]  ;;  %v882_v48 = vld [vmem:[#allocation2 + $0x10] sm:$0x3] }
  0x1e   : > { %3527 = vmatmul.mubr.msk.bf16.gmra.mrb[4].mxu0 %vm437_vm1, %v423_v23  ;;  %816 = vst [vmem:[#allocation2 + $0xb8] sm:$0x3] %v3797_v50  ;;  %817 = vst [vmem:[#allocation2 + $0xc0] sm:$0xff] %v3797_v50 }
  0x1f   : > { %3530 = vmatprep.mubr.msk.bf16.mxu0 %vm437_vm1, %v424_v25  ;;  %818 = vst [vmem:[#allocation2 + $0xc8] sm:$0xff] %v3797_v50  ;;  %819 = vst [vmem:[#allocation2 + $0xd0] sm:$0x3] %v3797_v50  ;;  %v936_v25 = vlaneseq }
  0x20   : > { %820 = vst [vmem:[#allocation2 + $0xd8] sm:$0xff] %v3797_v50  ;;  %821 = vst [vmem:[#allocation2 + $0xe0] sm:$0xff] %v3797_v50 }
  0x21   : > { %3543 = vmatmul.mubr.msk.bf16.gmra.mrb[4].mxu1 %vm437_vm1, %v431_v30  ;;  %822 = vst [vmem:[#allocation2 + $0xe8] sm:$0x3] %v3797_v50  ;;  %823 = vst [vmem:[#allocation2 + $0xf0] sm:$0xff] %v3797_v50  ;;  %v3957_v35 = vshrl.u32 %v936_v25, 7 }
  0x22   : > { %3546 = vmatprep.mubr.msk.bf16.mxu1 %vm437_vm1, %v432_v33  ;;  %824 = vst [vmem:[#allocation2 + $0xf8] sm:$0xff] %v3797_v50  ;;  %825 = vst [vmem:[#allocation2 + $0x100] sm:$0x3] %v3797_v50 }
  0x23   : > { %826 = vst [vmem:[#allocation2 + $0x108] sm:$0xff] %v3797_v50  ;;  %827 = vst [vmem:[#allocation2 + $0x110] sm:$0xff] %v3797_v50 }
  0x24   : > { %828 = vst [vmem:[#allocation2 + $0x118] sm:$0x3] %v3797_v50  ;;  %829 = vst [vmem:[#allocation2 + $0x120] sm:$0xff] %v3797_v50 }
  0x25   : > { %830 = vst [vmem:[#allocation2 + $0x128] sm:$0xff] %v3797_v50  ;;  %831 = vst [vmem:[#allocation2 + $0x130] sm:$0x3] %v3797_v50 }
  0x26   : > { %3531 = vmatmul.mubr.msk.bf16.gmra.mrb[8].mxu0 %vm437_vm1, %v425_v36  ;;  %832 = vst [vmem:[#allocation2 + $0x138] sm:$0xff] %v3797_v50  ;;  %833 = vst [vmem:[#allocation2 + $0x140] sm:$0xff] %v3797_v50 }
  0x27   : > { %3534 = vmatprep.mubr.msk.bf16.mxu0 %vm437_vm1, %v426_v37  ;;  %834 = vst [vmem:[#allocation2 + $0x148] sm:$0x3] %v3797_v50  ;;  %835 = vst [vmem:[#allocation2 + $0x150] sm:$0xff] %v3797_v50 }
  0x28   : > { %836 = vst [vmem:[#allocation2 + $0x158] sm:$0xff] %v3797_v50  ;;  %837 = vst [vmem:[#allocation2 + $0x160] sm:$0x3] %v3797_v50 }
  0x29   : > { %3547 = vmatmul.mubr.msk.bf16.gmra.mrb[8].mxu1 %vm437_vm1, %v433_v42  ;;  %838 = vst [vmem:[#allocation2 + $0x168] sm:$0xff] %v3797_v50  ;;  %839 = vst [vmem:[#allocation2 + $0x170] sm:$0xff] %v3797_v50  ;;  %v1006_v42 = vsub.s32 1, %v3957_v35 }
  0x2a   : > { %3550 = vmatprep.mubr.msk.bf16.mxu1 %vm437_vm1, %v434_v45  ;;  %840 = vst [vmem:[#allocation2 + $0x178] sm:$0x3] %v3797_v50  ;;  %841 = vst [vmem:[#allocation2 + $0x180] sm:$0xff] %v3797_v50 }
  0x2b   : > { %842 = vst [vmem:[#allocation2 + $0x188] sm:$0xff] %v3797_v50  ;;  %843 = vst [vmem:[#allocation2 + $0x190] sm:$0x3] %v3797_v50  ;;  %v3973_v45 = vrot.slane %v934_v43, %v1006_v42 }
  0x2c   : > { %846 = vst [vmem:[#allocation2 + $0x1a8] sm:$0x3] %v3797_v50  ;;  %6618 = vst [vmem:[#allocation3_spill] sm:$0xff] %v3957_v35  ;;  %v6517_v50 = vsub.s32 0, %v3957_v35 }
  0x2e   : > { %3535 = vmatmul.mubr.msk.bf16.gmra.mrb[12].mxu0 %vm437_vm1, %v427_v46  ;;  %v1251_v46 = vsub.s32 2, %v3957_v35 }
  0x31   : > { %3551 = vmatmul.mubr.msk.bf16.gmra.mrb[12].mxu1 %vm437_vm1, %v435_v49 }
  0xe9   : > { %v3524_v52 = vpop.f32.mrb[0].mxu0 }
  0xea   : > { %v660_v54 = vmul.f32 %v3524_v52, %v3932_v51  ;;  %v524_v55 = vpop.f32.mrb[1].mxu0  ;;  %v1008_v52 = vmul.f32 0.0, %v3973_v45 }
  0xeb   : > { %v658_v56 = vmul.f32 %v3932_v51, %v524_v55  ;;  %v3525_v57 = vpop.f32.mrb[2].mxu0  ;;  %v3984_v55 = vrot.slane %v934_v43, %v1251_v46 }
  0xec   : > { %v699_v58 = vadd.f32 %v3937_v53, %v660_v54  ;;  %v661_v59 = vmul.f32 %v3525_v57, %v3932_v51  ;;  %v527_v60 = vpop.f32.mrb[3].mxu0  ;;  %v3540_v63 = vpop.f32.mrb[0].mxu1  ;;  %v3989_v57 = vrot.slane %v934_v43, %v6517_v50 }
  0xed   : > { %v697_v61 = vadd.f32 %v3937_v53, %v658_v56  ;;  %v659_v62 = vmul.f32 %v3932_v51, %v527_v60  ;;  %v676_v2 = vmul.f32 %v3540_v63, %v3932_v51  ;;  %v588_v3 = vpop.f32.mrb[1].mxu1  ;;  %6622 = vst [vmem:[#allocation7_spill] sm:$0xff] %v3984_v55  ;;  %v1010_v56 = vmul.f32 %v3973_v45, %v882_v48 }
  0xee   : > { %v731_v0 = vmax.f32 %v699_v58, 0.0  ;;  %v700_v1 = vadd.f32 %v3937_v53, %v661_v59  ;;  %v674_v6 = vmul.f32 %v3932_v51, %v588_v3  ;;  %v3541_v7 = vpop.f32.mrb[2].mxu1  ;;  %6623 = vst [vmem:[#allocation8_spill] sm:$0xff] %v3989_v57  ;;  %v1105_v58 = vrot.slane %v1008_v52, 1 }
  0xef   : > { %v729_v4 = vmax.f32 %v697_v61, 0.0  ;;  %v698_v5 = vadd.f32 %v3937_v53, %v659_v62  ;;  %v715_v10 = vadd.f32 %v3937_v53, %v676_v2  ;;  %v677_v11 = vmul.f32 %v3541_v7, %v3932_v51  ;;  %v3959_v37 = vpop.f32.mrb[3].mxu1 }
  0xf0   : > { %v763_v8 = vmin.f32 %v731_v0, 6.0  ;;  %v732_v9 = vmax.f32 %v700_v1, 0.0  ;;  %v713_v15 = vadd.f32 %v3937_v53, %v674_v6  ;;  %v1253_v59 = vmul.f32 0.0, %v3984_v55 }
  0xf1   : > { %v761_v12 = vmin.f32 %v729_v4, 6.0  ;;  %v730_v13 = vmax.f32 %v698_v5, 0.0  ;;  %v3528_v14 = vpop.f32.mrb[4].mxu0  ;;  %v747_v19 = vmax.f32 %v715_v10, 0.0  ;;  %v716_v20 = vadd.f32 %v3937_v53, %v677_v11 }
  0xf2   : > { %850 = vst [vmem:[#allocation2 + $0x31] sm:$0xff] %v763_v8  ;;  %v764_v16 = vmin.f32 %v732_v9, 6.0  ;;  %v664_v17 = vmul.f32 %v3528_v14, %v3932_v51  ;;  %v540_v18 = vpop.f32.mrb[5].mxu0  ;;  %v745_v24 = vmax.f32 %v713_v15, 0.0  ;;  %v1108_v60 = vrot.slane %v1010_v56, 1 }
  0xf3   : > { %848 = vst [vmem:[#allocation2 + $0x19] sm:$0xff] %v761_v12  ;;  %v762_v21 = vmin.f32 %v730_v13, 6.0  ;;  %v662_v22 = vmul.f32 %v3932_v51, %v540_v18  ;;  %v3529_v23 = vpop.f32.mrb[6].mxu0  ;;  %v779_v28 = vmin.f32 %v747_v19, 6.0  ;;  %v748_v29 = vmax.f32 %v716_v20, 0.0 }
  0xf4   : > { %851 = vst [vmem:[#allocation2 + $0x39] sm:$0xff] %v764_v16  ;;  %v703_v26 = vadd.f32 %v3937_v53, %v664_v17  ;;  %v543_v27 = vpop.f32.mrb[7].mxu0  ;;  %v777_v31 = vmin.f32 %v745_v24, 6.0  ;;  %v1255_v61 = vmul.f32 %v3984_v55, %v882_v48  ;;  %v1564_v62 = vsub.s32 4, %v3957_v35  ;;  %v4015_v17 = vld [vmem:[%s6509_s4 + $0x8] ss:$0 sm:$0xff] }
  0xf5   : > { %849 = vst [vmem:[#allocation2 + $0x21] sm:$0xff] %v762_v21  ;;  %v701_v30 = vadd.f32 %v3937_v53, %v662_v22  ;;  %866 = vst [vmem:[#allocation2 + $0xf1] sm:$0xff] %v779_v28  ;;  %v780_v33 = vmin.f32 %v748_v29, 6.0  ;;  %v940_v63 = vmul.f32 0.0, %v3989_v57  ;;  %v1350_v0 = vrot.slane %v1253_v59, 2 }
  0xf6   : > { %v735_v32 = vmax.f32 %v703_v26, 0.0  ;;  %864 = vst [vmem:[#allocation2 + $0xd9] sm:$0xff] %v777_v31  ;;  %v1109_v1 = vsel %vm1104_vm2, %v1105_v58, %v1108_v60  ;;  %v1353_v2 = vrot.slane %v1255_v61, 2  ;;  %v665_v3 = vmul.f32 %v3529_v23, %v3932_v51  ;;  %6627 = vst [vmem:[#allocation12_spill] sm:$0xff] %v4015_v17 }
  0xf7   : > { %v733_v34 = vmax.f32 %v701_v30, 0.0  ;;  %867 = vst [vmem:[#allocation2 + $0xf9] sm:$0xff] %v780_v33  ;;  %v2120_v4 = vsub.s32 7, %v3957_v35  ;;  %v1496_v6 = vsub.s32 3, %v3957_v35  ;;  %v663_v7 = vmul.f32 %v3932_v51, %v543_v27 }
  0xf8   : > { %v767_v36 = vmin.f32 %v735_v32, 6.0  ;;  %v4002_v8 = vrot.slane %v934_v43, %v1564_v62  ;;  %v1808_v9 = vsub.s32 5, %v3957_v35  ;;  %v1217_v10 = vadd.f32 %v1105_v58, %v940_v63 }
  0xf9   : > { %v765_v38 = vmin.f32 %v733_v34, 6.0  ;;  %v3961_v39 = vpop.f32.mrb[8].mxu0  ;;  %v1218_v11 = vadd.f32 %v1109_v1, %v940_v63  ;;  %v1354_v12 = vsel %vm1349_vm3, %v1350_v0, %v1353_v2  ;;  %v2052_v13 = vsub.s32 6, %v3957_v35  ;;  %v4008_v15 = vld [vmem:[#allocation2 + $0x30] sm:$0xff] }
  0xfa   : > { %854 = vst [vmem:[#allocation2 + $0x61] sm:$0xff] %v767_v36  ;;  %v3963_v40 = vpop.f32.mrb[9].mxu0  ;;  %6625 = vst [vmem:[#allocation10_spill] sm:$0xff] %v4002_v8  ;;  %v704_v14 = vadd.f32 %v3937_v53, %v665_v3  ;;  %v4010_v16 = vrot.slane %v934_v43, %v2120_v4  ;;  %v883_v18 = vld [vmem:[#allocation2 + $0x18] sm:$0xff]  ;;  %v4017_v19 = vrot.slane %v934_v43, %v1496_v6 }
  0xfb   : > { %852 = vst [vmem:[#allocation2 + $0x49] sm:$0xff] %v765_v38  ;;  %v3965_v41 = vpop.f32.mrb[10].mxu0  ;;  %v702_v20 = vadd.f32 %v3937_v53, %v663_v7  ;;  %v4020_v21 = vrot.slane %v934_v43, %v1808_v9  ;;  %v1462_v22 = vadd.f32 %v1350_v0, %v1217_v10  ;;  %v1463_v23 = vadd.f32 %v1354_v12, %v1218_v11  ;;  %v4061_v48 = vld [vmem:[#allocation2 + $0x38] sm:$0xff]  ;;  %v4063_v52 = vld [vmem:[#allocation2 + $0x40] sm:$0x3] }
  0xfc   : > { %v3971_v44 = vpop.f32.mrb[11].mxu0  ;;  %6626 = vst [vmem:[#allocation11_spill] sm:$0xff] %v4010_v16  ;;  %v4024_v24 = vmul.f32 %v3973_v45, %v4008_v15  ;;  %v4028_v25 = vmul.f32 %v4002_v8, %v4008_v15  ;;  %v884_v26 = vld [vmem:[#allocation2 + $0x20] sm:$0xff]  ;;  %v4030_v27 = vld [vmem:[#allocation2 + $0x28] sm:$0x3]  ;;  %v4032_v28 = vrot.slane %v934_v43, %v2052_v13  ;;  %v736_v29 = vmax.f32 %v704_v14, 0.0 }
  0xfd   : > { %6628 = vst [vmem:[#allocation13_spill] sm:$0xff] %v4020_v21  ;;  %v4036_v30 = vmul.f32 %v4010_v16, %v4008_v15  ;;  %v4040_v31 = vmul.f32 %v4015_v17, %v4008_v15  ;;  %v4043_v32 = vmul.f32 %v3973_v45, %v883_v18  ;;  %v4046_v33 = vmul.f32 %v3984_v55, %v883_v18 }
  0xfe   : > { %6629 = vst [vmem:[#allocation14_spill] sm:$0xff] %v4032_v28  ;;  %v4050_v34 = vmul.f32 %v3989_v57, %v4008_v15  ;;  %v4054_v36 = vmul.f32 %v3984_v55, %v4008_v15  ;;  %v1498_v38 = vmul.f32 %v4017_v19, %v883_v18  ;;  %v734_v42 = vmax.f32 %v702_v20, 0.0 }
  0xff   : > { %v1566_v43 = vmul.f32 %v4002_v8, %v883_v18  ;;  %v4059_v46 = vmul.f32 %v4020_v21, %v883_v18  ;;  %v1567_v56 = vmul.f32 %v4002_v8, %v884_v26  ;;  %v1568_v58 = vmul.f32 %v4002_v8, %v4030_v27 }
 0x100   : > { %v4072_v61 = vmul.f32 %v4020_v21, %v4008_v15  ;;  %v4075_v62 = vmul.f32 %v3989_v57, %v883_v18  ;;  %v1110_v1 = vrot.slane %v4043_v32, 1  ;;  %v1530_v3 = vadd.f32 %v1498_v38, %v1462_v22  ;;  %v4102_v22 = vpop.f32.mrb[4].mxu1 }
 0x101   : > { %v3976_v47 = vpop.f32.mrb[12].mxu0  ;;  %v4083_v4 = vmul.f32 %v3973_v45, %v4061_v48  ;;  %v4087_v6 = vmul.f32 %v3973_v45, %v4063_v52  ;;  %v1499_v7 = vmul.f32 %v4017_v19, %v884_v26  ;;  %v1662_v9 = vrot.slane %v1566_v43, 1  ;;  %6630 = vst [vmem:[#allocation15_spill] sm:$0xff] %v4102_v22 }
 0x102   : > { %6619 = vst [vmem:[#allocation4_spill] sm:$0xff] %v3976_v47  ;;  %v3978_v49 = vpop.f32.mrb[13].mxu0  ;;  %v1906_v10 = vrot.slane %v4059_v46, 2  ;;  %v1663_v11 = vrot.slane %v1567_v56, 1  ;;  %v1665_v12 = vrot.slane %v1568_v58, 1  ;;  %v4093_v13 = vmul.f32 %v3984_v55, %v4061_v48  ;;  %v4112_v56 = vpop.f32.mrb[5].mxu1 }
 0x103   : > { %6620 = vst [vmem:[#allocation5_spill] sm:$0xff] %v3978_v49  ;;  %v3982_v54 = vpop.f32.mrb[14].mxu0  ;;  %v4097_v14 = vmul.f32 %v4010_v16, %v4061_v48  ;;  %v1012_v18 = vmul.f32 %v3973_v45, %v884_v26  ;;  %v1013_v20 = vmul.f32 %v3973_v45, %v4030_v27  ;;  %v4106_v32 = vmul.f32 %v4010_v16, %v4063_v52  ;;  %v4117_v63 = vpop.f32.mrb[6].mxu1 }
 0x104   : > { %6621 = vst [vmem:[#allocation6_spill] sm:$0xff] %v3982_v54  ;;  %v3998_v5 = vpop.f32.mrb[15].mxu0  ;;  %v943_v38 = vmul.f32 %v3989_v57, %v884_v26  ;;  %v1811_v43 = vmul.f32 %v4020_v21, %v884_v26  ;;  %v1812_v46 = vmul.f32 %v4020_v21, %v4030_v27  ;;  %6631 = vst [vmem:[#allocation16_spill] sm:$0xff] %v4112_v56  ;;  %v768_v60 = vmin.f32 %v736_v29, 6.0 }
 0x105   : > { %6624 = vst [vmem:[#allocation9_spill] sm:$0xff] %v3998_v5  ;;  %v4115_v58 = vmul.f32 %v3984_v55, %v884_v26  ;;  %v1531_v50 = vadd.f32 %v1499_v7, %v1463_v23  ;;  %v766_v0 = vmin.f32 %v734_v42, 6.0  ;;  %6632 = vst [vmem:[#allocation17_spill] sm:$0xff] %v4117_v63  ;;  %v1664_v59 = vsel %vm1104_vm2, %v1662_v9, %v1663_v11  ;;  %v4125_v5 = vpop.f32.mrb[7].mxu1 }
 0x106   : > { %v1666_v2 = vsel %vm1104_vm2, %v1663_v11, %v1665_v12  ;;  %v668_v35 = vmul.f32 %v3961_v39, %v3932_v51  ;;  %v666_v22 = vmul.f32 %v3932_v51, %v3963_v40  ;;  %6633 = vst [vmem:[#allocation18_spill] sm:$0xff] %v4125_v5  ;;  %v1111_v56 = vrot.slane %v1012_v18, 1  ;;  %855 = vst [vmem:[#allocation2 + $0x69] sm:$0xff] %v768_v60 }
 0x107   : > { %v1113_v26 = vrot.slane %v1013_v20, 1  ;;  %853 = vst [vmem:[#allocation2 + $0x51] sm:$0xff] %v766_v0  ;;  %v669_v23 = vmul.f32 %v3965_v41, %v3932_v51  ;;  %v667_v29 = vmul.f32 %v3932_v51, %v3971_v44  ;;  %v1907_v42 = vrot.slane %v1811_v43, 2 }
 0x108   : > { %v1909_v7 = vrot.slane %v1812_v46, 2  ;;  %v707_v9 = vadd.f32 %v3937_v53, %v668_v35  ;;  %v705_v39 = vadd.f32 %v3937_v53, %v666_v22  ;;  %v1774_v11 = vadd.f32 %v1664_v59, %v1530_v3 }
 0x109   : > { %v1775_v40 = vadd.f32 %v1666_v2, %v1531_v50  ;;  %v708_v12 = vadd.f32 %v3937_v53, %v669_v23  ;;  %v706_v18 = vadd.f32 %v3937_v53, %v667_v29  ;;  %v1258_v60 = vmul.f32 %v3984_v55, %v4030_v27 }
 0x10a   : > { %v1356_v41 = vrot.slane %v4115_v58, 2  ;;  %v739_v0 = vmax.f32 %v707_v9, 0.0  ;;  %v737_v20 = vmax.f32 %v705_v39, 0.0  ;;  %v1112_v44 = vsel %vm1104_vm2, %v1110_v1, %v1111_v56 }
 0x10b   : > { %v1114_v43 = vsel %vm1104_vm2, %v1111_v56, %v1113_v26  ;;  %v740_v35 = vmax.f32 %v708_v12, 0.0  ;;  %v738_v46 = vmax.f32 %v706_v18, 0.0  ;;  %v1908_v59 = vsel %vm1349_vm3, %v1906_v10, %v1907_v42 }
 0x10c   : > { %v1910_v50 = vsel %vm1349_vm3, %v1907_v42, %v1909_v7  ;;  %v771_v2 = vmin.f32 %v739_v0, 6.0  ;;  %v769_v3 = vmin.f32 %v737_v20, 6.0  ;;  %v2018_v53 = vadd.f32 %v1908_v59, %v1774_v11 }
 0x10d   : > { %v2019_v22 = vadd.f32 %v1910_v50, %v1775_v40  ;;  %v772_v23 = vmin.f32 %v740_v35, 6.0  ;;  %v770_v27 = vmin.f32 %v738_v46, 6.0  ;;  %v1116_v58 = vrot.slane %v4083_v4, 1  ;;  %v4151_v4 = vpop.f32.mrb[8].mxu1 }
 0x10e   : > { %v1118_v29 = vrot.slane %v4087_v6, 1  ;;  %v1219_v1 = vadd.f32 %v1112_v44, %v4075_v62  ;;  %v1358_v9 = vrot.slane %v1258_v60, 2  ;;  %858 = vst [vmem:[#allocation2 + $0x91] sm:$0xff] %v771_v2  ;;  %856 = vst [vmem:[#allocation2 + $0x79] sm:$0xff] %v769_v3  ;;  %v2367_v10 = vmul.f32 %v4015_v17, %v4061_v48  ;;  %v4164_v60 = vpop.f32.mrb[9].mxu1 }
 0x10f   : > { %v1220_v56 = vadd.f32 %v1114_v43, %v943_v38  ;;  %v2054_v26 = vmul.f32 %v4032_v28, %v4008_v15  ;;  %v2055_v42 = vmul.f32 %v4032_v28, %v4061_v48  ;;  %859 = vst [vmem:[#allocation2 + $0x99] sm:$0xff] %v772_v23  ;;  %857 = vst [vmem:[#allocation2 + $0x81] sm:$0xff] %v770_v27  ;;  %v2219_v6 = vrot.slane %v4097_v14, 1 }
 0x110   : > { %6634 = vst [vmem:[#allocation19_spill] sm:$0xff] %v4151_v4  ;;  %v1261_v62 = vmul.f32 %v3984_v55, %v4063_v52  ;;  %v2221_v7 = vrot.slane %v4106_v32, 1  ;;  %v2368_v38 = vmul.f32 %v4015_v17, %v4063_v52  ;;  %v1570_v39 = vmul.f32 %v4002_v8, %v4061_v48  ;;  %6636 = vst [vmem:[#allocation20_spill] sm:$0xff] %v4164_v60 }
 0x111   : > { %v6635_v11 = vrot.slane %v4046_v33, 2  ;;  %v2086_v12 = vadd.f32 %v2054_v26, %v2018_v53  ;;  %v2087_v18 = vadd.f32 %v2055_v42, %v2019_v22  ;;  %v1571_v0 = vmul.f32 %v4002_v8, %v4063_v52 }
 0x112   : > { %v1814_v14 = vmul.f32 %v4020_v21, %v4061_v48  ;;  %v1359_v32 = vsel %vm1349_vm3, %v1356_v41, %v1358_v9  ;;  %v6637_v44 = vrot.slane %v4024_v24, 1  ;;  %v1119_v33 = vsel %vm1104_vm2, %v1116_v58, %v1118_v29 }
 0x113   : > { %v1357_v40 = vsel %vm1349_vm3, %v6635_v11, %v1356_v41  ;;  %v2463_v35 = vrot.slane %v2367_v10, 2  ;;  %v1465_v46 = vadd.f32 %v1359_v32, %v1220_v56  ;;  %v2222_v59 = vsel %vm1104_vm2, %v2219_v6, %v2221_v7 }
 0x114   : > { %v1464_v20 = vadd.f32 %v1357_v40, %v1219_v1  ;;  %v1117_v43 = vsel %vm1104_vm2, %v6637_v44, %v1116_v58  ;;  %v2465_v50 = vrot.slane %v2368_v38, 2  ;;  %v1500_v2 = vmul.f32 %v4017_v19, %v4008_v15 }
 0x115   : > { %v6638_v3 = vrot.slane %v4036_v30, 1  ;;  %v1668_v41 = vrot.slane %v1570_v39, 1  ;;  %v1501_v24 = vmul.f32 %v4017_v19, %v4061_v48  ;;  %v2331_v23 = vadd.f32 %v2222_v59, %v2087_v18 }
 0x116   : > { %v945_v27 = vmul.f32 %v3989_v57, %v4061_v48  ;;  %v1670_v58 = vrot.slane %v1571_v0, 1  ;;  %v1815_v29 = vmul.f32 %v4020_v21, %v4063_v52  ;;  %v1532_v1 = vadd.f32 %v1500_v2, %v1464_v20  ;;  %v4193_v48 = vpop.f32.mrb[10].mxu1  ;;  %v4206_v0 = vld [vmem:[%s6510_s5] ss:$0 sm:$0xff] }
 0x117   : > { %v2220_v53 = vsel %vm1104_vm2, %v6638_v3, %v2219_v6  ;;  %v1221_v15 = vadd.f32 %v1117_v43, %v4050_v34  ;;  %v1361_v30 = vrot.slane %v4093_v13, 2  ;;  %v1363_v9 = vrot.slane %v1261_v62, 2  ;;  %6640 = vst [vmem:[#allocation21_spill] sm:$0xff] %v4193_v48  ;;  %v892_v62 = vld [vmem:[#allocation2 + $0x60] sm:$0xff]  ;;  %v4199_v11 = vpop.f32.mrb[11].mxu1 }
 0x118   : > { %v2330_v22 = vadd.f32 %v2220_v53, %v2086_v12  ;;  %v1533_v10 = vadd.f32 %v1501_v24, %v1465_v46  ;;  %v1222_v56 = vadd.f32 %v1119_v33, %v945_v27  ;;  %v1912_v26 = vrot.slane %v1814_v14, 2  ;;  %6642 = vst [vmem:[#allocation22_spill] sm:$0xff] %v4199_v11  ;;  %v889_v33 = vld [vmem:[#allocation2 + $0x48] sm:$0xff] }
 0x119   : > { %v2466_v42 = vsel %vm1349_vm3, %v2463_v35, %v2465_v50  ;;  %v6639_v6 = vrot.slane %v4040_v31, 2  ;;  %v1360_v38 = vrot.slane %v4054_v36, 2  ;;  %v6641_v52 = vrot.slane %v4028_v25, 1 }
 0x11a   : > { %v2575_v13 = vadd.f32 %v2466_v42, %v2331_v23  ;;  %v1911_v40 = vrot.slane %v4072_v61, 2  ;;  %v1671_v12 = vsel %vm1104_vm2, %v1668_v41, %v1670_v58  ;;  %v1914_v31 = vrot.slane %v1815_v29, 2  ;;  %v4246_v23 = vpop.f32.mrb[12].mxu1 }
 0x11b   : > { %v2464_v7 = vsel %vm1349_vm3, %v6639_v6, %v2463_v35  ;;  %v1669_v34 = vsel %vm1104_vm2, %v6641_v52, %v1668_v41  ;;  %v1362_v25 = vsel %vm1349_vm3, %v1360_v38, %v1361_v30  ;;  %v1364_v36 = vsel %vm1349_vm3, %v1361_v30, %v1363_v9  ;;  %6644 = vst [vmem:[#allocation24_spill] sm:$0xff] %v4246_v23  ;;  %v910_v52 = vld [vmem:[#allocation2 + $0xf0] sm:$0xff] }
 0x11c   : > { %v2574_v39 = vadd.f32 %v2464_v7, %v2330_v22  ;;  %v1776_v18 = vadd.f32 %v1669_v34, %v1532_v1  ;;  %v1777_v14 = vadd.f32 %v1671_v12, %v1533_v10  ;;  %v4212_v32 = vmul.f32 %v3932_v51, %v3959_v37  ;;  %v4278_v12 = vld [vmem:[#allocation2 + $0x50] sm:$0xff] }
 0x11d   : > { %v1466_v20 = vadd.f32 %v1362_v25, %v1221_v15  ;;  %v4214_v61 = vadd.f32 %v1364_v36, %v1222_v56  ;;  %v1913_v44 = vsel %vm1349_vm3, %v1911_v40, %v1912_v26  ;;  %v4218_v43 = vmul.f32 %v3973_v45, %v892_v62  ;;  %v4258_v15 = vpop.f32.mrb[13].mxu1 }
 0x11e   : > { %6643 = vst [vmem:[#allocation23_spill] sm:$0xff] %v4212_v32  ;;  %v2613_v35 = vadd.f32 %v4206_v0, %v2574_v39  ;;  %v2614_v46 = vadd.f32 %v4206_v0, %v2575_v13  ;;  %v4223_v59 = vmul.f32 %v3984_v55, %v892_v62  ;;  %v4226_v50 = vmul.f32 %v4002_v8, %v892_v62  ;;  %v894_v39 = vld [vmem:[#allocation2 + $0x70] sm:$0x3] }
 0x11f   : > { %v1915_v51 = vsel %vm1349_vm3, %v1912_v26, %v1914_v31  ;;  %v2020_v37 = vadd.f32 %v1913_v44, %v1776_v18  ;;  %v4230_v2 = vmul.f32 %v3989_v57, %v892_v62  ;;  %v4233_v3 = vmul.f32 %v4020_v21, %v892_v62  ;;  %6645 = vst [vmem:[#allocation25_spill] sm:$0xff] %v4258_v15  ;;  %v4262_v26 = vpop.f32.mrb[14].mxu1 }
 0x120   : > { %v4235_v53 = vadd.f32 %v1915_v51, %v1777_v14  ;;  %v4238_v41 = vmul.f32 %v4010_v16, %v892_v62  ;;  %v4241_v24 = vmul.f32 %v4015_v17, %v892_v62  ;;  %v4244_v22 = vmul.f32 %v3973_v45, %v889_v33  ;;  %6646 = vst [vmem:[#allocation26_spill] sm:$0xff] %v4262_v26  ;;  %v4270_v34 = vpop.f32.mrb[15].mxu1  ;;  %v4288_v14 = vld [vmem:[#allocation2 + $0x58] sm:$0x3] }
 0x121   : > { %v4250_v58 = vmul.f32 %v4017_v19, %v892_v62  ;;  %v4253_v29 = vmul.f32 %v4032_v28, %v892_v62  ;;  %v4256_v1 = vmul.f32 %v3984_v55, %v889_v33  ;;  %v2645_v30 = vmax.f32 %v2613_v35, 0.0  ;;  %6647 = vst [vmem:[#allocation27_spill] sm:$0xff] %v4270_v34 }
 0x122   : > { %v2646_v9 = vmax.f32 %v2614_v46, 0.0  ;;  %v4266_v6 = vmul.f32 %v3989_v57, %v889_v33  ;;  %v1502_v7 = vmul.f32 %v4017_v19, %v889_v33  ;;  %v1572_v38 = vmul.f32 %v4002_v8, %v889_v33 }
 0x123   : > { %v4276_v40 = vmul.f32 %v4020_v21, %v889_v33  ;;  %v2056_v18 = vmul.f32 %v4032_v28, %v889_v33  ;;  %v4283_v25 = vmul.f32 %v4010_v16, %v889_v33  ;;  %v4286_v36 = vmul.f32 %v4015_v17, %v889_v33 }
 0x124   : > { %v4290_v44 = vmin.f32 %v2645_v30, 6.0  ;;  %v4292_v35 = vmin.f32 %v2646_v9, 6.0  ;;  %v4295_v46 = vmul.f32 %v3973_v45, %v910_v52  ;;  %v4298_v51 = vmul.f32 %v3984_v55, %v910_v52 }
 0x125   : > { %v1534_v42 = vadd.f32 %v1502_v7, %v1466_v20  ;;  %v1672_v56 = vrot.slane %v1572_v38, 1  ;;  %v1573_v31 = vmul.f32 %v4002_v8, %v4278_v12  ;;  %v4303_v33 = vmul.f32 %v4002_v8, %v910_v52  ;;  %v4316_v38 = vld [vmem:[#allocation2 + $0x68] sm:$0xff] }
 0x126   : > { %6648 = vst [vmem:[#allocation28_spill] sm:$0xff] %v4290_v44  ;;  %6649 = vst [vmem:[#allocation29_spill] sm:$0xff] %v4292_v35  ;;  %v1916_v13 = vrot.slane %v4276_v40, 2  ;;  %v1574_v30 = vmul.f32 %v4002_v8, %v4288_v14  ;;  %v4309_v9 = vmul.f32 %v4020_v21, %v910_v52  ;;  %v4312_v10 = vmul.f32 %v4010_v16, %v910_v52 }
 0x127   : > { %6650 = vst [vmem:[#allocation30_spill] sm:$0xff] %v4295_v46  ;;  %6651 = vst [vmem:[#allocation31_spill] sm:$0xff] %v4298_v51  ;;  %v2088_v27 = vadd.f32 %v2056_v18, %v2020_v37  ;;  %v2223_v20 = vrot.slane %v4283_v25, 1  ;;  %v4319_v62 = vmul.f32 %v3989_v57, %v910_v52  ;;  %v4323_v40 = vadd.f32 %v4292_v35, %v4290_v44  ;;  %v4330_v18 = vld [vmem:[#allocation2 + $0xd8] sm:$0xff] }
 0x128   : > { %6652 = vst [vmem:[#allocation32_spill] sm:$0xff] %v4303_v33  ;;  %6653 = vst [vmem:[#allocation33_spill] sm:$0xff] %v4309_v9  ;;  %v4328_v37 = vmul.f32 %v4017_v19, %v910_v52  ;;  %v1503_v25 = vmul.f32 %v4017_v19, %v4278_v12  ;;  %v1673_v7 = vrot.slane %v1573_v31, 1  ;;  %v4337_v35 = vmul.f32 %v3989_v57, %v4330_v18 }
 0x129   : > { %6654 = vst [vmem:[#allocation34_spill] sm:$0xff] %v4312_v10  ;;  %6655 = vst [vmem:[#allocation35_spill] sm:$0xff] %v4319_v62  ;;  %v4341_v34 = vmul.f32 %v3973_v45, %v4316_v38  ;;  %v1675_v26 = vrot.slane %v1574_v30, 1  ;;  %v1817_v31 = vmul.f32 %v4020_v21, %v4278_v12  ;;  %v4352_v62 = vmul.f32 %v3973_v45, %v4330_v18 }
 0x12a   : > { %6656 = vst [vmem:[#allocation36_spill] sm:$0xff] %v4323_v40  ;;  %6657 = vst [vmem:[#allocation37_spill] sm:$0xff] %v4328_v37  ;;  %v4346_v37 = vmul.f32 %v3973_v45, %v894_v39  ;;  %v4356_v33 = vmul.f32 %v3984_v55, %v4330_v18  ;;  %v4360_v30 = vmul.f32 %v3989_v57, %v4316_v38 }
 0x12b   : > { %6658 = vst [vmem:[#allocation38_spill] sm:$0xff] %v4330_v18  ;;  %6659 = vst [vmem:[#allocation39_spill] sm:$0xff] %v4337_v35  ;;  %v4364_v44 = vmul.f32 %v3984_v55, %v4316_v38  ;;  %v1818_v52 = vmul.f32 %v4020_v21, %v4288_v14  ;;  %v2126_v10 = vmul.f32 %v4010_v16, %v4278_v12 }
 0x12c   : > { %6660 = vst [vmem:[#allocation40_spill] sm:$0xff] %v4352_v62  ;;  %6661 = vst [vmem:[#allocation41_spill] sm:$0xff] %v4356_v33  ;;  %v4371_v9 = vmul.f32 %v3984_v55, %v894_v39  ;;  %v4375_v51 = vmul.f32 %v4002_v8, %v4316_v38  ;;  %v1535_v35 = vadd.f32 %v1503_v25, %v4214_v61  ;;  %v1128_v60 = vrot.slane %v4346_v37, 1 }
 0x12d   : > { %v1674_v46 = vsel %vm1104_vm2, %v1672_v56, %v1673_v7  ;;  %v4381_v23 = vmul.f32 %v4002_v8, %v894_v39  ;;  %v4385_v11 = vmul.f32 %v4020_v21, %v4316_v38  ;;  %v1676_v48 = vsel %vm1104_vm2, %v1673_v7, %v1675_v26 }
 0x12e   : > { %v1018_v4 = vmul.f32 %v3973_v45, %v4278_v12  ;;  %v1019_v61 = vmul.f32 %v3973_v45, %v4288_v14  ;;  %v1917_v56 = vrot.slane %v1817_v31, 2  ;;  %v1778_v25 = vadd.f32 %v1674_v46, %v1534_v42 }
 0x12f   : > { %v1919_v15 = vrot.slane %v1818_v52, 2  ;;  %v2224_v33 = vrot.slane %v2126_v10, 1  ;;  %v2370_v62 = vmul.f32 %v4015_v17, %v4278_v12  ;;  %v4398_v26 = vmul.f32 %v4020_v21, %v894_v39 }
 0x130   : > { %v1779_v7 = vadd.f32 %v1676_v48, %v1535_v35  ;;  %v2129_v63 = vmul.f32 %v4010_v16, %v4316_v38  ;;  %v2130_v42 = vmul.f32 %v4010_v16, %v894_v39  ;;  %v2127_v10 = vmul.f32 %v4010_v16, %v4288_v14 }
 0x131   : > { %v1121_v46 = vrot.slane %v1018_v4, 1  ;;  %v1123_v52 = vrot.slane %v1019_v61, 1  ;;  %v1263_v31 = vmul.f32 %v3984_v55, %v4278_v12  ;;  %v1918_v5 = vsel %vm1349_vm3, %v1916_v13, %v1917_v56 }
 0x132   : > { %v1920_v18 = vsel %vm1349_vm3, %v1917_v56, %v1919_v15  ;;  %v2022_v48 = vadd.f32 %v1918_v5, %v1778_v25  ;;  %v2225_v35 = vsel %vm1104_vm2, %v2223_v20, %v2224_v33  ;;  %v2468_v37 = vrot.slane %v2370_v62, 2 }
 0x133   : > { %v1264_v54 = vmul.f32 %v3984_v55, %v4288_v14  ;;  %v2023_v49 = vadd.f32 %v1920_v18, %v1779_v7  ;;  %v2057_v32 = vmul.f32 %v4032_v28, %v4278_v12  ;;  %v2332_v4 = vadd.f32 %v2225_v35, %v2088_v27 }
 0x134   : > { %v2229_v61 = vrot.slane %v2129_v63, 1  ;;  %v2373_v47 = vmul.f32 %v4015_v17, %v4316_v38  ;;  %v2226_v40 = vrot.slane %v2127_v10, 1  ;;  %v2371_v15 = vmul.f32 %v4015_v17, %v4288_v14 }
 0x135   : > { %v2374_v5 = vmul.f32 %v4015_v17, %v894_v39  ;;  %v1124_v13 = vsel %vm1104_vm2, %v1121_v46, %v1123_v52  ;;  %v2059_v62 = vmul.f32 %v4032_v28, %v4316_v38  ;;  %v2089_v20 = vadd.f32 %v2057_v32, %v4235_v53 }
 0x136   : > { %v2231_v18 = vrot.slane %v2130_v42, 1  ;;  %v947_v63 = vmul.f32 %v3989_v57, %v4278_v12  ;;  %v2090_v27 = vadd.f32 %v4253_v29, %v2022_v48  ;;  %v6662_v56 = vrot.slane %v4286_v36, 2 }
 0x137   : > { %v1366_v14 = vrot.slane %v1263_v31, 2  ;;  %v1368_v7 = vrot.slane %v1264_v54, 2  ;;  %v2091_v39 = vadd.f32 %v2059_v62, %v2023_v49  ;;  %v1680_v52 = vrot.slane %v4381_v23, 1 }
 0x138   : > { %v2469_v25 = vsel %vm1349_vm3, %v6662_v56, %v2468_v37  ;;  %v1224_v35 = vadd.f32 %v1124_v13, %v947_v63  ;;  %v2227_v17 = vsel %vm1104_vm2, %v2224_v33, %v2226_v40  ;;  %v2470_v32 = vrot.slane %v2371_v15, 2 }
 0x139   : > { %v2576_v10 = vadd.f32 %v2469_v25, %v2332_v4  ;;  %v6663_v53 = vrot.slane %v4238_v41, 1  ;;  %v2473_v42 = vrot.slane %v2373_v47, 2  ;;  %v6664_v29 = vrot.slane %v4244_v22, 1 }
 0x13a   : > { %v2333_v48 = vadd.f32 %v2227_v17, %v2089_v20  ;;  %v1922_v54 = vrot.slane %v4385_v11, 2  ;;  %v2232_v49 = vsel %vm1104_vm2, %v2229_v61, %v2231_v18  ;;  %v2475_v31 = vrot.slane %v2374_v5, 2 }
 0x13b   : > { %v2230_v12 = vsel %vm1104_vm2, %v6663_v53, %v2229_v61  ;;  %v1122_v36 = vsel %vm1104_vm2, %v6664_v29, %v1121_v46  ;;  %v6665_v4 = vrot.slane %v4341_v34, 1  ;;  %v6666_v33 = vrot.slane %v4218_v43, 1 }
 0x13c   : > { %v2334_v23 = vadd.f32 %v2230_v12, %v2090_v27  ;;  %v1369_v40 = vsel %vm1349_vm3, %v1366_v14, %v1368_v7  ;;  %v2335_v47 = vadd.f32 %v2232_v49, %v2091_v39  ;;  %v2615_v22 = vadd.f32 %v4206_v0, %v2576_v10  ;;  %v898_v27 = vld [vmem:[#allocation2 + $0x90] sm:$0xff] }
 0x13d   : > { %v1127_v41 = vsel %vm1104_vm2, %v6666_v33, %v6665_v4  ;;  %v6667_v46 = vmov %v6665_v4  ;;  %v1223_v11 = vadd.f32 %v1122_v36, %v4266_v6  ;;  %v1469_v61 = vadd.f32 %v1369_v40, %v1224_v35  ;;  %v895_v4 = vld [vmem:[#allocation2 + $0x78] sm:$0xff] }
 0x13e   : > { %v1129_v17 = vsel %vm1104_vm2, %v6667_v46, %v1128_v60  ;;  %v2471_v15 = vsel %vm1349_vm3, %v2468_v37, %v2470_v32  ;;  %v6668_v5 = vrot.slane %v4364_v44, 2  ;;  %v6669_v43 = vrot.slane %v4223_v59, 2 }
 0x13f   : > { %v1924_v62 = vrot.slane %v4398_v26, 2  ;;  %v6670_v20 = vrot.slane %v4241_v24, 2  ;;  %v2577_v34 = vadd.f32 %v2471_v15, %v2333_v48  ;;  %v1225_v60 = vadd.f32 %v1127_v41, %v4230_v2  ;;  %v6683_v15 = vld [vmem:[#allocation36_spill] sm:$0xff] }
 0x140   : > { %v1372_v13 = vsel %vm1349_vm3, %v6669_v43, %v6668_v5  ;;  %v2476_v6 = vsel %vm1349_vm3, %v2473_v42, %v2475_v31  ;;  %v1505_v37 = vmul.f32 %v4017_v19, %v4316_v38  ;;  %v1226_v59 = vadd.f32 %v1129_v17, %v4360_v30  ;;  %v6681_v17 = vld [vmem:[#allocation12_spill] sm:$0xff] }
 0x141   : > { %v2474_v18 = vsel %vm1349_vm3, %v6670_v20, %v2473_v42  ;;  %v6671_v56 = vrot.slane %v4256_v1, 2  ;;  %v2579_v25 = vadd.f32 %v2476_v6, %v2335_v47  ;;  %v2647_v24 = vmax.f32 %v2615_v22, 0.0  ;;  %v4540_v6 = vld [vmem:[#allocation2 + $0xa0] sm:$0x3] }
 0x142   : > { %v2578_v63 = vadd.f32 %v2474_v18, %v2334_v23  ;;  %v6672_v7 = vrot.slane %v4371_v9, 2  ;;  %v6673_v39 = vmov %v6668_v5  ;;  %v6674_v10 = vrot.slane %v4375_v51, 1 }
 0x143   : > { %v1367_v26 = vsel %vm1349_vm3, %v6671_v56, %v1366_v14  ;;  %v6675_v38 = vrot.slane %v4226_v50, 1  ;;  %v1537_v30 = vadd.f32 %v1505_v37, %v1469_v61  ;;  %v2616_v53 = vadd.f32 %v4206_v0, %v2577_v34 }
 0x144   : > { %v1374_v2 = vsel %vm1349_vm3, %v6673_v39, %v6672_v7  ;;  %v1468_v32 = vadd.f32 %v1367_v26, %v1223_v11  ;;  %v6676_v1 = vmov %v6674_v10  ;;  %v4484_v9 = vmul.f32 %v3973_v45, %v898_v27 }
 0x145   : > { %v1679_v35 = vsel %vm1104_vm2, %v6675_v38, %v6674_v10  ;;  %v1681_v14 = vsel %vm1104_vm2, %v6676_v1, %v1680_v52  ;;  %v4487_v44 = vmul.f32 %v3984_v55, %v898_v27  ;;  %v1470_v12 = vadd.f32 %v1372_v13, %v1225_v60  ;;  %v4565_v38 = vld [vmem:[#allocation2 + $0x80] sm:$0xff] }
 0x146   : > { %v6677_v42 = vrot.slane %v4233_v3, 2  ;;  %v4493_v29 = vsel %vm1349_vm3, %v1922_v54, %v1924_v62  ;;  %v2617_v51 = vadd.f32 %v4206_v0, %v2578_v63  ;;  %v4496_v36 = vadd.f32 %v1374_v2, %v1226_v59  ;;  %v4533_v62 = vld [vmem:[#allocation2 + $0x98] sm:$0xff] }
 0x147   : > { %v2618_v52 = vadd.f32 %v4206_v0, %v2579_v25  ;;  %v4499_v48 = vmin.f32 %v2647_v24, 6.0  ;;  %v4502_v49 = vmul.f32 %v4002_v8, %v898_v27  ;;  %v1536_v31 = vadd.f32 %v4250_v58, %v1468_v32 }
 0x148   : > { %v1923_v50 = vsel %vm1349_vm3, %v6677_v42, %v1922_v54  ;;  %v4505_v23 = vadd.f32 %v1681_v14, %v1537_v30  ;;  %v4508_v3 = vmul.f32 %v4020_v21, %v898_v27  ;;  %v4511_v54 = vmul.f32 %v4010_v16, %v898_v27 }
 0x149   : > { %6678 = vst [vmem:[#allocation42_spill] sm:$0xff] %v4499_v48  ;;  %v2648_v33 = vmax.f32 %v2616_v53, 0.0  ;;  %v4514_v41 = vmul.f32 %v3989_v57, %v898_v27  ;;  %v1135_v40 = vrot.slane %v4484_v9, 1  ;;  %v1380_v47 = vrot.slane %v4487_v44, 2 }
 0x14a   : > { %6679 = vst [vmem:[#allocation43_spill] sm:$0xff] %v4508_v3  ;;  %v2649_v22 = vmax.f32 %v2617_v51, 0.0  ;;  %v4519_v58 = vmul.f32 %v4017_v19, %v898_v27  ;;  %v4522_v46 = vmul.f32 %v4032_v28, %v898_v27  ;;  %v4525_v11 = vmul.f32 %v6681_v17, %v898_v27 }
 0x14b   : > { %v2650_v61 = vmax.f32 %v2618_v52, 0.0  ;;  %v2710_v5 = vadd.f32 %v6683_v15, %v4499_v48  ;;  %v4531_v13 = vmul.f32 %v3973_v45, %v895_v4  ;;  %v4538_v34 = vmul.f32 %v3984_v55, %v895_v4 }
 0x14c   : > { %6680 = vst [vmem:[#allocation44_spill] sm:$0xff] %v4519_v58  ;;  %6682 = vst [vmem:[#allocation12_spill] sm:$0xff] %v4525_v11  ;;  %v1780_v60 = vadd.f32 %v1679_v35, %v1536_v31  ;;  %v4542_v37 = vmin.f32 %v2648_v33, 6.0  ;;  %v1506_v63 = vmul.f32 %v4017_v19, %v895_v4  ;;  %v4546_v27 = vmul.f32 %v4002_v8, %v895_v4  ;;  %v4567_v35 = vld [vmem:[#allocation2 + $0x88] sm:$0x3] }
 0x14d   : > { %v4549_v59 = vmul.f32 %v4020_v21, %v895_v4  ;;  %v4551_v56 = vmin.f32 %v2649_v22, 6.0  ;;  %v4555_v25 = vmul.f32 %v3989_v57, %v895_v4  ;;  %v1027_v24 = vmul.f32 %v3973_v45, %v4533_v62 }
 0x14e   : > { %6684 = vst [vmem:[#allocation36_spill] sm:$0xff] %v4542_v37  ;;  %v4559_v7 = vmin.f32 %v2650_v61, 6.0  ;;  %v2711_v39 = vadd.f32 %v2710_v5, %v4542_v37  ;;  %v1130_v2 = vrot.slane %v4531_v13, 1  ;;  %v1028_v10 = vmul.f32 %v3973_v45, %v4540_v6 }
 0x14f   : > { %6685 = vst [vmem:[#allocation45_spill] sm:$0xff] %v4551_v56  ;;  %v2024_v30 = vadd.f32 %v1923_v50, %v1780_v60  ;;  %v4571_v1 = vmul.f32 %v4010_v16, %v895_v4  ;;  %v4574_v14 = vmul.f32 %v6681_v17, %v895_v4  ;;  %v1538_v53 = vadd.f32 %v1506_v63, %v1470_v12 }
 0x150   : > { %6686 = vst [vmem:[#allocation46_spill] sm:$0xff] %v4559_v7  ;;  %v1682_v9 = vrot.slane %v4546_v27, 1  ;;  %v1926_v42 = vrot.slane %v4549_v59, 2  ;;  %v2060_v51 = vmul.f32 %v4032_v28, %v895_v4  ;;  %v1136_v52 = vrot.slane %v1027_v24, 1 }
 0x151   : > { %v4581_v31 = vmul.f32 %v3984_v55, %v4533_v62  ;;  %v1024_v50 = vmul.f32 %v3973_v45, %v4565_v38  ;;  %v1025_v33 = vmul.f32 %v3973_v45, %v4567_v35  ;;  %v4588_v22 = vadd.f32 %v2711_v39, %v4551_v56 }
 0x152   : > { %v953_v12 = vmul.f32 %v3989_v57, %v4533_v62  ;;  %v1138_v61 = vrot.slane %v1028_v10, 1  ;;  %v4594_v4 = vmul.f32 %v3984_v55, %v4540_v6  ;;  %v4596_v15 = vadd.f32 %v2060_v51, %v2024_v30 }
 0x153   : > { %6687 = vst [vmem:[#allocation47_spill] sm:$0xff] %v4588_v22  ;;  %v1579_v60 = vmul.f32 %v4002_v8, %v4565_v38  ;;  %v4604_v63 = vmul.f32 %v4002_v8, %v4533_v62  ;;  %v4608_v27 = vmul.f32 %v4002_v8, %v4540_v6  ;;  %v4612_v59 = vmul.f32 %v4020_v21, %v4533_v62  ;;  %v6694_v22 = vld [vmem:[#allocation15_spill] sm:$0xff] }
 0x154   : > { %v1580_v24 = vmul.f32 %v4002_v8, %v4567_v35  ;;  %v1137_v39 = vsel %vm1104_vm2, %v1135_v40, %v1136_v52  ;;  %v6533_v10 = vrot.slane %v4581_v31, 2  ;;  %v1131_v30 = vrot.slane %v1024_v50, 1 }
 0x155   : > { %v1133_v51 = vrot.slane %v1025_v33, 1  ;;  %v1139_v26 = vsel %vm1104_vm2, %v1136_v52, %v1138_v61  ;;  %v4622_v43 = vmul.f32 %v4020_v21, %v4540_v6  ;;  %v4626_v18 = vmul.f32 %v4020_v21, %v4565_v38 }
 0x156   : > { %v4630_v32 = vmul.f32 %v3984_v55, %v4565_v38  ;;  %v4634_v40 = vmul.f32 %v3984_v55, %v4567_v35  ;;  %v1507_v52 = vmul.f32 %v4017_v19, %v4565_v38  ;;  %v1683_v50 = vrot.slane %v1579_v60, 1 }
 0x157   : > { %v4639_v33 = vadd.f32 %v1137_v39, %v4514_v41  ;;  %v1685_v20 = vrot.slane %v1580_v24, 1  ;;  %v4643_v5 = vadd.f32 %v1139_v26, %v953_v12  ;;  %v4650_v56 = vsel %vm1349_vm3, %v1380_v47, %v6533_v10 }
 0x158   : > { %v4654_v60 = vmul.f32 %v4010_v16, %v4533_v62  ;;  %v1134_v41 = vsel %vm1104_vm2, %v1131_v30, %v1133_v51  ;;  %v4659_v39 = vmul.f32 %v4010_v16, %v4540_v6  ;;  %v951_v26 = vmul.f32 %v3989_v57, %v4565_v38 }
 0x159   : > { %v4665_v12 = vmul.f32 %v4020_v21, %v4567_v35  ;;  %v6542_v44 = vrot.slane %v4626_v18, 2  ;;  %v1539_v13 = vadd.f32 %v1507_v52, %v4496_v36  ;;  %v1684_v51 = vsel %vm1104_vm2, %v1682_v9, %v1683_v50  ;;  %v4691_v36 = vld [vmem:[%s6507_s2] ss:$0 sm:$0xff] }
 0x15a   : > { %v4673_v61 = vsel %vm1104_vm2, %v1130_v2, %v1131_v30  ;;  %v4675_v10 = vadd.f32 %v1134_v41, %v951_v26  ;;  %v1686_v37 = vsel %vm1104_vm2, %v1683_v50, %v1685_v20  ;;  %v4680_v48 = vmul.f32 %v4010_v16, %v4565_v38  ;;  %6688 = vst [vmem:[#allocation48_spill] sm:$0xff] %v4691_v36  ;;  %v6689_v2 = vld [vmem:[#allocation4_spill] sm:$0xff]  ;;  %v4698_v20 = vld [vmem:[%s6508_s3] ss:$0 sm:$0xff]  ;;  %v6690_v30 = vld [vmem:[#allocation23_spill] sm:$0xff] }
 0x15b   : > { %v2025_v47 = vadd.f32 %v4493_v29, %v4505_v23  ;;  %v4686_v24 = vmul.f32 %v6681_v17, %v4565_v38  ;;  %v672_v9 = vmul.f32 %v4691_v36, %v6689_v2  ;;  %v714_v29 = vadd.f32 %v4698_v20, %v6690_v30  ;;  %v6691_v21 = vld [vmem:[#allocation5_spill] sm:$0xff] }
 0x15c   : > { %v1782_v23 = vadd.f32 %v1684_v51, %v1538_v53  ;;  %v1928_v52 = vsel %vm1349_vm3, %v1926_v42, %v6542_v44  ;;  %v1929_v50 = vrot.slane %v4665_v12, 2  ;;  %v2061_v41 = vmul.f32 %v4032_v28, %v4565_v38  ;;  %v6692_v51 = vld [vmem:[#allocation6_spill] sm:$0xff]  ;;  %v6693_v44 = vld [vmem:[#allocation9_spill] sm:$0xff] }
 0x15d   : > { %v1783_v26 = vadd.f32 %v1686_v37, %v1539_v13  ;;  %v711_v2 = vadd.f32 %v4698_v20, %v672_v9  ;;  %v746_v57 = vmax.f32 %v714_v29, 0.0  ;;  %v670_v55 = vmul.f32 %v4691_v36, %v6691_v21 }
 0x15e   : > { %v2133_v30 = vmul.f32 %v4010_v16, %v4567_v35  ;;  %v2234_v53 = vrot.slane %v4680_v48, 1  ;;  %v673_v42 = vmul.f32 %v4691_v36, %v6692_v51  ;;  %v671_v12 = vmul.f32 %v4691_v36, %v6693_v44  ;;  %v6695_v48 = vld [vmem:[#allocation16_spill] sm:$0xff]  ;;  %v6696_v44 = vld [vmem:[#allocation17_spill] sm:$0xff] }
 0x15f   : > { %v743_v37 = vmax.f32 %v711_v2, 0.0  ;;  %v778_v13 = vmin.f32 %v746_v57, 6.0  ;;  %v709_v9 = vadd.f32 %v4698_v20, %v670_v55  ;;  %v680_v16 = vmul.f32 %v4691_v36, %v6694_v22  ;;  %v6697_v2 = vld [vmem:[#allocation18_spill] sm:$0xff] }
 0x160   : > { %v712_v29 = vadd.f32 %v4698_v20, %v673_v42  ;;  %v710_v21 = vadd.f32 %v4698_v20, %v671_v12  ;;  %v678_v7 = vmul.f32 %v4691_v36, %v6695_v48  ;;  %v681_v38 = vmul.f32 %v4691_v36, %v6696_v44 }
 0x161   : > { %v775_v51 = vmin.f32 %v743_v37, 6.0  ;;  %865 = vst [vmem:[#allocation2 + $0xe1] sm:$0xff] %v778_v13  ;;  %v741_v8 = vmax.f32 %v709_v9, 0.0  ;;  %v679_v57 = vmul.f32 %v4691_v36, %v6697_v2  ;;  %v719_v42 = vadd.f32 %v4698_v20, %v680_v16 }
 0x162   : > { %v744_v55 = vmax.f32 %v712_v29, 0.0  ;;  %v742_v58 = vmax.f32 %v710_v21, 0.0  ;;  %v717_v12 = vadd.f32 %v4698_v20, %v678_v7  ;;  %v6698_v22 = vrot.slane %v4571_v1, 1 }
 0x163   : > { %862 = vst [vmem:[#allocation2 + $0xc1] sm:$0xff] %v775_v51  ;;  %v773_v37 = vmin.f32 %v741_v8, 6.0  ;;  %v720_v13 = vadd.f32 %v4698_v20, %v681_v38  ;;  %v718_v9 = vadd.f32 %v4698_v20, %v679_v57  ;;  %v751_v3 = vmax.f32 %v719_v42, 0.0 }
 0x164   : > { %v2235_v11 = vsel %vm1104_vm2, %v6698_v22, %v2234_v53  ;;  %v776_v48 = vmin.f32 %v744_v55, 6.0  ;;  %v774_v44 = vmin.f32 %v742_v58, 6.0  ;;  %v749_v2 = vmax.f32 %v717_v12, 0.0 }
 0x165   : > { %v2093_v29 = vadd.f32 %v2061_v41, %v2025_v47  ;;  %v2336_v21 = vadd.f32 %v2235_v11, %v4596_v15  ;;  %860 = vst [vmem:[#allocation2 + $0xa9] sm:$0xff] %v773_v37  ;;  %v752_v16 = vmax.f32 %v720_v13, 0.0  ;;  %v750_v7 = vmax.f32 %v718_v9, 0.0 }
 0x166   : > { %v2236_v36 = vrot.slane %v2133_v30, 1  ;;  %v2377_v1 = vmul.f32 %v6681_v17, %v4567_v35  ;;  %863 = vst [vmem:[#allocation2 + $0xc9] sm:$0xff] %v776_v48  ;;  %861 = vst [vmem:[#allocation2 + $0xb1] sm:$0xff] %v774_v44  ;;  %v783_v8 = vmin.f32 %v751_v3, 6.0  ;;  %v781_v38 = vmin.f32 %v749_v2, 6.0  ;;  %v4785_v44 = vld [vmem:[#allocation2 + $0xf8] sm:$0xff] }
 0x167   : > { %v6699_v51 = vrot.slane %v4626_v18, 2  ;;  %v2026_v57 = vadd.f32 %v1928_v52, %v1782_v23  ;;  %v784_v55 = vmin.f32 %v752_v16, 6.0  ;;  %v782_v47 = vmin.f32 %v750_v7, 6.0 }
 0x168   : > { %v6700_v11 = vrot.slane %v4594_v4, 2  ;;  %v6701_v15 = vrot.slane %v4581_v31, 2  ;;  %v2379_v35 = vmul.f32 %v6681_v17, %v4533_v62  ;;  %v6702_v3 = vrot.slane %v4686_v24, 2  ;;  %870 = vst [vmem:[#allocation2 + $0x121] sm:$0xff] %v783_v8  ;;  %868 = vst [vmem:[#allocation2 + $0x109] sm:$0xff] %v781_v38 }
 0x169   : > { %v1930_v58 = vsel %vm1349_vm3, %v6699_v51, %v1929_v50  ;;  %v6703_v42 = vrot.slane %v4574_v14, 2  ;;  %v2239_v23 = vrot.slane %v4654_v60, 1  ;;  %v2380_v4 = vmul.f32 %v6681_v17, %v4540_v6  ;;  %871 = vst [vmem:[#allocation2 + $0x129] sm:$0xff] %v784_v55  ;;  %869 = vst [vmem:[#allocation2 + $0x111] sm:$0xff] %v782_v47  ;;  %v6715_v55 = vld [vmem:[#allocation43_spill] sm:$0xff] }
 0x16a   : > { %v1384_v41 = vsel %vm1349_vm3, %v6701_v15, %v6700_v11  ;;  %v2027_v30 = vadd.f32 %v1930_v58, %v1783_v26  ;;  %v1227_v31 = vadd.f32 %v4673_v61, %v4555_v25  ;;  %v6704_v50 = vrot.slane %v4634_v40, 2 }
 0x16b   : > { %v2479_v18 = vsel %vm1349_vm3, %v6703_v42, %v6702_v3  ;;  %v6705_v26 = vrot.slane %v4630_v32, 2  ;;  %v2063_v12 = vmul.f32 %v4032_v28, %v4533_v62  ;;  %v2237_v60 = vsel %vm1104_vm2, %v2234_v53, %v2236_v36 }
 0x16c   : > { %v2580_v52 = vadd.f32 %v2479_v18, %v2336_v21  ;;  %v2480_v22 = vrot.slane %v2377_v1, 2  ;;  %v2241_v17 = vrot.slane %v4659_v39, 1  ;;  %v2094_v25 = vadd.f32 %v4522_v46, %v2026_v57 }
 0x16d   : > { %v1379_v14 = vsel %vm1349_vm3, %v6705_v26, %v6704_v50  ;;  %v2337_v61 = vadd.f32 %v2237_v60, %v2093_v29  ;;  %v4773_v40 = vadd.f32 %v4650_v56, %v4639_v33  ;;  %v1932_v37 = vrot.slane %v4612_v59, 2  ;;  %v4787_v56 = vld [vmem:[#allocation2 + $0x100] sm:$0x3] }
 0x16e   : > { %v1473_v6 = vadd.f32 %v1379_v14, %v4675_v10  ;;  %v1934_v13 = vrot.slane %v4622_v43, 2  ;;  %v2095_v9 = vadd.f32 %v2063_v12, %v2027_v30  ;;  %v2483_v48 = vrot.slane %v2379_v35, 2  ;;  %v6717_v30 = vld [vmem:[#allocation12_spill] sm:$0xff]  ;;  %v6724_v14 = vld [vmem:[#allocation47_spill] sm:$0xff] }
 0x16f   : > { %v6706_v36 = vmov %v6705_v26  ;;  %v6707_v53 = vrot.slane %v4538_v34, 2  ;;  %v1509_v46 = vmul.f32 %v4017_v19, %v4533_v62  ;;  %v2619_v10 = vadd.f32 %v4206_v0, %v2580_v52  ;;  %v6723_v26 = vld [vmem:[#allocation46_spill] sm:$0xff] }
 0x170   : > { %v6708_v59 = vrot.slane %v4511_v54, 1  ;;  %v2485_v33 = vrot.slane %v2380_v4, 2  ;;  %v6709_v32 = vmov %v6702_v3  ;;  %v2242_v29 = vsel %vm1104_vm2, %v2239_v23, %v2241_v17  ;;  %v6720_v4 = vld [vmem:[#allocation38_spill] sm:$0xff] }
 0x171   : > { %v1377_v39 = vsel %vm1349_vm3, %v6707_v53, %v6706_v36  ;;  %v2481_v34 = vsel %vm1349_vm3, %v6709_v32, %v2480_v22  ;;  %v1541_v21 = vadd.f32 %v1509_v46, %v1473_v6  ;;  %v6710_v7 = vrot.slane %v4604_v63, 1  ;;  %v6726_v6 = vld [vmem:[#allocation40_spill] sm:$0xff]  ;;  %v6731_v53 = vld [vmem:[#allocation13_spill] sm:$0xff] }
 0x172   : > { %v2240_v43 = vsel %vm1104_vm2, %v6708_v59, %v2239_v23  ;;  %v1472_v2 = vadd.f32 %v1377_v39, %v1227_v31  ;;  %v2581_v16 = vadd.f32 %v2481_v34, %v2337_v61  ;;  %v6711_v1 = vrot.slane %v4502_v49, 1  ;;  %v6721_v31 = vld [vmem:[#allocation10_spill] sm:$0xff]  ;;  %v6727_v61 = vld [vmem:[#allocation7_spill] sm:$0xff] }
 0x173   : > { %v2338_v62 = vadd.f32 %v2240_v43, %v2094_v25  ;;  %v2339_v54 = vadd.f32 %v2242_v29, %v2095_v9  ;;  %v4805_v38 = vmul.f32 %v3973_v45, %v4785_v44  ;;  %v1040_v24 = vmul.f32 %v3973_v45, %v4787_v56  ;;  %v4872_v34 = vld [vmem:[%s6509_s4 + $0x8] ss:$0 sm:$0xff]  ;;  %v6749_v43 = vld [vmem:[#allocation21_spill] sm:$0xff] }
 0x174   : > { %v4801_v8 = vsel %vm1104_vm2, %v6711_v1, %v6710_v7  ;;  %v4810_v51 = vadd.f32 %v1384_v41, %v4643_v5  ;;  %v6713_v58 = vrot.slane %v4608_v27, 1  ;;  %v6714_v57 = vmov %v6710_v7  ;;  %v6719_v27 = vld [vmem:[#allocation44_spill] sm:$0xff] }
 0x175   : > { %6712 = vst [vmem:[#allocation4_spill] sm:$0xff] %v4805_v38  ;;  %v6716_v47 = vrot.slane %v6715_v55, 2  ;;  %v2651_v15 = vmax.f32 %v2619_v10, 0.0  ;;  %v4823_v35 = vsel %vm1349_vm3, %v1932_v37, %v1934_v13  ;;  %v6718_v3 = vrot.slane %v6717_v30, 2 }
 0x176   : > { %v1691_v49 = vsel %vm1104_vm2, %v6714_v57, %v6713_v58  ;;  %v2486_v41 = vsel %vm1349_vm3, %v2483_v48, %v2485_v33  ;;  %v1540_v42 = vadd.f32 %v6719_v27, %v1472_v2  ;;  %v2620_v23 = vadd.f32 %v4206_v0, %v2581_v16  ;;  %v6734_v33 = vld [vmem:[#allocation11_spill] sm:$0xff] }
 0x177   : > { %v4820_v11 = vsel %vm1349_vm3, %v6716_v47, %v1932_v37  ;;  %v2484_v5 = vsel %vm1349_vm3, %v6718_v3, %v2483_v48  ;;  %v4830_v63 = vadd.f32 %v1691_v49, %v1541_v21  ;;  %v4835_v52 = vmul.f32 %v6721_v31, %v6720_v4  ;;  %v6737_v21 = vld [vmem:[#allocation8_spill] sm:$0xff] }
 0x178   : > { %v2582_v18 = vadd.f32 %v2484_v5, %v2338_v62  ;;  %v2583_v50 = vadd.f32 %v2486_v41, %v2339_v54  ;;  %v2713_v12 = vadd.f32 %v6724_v14, %v6723_v26  ;;  %v6556_v60 = vrot.slane %v4805_v38, 1  ;;  %v909_v14 = vld [vmem:[#allocation2 + $0xe8] sm:$0x3] }
 0x179   : > { %6722 = vst [vmem:[#allocation23_spill] sm:$0xff] %v4835_v52  ;;  %v1158_v22 = vrot.slane %v1040_v24, 1  ;;  %v4840_v17 = vmin.f32 %v2651_v15, 6.0  ;;  %v4845_v37 = vmul.f32 %v6727_v61, %v4785_v44  ;;  %v1285_v13 = vmul.f32 %v6727_v61, %v4787_v56 }
 0x17a   : > { %v4852_v36 = vmul.f32 %v4017_v19, %v6720_v4  ;;  %v4856_v39 = vmul.f32 %v6731_v53, %v6720_v4  ;;  %v4860_v46 = vmul.f32 %v4032_v28, %v6720_v4  ;;  %v2621_v10 = vadd.f32 %v4206_v0, %v2582_v18 }
 0x17b   : > { %6725 = vst [vmem:[#allocation5_spill] sm:$0xff] %v4840_v17  ;;  %6728 = vst [vmem:[#allocation6_spill] sm:$0xff] %v4845_v37  ;;  %v2652_v59 = vmax.f32 %v2620_v23, 0.0  ;;  %v4866_v2 = vmul.f32 %v6734_v33, %v6720_v4  ;;  %v2622_v32 = vadd.f32 %v4206_v0, %v2583_v50  ;;  %v4876_v29 = vmul.f32 %v4872_v34, %v6720_v4  ;;  %v4913_v50 = vld [vmem:[#allocation2 + $0xe0] sm:$0xff] }
 0x17c   : > { %6730 = vst [vmem:[#allocation9_spill] sm:$0xff] %v4852_v36  ;;  %6732 = vst [vmem:[#allocation15_spill] sm:$0xff] %v4856_v39  ;;  %v961_v62 = vmul.f32 %v6737_v21, %v4785_v44  ;;  %v1159_v16 = vsel %vm1104_vm2, %v6556_v60, %v1158_v22  ;;  %v2714_v7 = vadd.f32 %v2713_v12, %v4840_v17  ;;  %v6552_v0 = vrot.slane %v4845_v37, 2  ;;  %v6742_v12 = vld [vmem:[#allocation19_spill] sm:$0xff]  ;;  %v6743_v22 = vld [vmem:[#allocation48_spill] sm:$0xff] }
 0x17d   : > { %6733 = vst [vmem:[#allocation16_spill] sm:$0xff] %v4860_v46  ;;  %6735 = vst [vmem:[#allocation17_spill] sm:$0xff] %v4866_v2  ;;  %v1403_v1 = vrot.slane %v1285_v13, 2  ;;  %v4887_v54 = vmul.f32 %v6721_v31, %v4785_v44  ;;  %v1595_v58 = vmul.f32 %v6721_v31, %v4787_v56  ;;  %v4894_v57 = vmul.f32 %v6731_v53, %v4785_v44 }
 0x17e   : > { %6736 = vst [vmem:[#allocation18_spill] sm:$0xff] %v4876_v29  ;;  %v1839_v49 = vmul.f32 %v6731_v53, %v4787_v56  ;;  %v2653_v55 = vmax.f32 %v2621_v10, 0.0  ;;  %v4898_v47 = vmin.f32 %v2652_v59, 6.0  ;;  %v4902_v15 = vmul.f32 %v6734_v33, %v4785_v44 }
 0x17f   : > { %6738 = vst [vmem:[#allocation43_spill] sm:$0xff] %v4887_v54  ;;  %6739 = vst [vmem:[#allocation12_spill] sm:$0xff] %v4894_v57  ;;  %v2148_v30 = vmul.f32 %v6734_v33, %v4787_v56  ;;  %v2654_v3 = vmax.f32 %v2622_v32, 0.0  ;;  %v1238_v27 = vadd.f32 %v1159_v16, %v961_v62  ;;  %v1404_v23 = vsel %vm1349_vm3, %v6552_v0, %v1403_v1  ;;  %v6750_v0 = vld [vmem:[#allocation22_spill] sm:$0xff] }
 0x180   : > { %6740 = vst [vmem:[#allocation44_spill] sm:$0xff] %v4898_v47  ;;  %6741 = vst [vmem:[#allocation38_spill] sm:$0xff] %v4902_v15  ;;  %v2715_v18 = vadd.f32 %v2714_v7, %v4898_v47  ;;  %v6555_v4 = vrot.slane %v4887_v54, 1  ;;  %v684_v13 = vmul.f32 %v6743_v22, %v6742_v12  ;;  %v1710_v10 = vrot.slane %v1595_v58, 1 }
 0x181   : > { %v6554_v59 = vrot.slane %v4894_v57, 2  ;;  %v1954_v32 = vrot.slane %v1839_v49, 2  ;;  %v4920_v62 = vmul.f32 %v4872_v34, %v4787_v56  ;;  %v4922_v16 = vmin.f32 %v2653_v55, 6.0  ;;  %v6748_v56 = vld [vmem:[#allocation20_spill] sm:$0xff] }
 0x182   : > { %v6553_v7 = vrot.slane %v4902_v15, 1  ;;  %v2261_v1 = vrot.slane %v2148_v30, 1  ;;  %v1784_v41 = vadd.f32 %v4801_v8, %v1540_v42  ;;  %v4926_v5 = vmin.f32 %v2654_v3, 6.0 }
 0x183   : > { %6744 = vst [vmem:[#allocation10_spill] sm:$0xff] %v4920_v62  ;;  %6745 = vst [vmem:[#allocation47_spill] sm:$0xff] %v4922_v16  ;;  %v4928_v24 = vadd.f32 %v1404_v23, %v1238_v27  ;;  %v1036_v58 = vmul.f32 %v3973_v45, %v4913_v50  ;;  %v1037_v49 = vmul.f32 %v3973_v45, %v909_v14 }
 0x184   : > { %6746 = vst [vmem:[#allocation40_spill] sm:$0xff] %v4926_v5  ;;  %v4934_v12 = vadd.f32 %v4698_v20, %v684_v13  ;;  %v682_v55 = vmul.f32 %v6743_v22, %v6748_v56  ;;  %v685_v30 = vmul.f32 %v6743_v22, %v6749_v43  ;;  %v683_v8 = vmul.f32 %v6743_v22, %v6750_v0  ;;  %v904_v0 = vld [vmem:[#allocation2 + $0xc0] sm:$0xff] }
 0x185   : > { %6747 = vst [vmem:[#allocation7_spill] sm:$0xff] %v4928_v24  ;;  %v4943_v42 = vadd.f32 %v2715_v18, %v4922_v16  ;;  %v4948_v3 = vsel %vm1104_vm2, %v6555_v4, %v1710_v10  ;;  %v4953_v27 = vsel %vm1349_vm3, %v6554_v59, %v1954_v32  ;;  %v4959_v43 = vsel %vm1104_vm2, %v6553_v7, %v2261_v1  ;;  %v6757_v59 = vld [vmem:[#allocation25_spill] sm:$0xff] }
 0x186   : > { %6752 = vst [vmem:[#allocation19_spill] sm:$0xff] %v4948_v3  ;;  %6753 = vst [vmem:[#allocation48_spill] sm:$0xff] %v4953_v27  ;;  %v4963_v18 = vmul.f32 %v4017_v19, %v4785_v44  ;;  %v4966_v13 = vadd.f32 %v4820_v11, %v1784_v41  ;;  %v4970_v10 = vadd.f32 %v4823_v35, %v4830_v63  ;;  %v1151_v32 = vrot.slane %v1036_v58, 1  ;;  %v6756_v58 = vld [vmem:[#allocation24_spill] sm:$0xff]  ;;  %v901_v27 = vld [vmem:[#allocation2 + $0xa8] sm:$0xff] }
 0x187   : > { %6751 = vst [vmem:[#allocation8_spill] sm:$0xff] %v4943_v42  ;;  %6754 = vst [vmem:[#allocation20_spill] sm:$0xff] %v4959_v43  ;;  %v1153_v56 = vrot.slane %v1037_v49, 1  ;;  %v4974_v23 = vmul.f32 %v6727_v61, %v4913_v50  ;;  %v1282_v1 = vmul.f32 %v6727_v61, %v909_v14  ;;  %v4979_v44 = vadd.f32 %v4698_v20, %v682_v55 }
 0x188   : > { %v4982_v11 = vadd.f32 %v4698_v20, %v685_v30  ;;  %v4985_v41 = vadd.f32 %v4698_v20, %v683_v8  ;;  %v4988_v35 = vmul.f32 %v3973_v45, %v904_v0  ;;  %v959_v63 = vmul.f32 %v6737_v21, %v4913_v50 }
 0x189   : > { %6755 = vst [vmem:[#allocation21_spill] sm:$0xff] %v4974_v23  ;;  %v4994_v49 = vmul.f32 %v6743_v22, %v6756_v58  ;;  %v4998_v55 = vmul.f32 %v6743_v22, %v6757_v59  ;;  %v5001_v30 = vmul.f32 %v6727_v61, %v904_v0  ;;  %v5005_v8 = vmul.f32 %v6721_v31, %v4913_v50  ;;  %v5052_v59 = vld [vmem:[#allocation2 + $0xc8] sm:$0xff] }
 0x18a   : > { %v1592_v4 = vmul.f32 %v6721_v31, %v909_v14  ;;  %v5010_v48 = vmul.f32 %v6731_v53, %v4913_v50  ;;  %v5013_v58 = vmul.f32 %v6721_v31, %v904_v0  ;;  %v1154_v60 = vsel %vm1104_vm2, %v1151_v32, %v1153_v56 }
 0x18b   : > { %6758 = vst [vmem:[#allocation22_spill] sm:$0xff] %v5005_v8  ;;  %v1398_v7 = vrot.slane %v1282_v1, 2  ;;  %v5018_v25 = vmul.f32 %v6737_v21, %v904_v0  ;;  %v5021_v16 = vmul.f32 %v4017_v19, %v904_v0  ;;  %v5024_v47 = vmul.f32 %v6731_v53, %v904_v0 }
 0x18c   : > { %6759 = vst [vmem:[#allocation24_spill] sm:$0xff] %v5010_v48  ;;  %v1836_v17 = vmul.f32 %v6731_v53, %v909_v14  ;;  %v1145_v26 = vrot.slane %v4988_v35, 1  ;;  %v5029_v42 = vmul.f32 %v4032_v28, %v904_v0  ;;  %v5032_v56 = vmul.f32 %v6734_v33, %v904_v0 }
 0x18d   : > { %v5035_v1 = vmul.f32 %v4872_v34, %v904_v0  ;;  %v1236_v5 = vadd.f32 %v1154_v60, %v959_v63  ;;  %v5040_v62 = vmul.f32 %v6734_v33, %v4913_v50  ;;  %v2145_v29 = vmul.f32 %v6734_v33, %v909_v14 }
 0x18e   : > { %6760 = vst [vmem:[#allocation25_spill] sm:$0xff] %v5029_v42  ;;  %v6763_v43 = vrot.slane %v4974_v23, 2  ;;  %v5049_v2 = vmul.f32 %v4872_v34, %v4913_v50  ;;  %v2389_v0 = vmul.f32 %v4872_v34, %v909_v14  ;;  %v1705_v63 = vrot.slane %v1592_v4, 1  ;;  %v5065_v4 = vld [vmem:[#allocation2 + $0xd0] sm:$0x3] }
 0x18f   : > { %6761 = vst [vmem:[#allocation49_spill] sm:$0xff] %v5035_v1  ;;  %6762 = vst [vmem:[#allocation50_spill] sm:$0xff] %v5040_v62  ;;  %v6567_v46 = vrot.slane %v5010_v48, 2  ;;  %v1949_v42 = vrot.slane %v1836_v17, 2  ;;  %v6572_v3 = vrot.slane %v5040_v62, 1  ;;  %v2256_v60 = vrot.slane %v2145_v29, 1 }
 0x190   : > { %v1399_v15 = vsel %vm1349_vm3, %v6763_v43, %v1398_v7  ;;  %6764 = vst [vmem:[#allocation51_spill] sm:$0xff] %v5049_v2  ;;  %v6765_v43 = vrot.slane %v6726_v6, 1  ;;  %v1033_v17 = vmul.f32 %v3973_v45, %v5052_v59  ;;  %v5071_v35 = vmul.f32 %v4032_v28, %v4913_v50 }
 0x191   : > { %v1481_v14 = vadd.f32 %v1399_v15, %v1236_v5  ;;  %v2500_v57 = vrot.slane %v2389_v0, 2  ;;  %v5075_v6 = vmul.f32 %v3973_v45, %v901_v27  ;;  %v6768_v15 = vrot.slane %v5005_v8, 1 }
 0x192   : > { %v5062_v39 = vsel %vm1104_vm2, %v6765_v43, %v1151_v32  ;;  %6767 = vst [vmem:[#allocation53_spill] sm:$0xff] %v5071_v35  ;;  %v5085_v29 = vsel %vm1349_vm3, %v6567_v46, %v1949_v42  ;;  %v5088_v32 = vmul.f32 %v6737_v21, %v901_v27  ;;  %v5091_v43 = vmul.f32 %v6727_v61, %v901_v27 }
 0x193   : > { %6766 = vst [vmem:[#allocation52_spill] sm:$0xff] %v5062_v39  ;;  %v5080_v5 = vsel %vm1104_vm2, %v6768_v15, %v1705_v63  ;;  %6769 = vst [vmem:[#allocation54_spill] sm:$0xff] %v5085_v29  ;;  %v1510_v0 = vmul.f32 %v4017_v19, %v901_v27  ;;  %v5095_v7 = vmul.f32 %v6721_v31, %v901_v27  ;;  %v1146_v35 = vrot.slane %v1033_v17, 1  ;;  %v2750_v39 = vld [vmem:[%s6511_s6 + $0x10] sm:$0xff] }
 0x194   : > { %v1034_v63 = vmul.f32 %v3973_v45, %v5065_v4  ;;  %v5101_v15 = vmul.f32 %v6727_v61, %v5052_v59  ;;  %v5104_v42 = vadd.f32 %v4963_v18, %v1481_v14  ;;  %v5109_v46 = vsel %vm1104_vm2, %v6572_v3, %v2256_v60 }
 0x195   : > { %6771 = vst [vmem:[#allocation56_spill] sm:$0xff] %v5109_v46  ;;  %v5112_v1 = vmul.f32 %v6731_v53, %v901_v27  ;;  %v6772_v29 = vrot.slane %v5049_v2, 2  ;;  %v5121_v52 = vmul.f32 %v6734_v33, %v901_v27  ;;  %v5124_v18 = vmul.f32 %v4872_v34, %v901_v27 }
 0x196   : > { %6770 = vst [vmem:[#allocation55_spill] sm:$0xff] %v5104_v42  ;;  %v2064_v14 = vmul.f32 %v4032_v28, %v901_v27  ;;  %v5130_v17 = vmul.f32 %v6727_v61, %v5065_v4  ;;  %v1148_v54 = vrot.slane %v1034_v63, 1  ;;  %v1147_v2 = vsel %vm1104_vm2, %v1145_v26, %v1146_v35 }
 0x197   : > { %v5117_v48 = vsel %vm1349_vm3, %v6772_v29, %v2500_v57  ;;  %6774 = vst [vmem:[#allocation58_spill] sm:$0xff] %v5121_v52  ;;  %6775 = vst [vmem:[#allocation59_spill] sm:$0xff] %v5124_v18  ;;  %v5134_v57 = vmul.f32 %v6721_v31, %v5052_v59  ;;  %v5137_v29 = vadd.f32 %v1510_v0, %v4773_v40  ;;  %v6777_v3 = vrot.slane %v5001_v30, 2  ;;  %v2749_v30 = vld [vmem:[%s6511_s6 + $0x8] sm:$0xff] }
 0x198   : > { %6773 = vst [vmem:[#allocation57_spill] sm:$0xff] %v5117_v48  ;;  %v1391_v48 = vrot.slane %v5101_v15, 2  ;;  %v5143_v27 = vadd.f32 %v2064_v14, %v4966_v13  ;;  %v5148_v46 = vmul.f32 %v6721_v31, %v5065_v4  ;;  %v957_v0 = vmul.f32 %v6737_v21, %v5052_v59  ;;  %v5158_v15 = vld [vmem:[#allocation2 + $0xb0] sm:$0xff]  ;;  %v5160_v13 = vld [vmem:[#allocation2 + $0xb8] sm:$0x3] }
 0x199   : > { %v5156_v63 = vmul.f32 %v4017_v19, %v4913_v50  ;;  %v1393_v26 = vrot.slane %v5130_v17, 2  ;;  %v5166_v62 = vmul.f32 %v6731_v53, %v5052_v59  ;;  %v5170_v40 = vmul.f32 %v6731_v53, %v5065_v4 }
 0x19a   : > { %6776 = vst [vmem:[#allocation60_spill] sm:$0xff] %v5143_v27  ;;  %v1149_v60 = vsel %vm1104_vm2, %v1146_v35, %v1148_v54  ;;  %v1233_v50 = vadd.f32 %v1147_v2, %v5018_v25  ;;  %v1392_v42 = vsel %vm1349_vm3, %v6777_v3, %v1391_v48  ;;  %v6778_v17 = vmax.f32 %v4934_v12, 0.0  ;;  %v2748_v3 = vld [vmem:[%s6511_s6] sm:$0xff]  ;;  %v6779_v35 = vld [vmem:[#allocation26_spill] sm:$0xff] }
 0x19b   : > { %v1700_v14 = vrot.slane %v5148_v46, 1  ;;  %v5182_v24 = vmul.f32 %v3973_v45, %v5158_v15  ;;  %v1031_v36 = vmul.f32 %v3973_v45, %v5160_v13  ;;  %v5188_v54 = vmul.f32 %v6727_v61, %v5158_v15 }
 0x19c   : > { %v787_v8 = vmin.f32 %v6778_v17, 6.0  ;;  %v753_v25 = vmax.f32 %v4979_v44, 0.0  ;;  %v756_v2 = vmax.f32 %v4982_v11, 0.0  ;;  %v754_v12 = vmax.f32 %v4985_v41, 0.0  ;;  %v6780_v11 = vld [vmem:[#allocation27_spill] sm:$0xff] }
 0x19d   : > { %v727_v46 = vadd.f32 %v4698_v20, %v4994_v49  ;;  %v689_v44 = vmul.f32 %v6743_v22, %v6779_v35  ;;  %v687_v41 = vmul.f32 %v6743_v22, %v6780_v11  ;;  %v6579_v23 = vmov 0.0|0.0  }
 0x19e   : > { %874 = vst [vmem:[#allocation2 + $0x151] sm:$0xff] %v787_v8  ;;  %v725_v8 = vadd.f32 %v4698_v20, %v4998_v55  ;;  %v785_v17 = vmin.f32 %v753_v25, 6.0  ;;  %v788_v37 = vmin.f32 %v756_v2, 6.0  ;;  %v786_v49 = vmin.f32 %v754_v12, 6.0  ;;  %3672 = vmatprep.subr.bf16.mxu1 %v6579_v23  ;;  %v2751_v55 = vld [vmem:[%s6511_s6 + $0x18] sm:$0xff] }
 0x19f   : > { %v759_v9 = vmax.f32 %v727_v46, 0.0  ;;  %v728_v35 = vadd.f32 %v4698_v20, %v689_v44  ;;  %v726_v22 = vadd.f32 %v4698_v20, %v687_v41  ;;  %v3673_v25 = vpack.c.bf16 %v2749_v30, %v2748_v3 }
 0x1a0   : > { %v757_v38 = vmax.f32 %v725_v8, 0.0  ;;  %v1141_v2 = vrot.slane %v5182_v24, 1  ;;  %v1143_v12 = vrot.slane %v1031_v36, 1  ;;  %v1276_v46 = vmul.f32 %v6727_v61, %v5160_v13  ;;  %872 = vst [vmem:[#allocation2 + $0x139] sm:$0xff] %v785_v17  ;;  %875 = vst [vmem:[#allocation2 + $0x159] sm:$0xff] %v788_v37  ;;  %v2753_v37 = vld [vmem:[%s6511_s6 + $0x28] sm:$0xff] }
 0x1a1   : > { %873 = vst [vmem:[#allocation2 + $0x141] sm:$0xff] %v786_v49  ;;  %v791_v11 = vmin.f32 %v759_v9, 6.0  ;;  %v760_v18 = vmax.f32 %v728_v35, 0.0  ;;  %v758_v27 = vmax.f32 %v726_v22, 0.0  ;;  %3674 = vmatpush3.bf16.msra.mxu1 %v3673_v25  ;;  %v3676_v8 = vpack.c.bf16 %v2751_v55, %v2750_v39 }
 0x1a2   : > { %v789_v23 = vmin.f32 %v757_v38, 6.0  ;;  %v1234_v52 = vadd.f32 %v1149_v60, %v957_v0  ;;  %v1394_v44 = vsel %vm1349_vm3, %v1391_v48, %v1393_v26  ;;  %v6781_v20 = vrot.slane %v5134_v57, 1  ;;  %v2752_v38 = vld [vmem:[%s6511_s6 + $0x20] sm:$0xff] }
 0x1a3   : > { %v6782_v24 = vrot.slane %v5013_v58, 1  ;;  %878 = vst [vmem:[#allocation2 + $0x181] sm:$0xff] %v791_v11  ;;  %v6784_v3 = vmov 0.0|0.0   ;;  %v1942_v9 = vrot.slane %v5166_v62, 2  ;;  %v1386_v48 = vrot.slane %v5188_v54, 2  ;;  %v5236_v60 = vld [vmem:[#allocation2] sm:$0xff] }
 0x1a4   : > { %3675 = vmatprep.subr.bf16.mxu1 %v6784_v3  ;;  %876 = vst [vmem:[#allocation2 + $0x169] sm:$0xff] %v789_v23  ;;  %v792_v39 = vmin.f32 %v760_v18, 6.0  ;;  %v790_v58 = vmin.f32 %v758_v27, 6.0  ;;  %6785 = vst [vmem:[#allocation27_spill] sm:$0xff] %v5236_v60  ;;  %3586 = vmatprep.mubr.msk.f32.mxu1 %vm3799_vm4, %v5236_v60  ;;  %v1144_v0 = vsel %vm1104_vm2, %v1141_v2, %v1143_v12  ;;  %v1388_v26 = vrot.slane %v1276_v46, 2  ;;  %v2760_v62 = vld [vmem:[%s6511_s6 + $0x60] sm:$0xff] }
 0x1a5   : > { %v5225_v36 = vsel %vm1104_vm2, %v6782_v24, %v6781_v20  ;;  %v1585_v30 = vmul.f32 %v6721_v31, %v5158_v15  ;;  %v1586_v41 = vmul.f32 %v6721_v31, %v5160_v13  ;;  %v5245_v17 = vadd.f32 %v1392_v42, %v1233_v50  ;;  %3677 = vmatpush3.bf16.msra.mxu1 %v3676_v8 }
 0x1a6   : > { %6783 = vst [vmem:[#allocation26_spill] sm:$0xff] %v5225_v36  ;;  %v6786_v23 = vmov %v6781_v20  ;;  %v955_v27 = vmul.f32 %v6737_v21, %v5158_v15  ;;  %879 = vst [vmem:[#allocation2 + $0x189] sm:$0xff] %v792_v39  ;;  %v3679_v49 = vpack.c.bf16 %v2753_v37, %v2752_v38  ;;  %v1944_v55 = vrot.slane %v5170_v40, 2  ;;  %3678 = vmatprep.subr.bf16.mxu1 %v6784_v3  ;;  %v2755_v40 = vld [vmem:[%s6511_s6 + $0x38] sm:$0xff] }
 0x1a7   : > { %v5250_v18 = vsel %vm1104_vm2, %v6786_v23, %v1700_v14  ;;  %877 = vst [vmem:[#allocation2 + $0x171] sm:$0xff] %v790_v58  ;;  %v5257_v35 = vmul.f32 %v6734_v33, %v5052_v59  ;;  %v5261_v42 = vmul.f32 %v6734_v33, %v5158_v15  ;;  %v2139_v57 = vmul.f32 %v6734_v33, %v5160_v13  ;;  %v2754_v14 = vld [vmem:[%s6511_s6 + $0x30] sm:$0xff] }
 0x1a8   : > { %v1479_v50 = vadd.f32 %v1394_v44, %v1234_v52  ;;  %v5274_v22 = vmul.f32 %v6734_v33, %v5065_v4  ;;  %v1232_v25 = vadd.f32 %v1144_v0, %v955_v27  ;;  %v1511_v12 = vmul.f32 %v4017_v19, %v5158_v15  ;;  %v2756_v0 = vld [vmem:[%s6511_s6 + $0x40] sm:$0xff] }
 0x1a9   : > { %v6787_v46 = vrot.slane %v5075_v6, 1  ;;  %v1389_v8 = vsel %vm1349_vm3, %v1386_v48, %v1388_v26  ;;  %v1693_v20 = vrot.slane %v1585_v30, 1  ;;  %v1695_v24 = vrot.slane %v1586_v41, 1  ;;  %3680 = vmatpush3.bf16.msra.mxu1 %v3679_v49  ;;  %v2757_v26 = vld [vmem:[%s6511_s6 + $0x48] sm:$0xff] }
 0x1aa   : > { %v5286_v52 = vmul.f32 %v6731_v53, %v5158_v15  ;;  %v1830_v44 = vmul.f32 %v6731_v53, %v5160_v13  ;;  %v2065_v38 = vmul.f32 %v4032_v28, %v5158_v15  ;;  %v3682_v6 = vpack.c.bf16 %v2755_v40, %v2754_v14  ;;  %3681 = vmatprep.subr.bf16.mxu1 %v6784_v3 }
 0x1ab   : > { %v1142_v11 = vsel %vm1104_vm2, %v6787_v46, %v1141_v2  ;;  %v2244_v2 = vrot.slane %v5261_v42, 1  ;;  %v2246_v37 = vrot.slane %v2139_v57, 1  ;;  %v5295_v39 = vmul.f32 %v4872_v34, %v5158_v15 }
 0x1ac   : > { %v2383_v58 = vmul.f32 %v4872_v34, %v5160_v13  ;;  %v5308_v30 = vmul.f32 %v4872_v34, %v5052_v59  ;;  %v1477_v41 = vadd.f32 %v1389_v8, %v1232_v25  ;;  %v1543_v15 = vadd.f32 %v1511_v12, %v4810_v51 }
 0x1ad   : > { %v2097_v23 = vadd.f32 %v2065_v38, %v4970_v10  ;;  %v1547_v13 = vadd.f32 %v5156_v63, %v1479_v50  ;;  %v2249_v27 = vrot.slane %v5257_v35, 1  ;;  %v2386_v49 = vmul.f32 %v4872_v34, %v5065_v4  ;;  %3683 = vmatpush3.bf16.msra.mxu1 %v3682_v6  ;;  %v2758_v4 = vld [vmem:[%s6511_s6 + $0x50] sm:$0xff] }
 0x1ae   : > { %6788 = vst [vmem:[#allocation61_spill] sm:$0xff] %v5308_v30  ;;  %v1696_v57 = vsel %vm1104_vm2, %v1693_v20, %v1695_v24  ;;  %v1231_v14 = vadd.f32 %v1142_v11, %v5088_v32  ;;  %v1513_v40 = vmul.f32 %v4017_v19, %v5052_v59  ;;  %v1937_v25 = vrot.slane %v5286_v52, 2  ;;  %3684 = vmatprep.subr.bf16.mxu1 %v6784_v3  ;;  %v2759_v32 = vld [vmem:[%s6511_s6 + $0x58] sm:$0xff] }
 0x1af   : > { %v3685_v51 = vpack.c.bf16 %v2757_v26, %v2756_v0  ;;  %v1939_v12 = vrot.slane %v1830_v44, 2  ;;  %v2247_v10 = vsel %vm1104_vm2, %v2244_v2, %v2246_v37  ;;  %v2488_v63 = vrot.slane %v5295_v39, 2 }
 0x1b0   : > { %v2490_v35 = vrot.slane %v2383_v58, 2  ;;  %v1545_v50 = vadd.f32 %v1513_v40, %v1477_v41  ;;  %v6789_v46 = vrot.slane %v5095_v7, 1  ;;  %v1787_v8 = vadd.f32 %v1696_v57, %v1543_v15  ;;  %v5352_v58 = vld [vmem:[#allocation2 + $0x108] sm:$0xff]  ;;  %v918_v41 = vld [vmem:[#allocation2 + $0x130] sm:$0x3] }
 0x1b1   : > { %v2341_v24 = vadd.f32 %v2247_v10, %v2097_v23  ;;  %v2251_v52 = vrot.slane %v5274_v22, 1  ;;  %v6583_v44 = vrot.slane %v5308_v30, 2  ;;  %v2495_v38 = vrot.slane %v2386_v49, 2  ;;  %3686 = vmatpush3.bf16.msra.mxu1 %v3685_v51  ;;  %v5373_v23 = vld [vmem:[#allocation2 + $0x110] sm:$0xff]  ;;  %v915_v49 = vld [vmem:[#allocation2 + $0x118] sm:$0x3] }
 0x1b2   : > { %v1694_v11 = vsel %vm1104_vm2, %v6789_v46, %v1693_v20  ;;  %v6790_v6 = vrot.slane %v5091_v43, 2  ;;  %v6791_v39 = vrot.slane %v5024_v47, 2  ;;  %v1945_v22 = vsel %vm1349_vm3, %v1942_v9, %v1944_v55  ;;  %3687 = vmatprep.subr.bf16.mxu1 %v6784_v3  ;;  %v6803_v46 = vld [vmem:[#allocation60_spill] sm:$0xff] }
 0x1b3   : > { %v3688_v54 = vpack.c.bf16 %v2759_v32, %v2758_v4  ;;  %v6793_v43 = vrot.slane %v5032_v56, 1  ;;  %v1786_v0 = vadd.f32 %v1694_v11, %v5137_v29  ;;  %v1940_v47 = vsel %vm1349_vm3, %v1937_v25, %v1939_v12  ;;  %v2761_v56 = vld [vmem:[%s6511_s6 + $0x68] sm:$0xff]  ;;  %v2763_v32 = vld [vmem:[%s6511_s6 + $0x78] sm:$0xff]  ;;  %v5419_v11 = vld [vmem:[%s6510_s5] ss:$0 sm:$0xff] }
 0x1b4   : > { %v1387_v37 = vsel %vm1349_vm3, %v6790_v6, %v1386_v48  ;;  %v5347_v7 = vsel %vm1349_vm3, %v6791_v39, %v1942_v9  ;;  %v2491_v26 = vsel %vm1349_vm3, %v2488_v63, %v2490_v35  ;;  %v5370_v9 = vadd.f32 %v5080_v5, %v1547_v13  ;;  %6804 = vst [vmem:[#allocation60_spill] sm:$0xff] %v5419_v11 }
 0x1b5   : > { %6792 = vst [vmem:[#allocation62_spill] sm:$0xff] %v5347_v7  ;;  %v1476_v20 = vadd.f32 %v1387_v37, %v1231_v14  ;;  %v5357_v48 = vsel %vm1104_vm2, %v6793_v43, %v2249_v27  ;;  %v1789_v29 = vadd.f32 %v5250_v18, %v1545_v50  ;;  %v2031_v55 = vadd.f32 %v1940_v47, %v1787_v8 }
 0x1b6   : > { %6794 = vst [vmem:[#allocation63_spill] sm:$0xff] %v5357_v48  ;;  %6795 = vst [vmem:[#allocation64_spill] sm:$0xff] %v5370_v9  ;;  %v2585_v15 = vadd.f32 %v2491_v26, %v2341_v24  ;;  %v2252_v57 = vsel %vm1104_vm2, %v2249_v27, %v2251_v52  ;;  %v5379_v14 = vsel %vm1349_vm3, %v6583_v44, %v2495_v38  ;;  %v6798_v13 = vrot.slane %v5112_v1, 2  ;;  %v6805_v24 = vld [vmem:[#allocation59_spill] sm:$0xff] }
 0x1b7   : > { %6796 = vst [vmem:[#allocation65_spill] sm:$0xff] %v5379_v14  ;;  %v2067_v40 = vmul.f32 %v4032_v28, %v5052_v59  ;;  %v5385_v5 = vmul.f32 %v3973_v45, %v5352_v58  ;;  %v5388_v18 = vadd.f32 %v5021_v16, %v1476_v20  ;;  %v5394_v27 = vmul.f32 %v3973_v45, %v918_v41  ;;  %v6800_v59 = vld [vmem:[#allocation58_spill] sm:$0xff] }
 0x1b8   : > { %v1938_v51 = vsel %vm1349_vm3, %v6798_v13, %v1937_v25  ;;  %3689 = vmatpush3.bf16.msra.mxu1 %v3688_v54  ;;  %v3691_v12 = vpack.c.bf16 %v2761_v56, %v2760_v62  ;;  %v6801_v35 = vrot.slane %v6800_v59, 1  ;;  %v1042_v16 = vmul.f32 %v3973_v45, %v5373_v23  ;;  %v2762_v25 = vld [vmem:[%s6511_s6 + $0x70] sm:$0xff]  ;;  %v6823_v59 = vld [vmem:[#allocation30_spill] sm:$0xff] }
 0x1b9   : > { %6797 = vst [vmem:[#allocation66_spill] sm:$0xff] %v5388_v18  ;;  %v5396_v10 = vadd.f32 %v1938_v51, %v1786_v0  ;;  %v1043_v1 = vmul.f32 %v3973_v45, %v915_v49  ;;  %3690 = vmatprep.subr.bf16.mxu1 %v6784_v3  ;;  %v5413_v42 = vadd.f32 %v1945_v22, %v1789_v29  ;;  %v6806_v52 = vrot.slane %v6805_v24, 2  ;;  %v5439_v0 = vld [vmem:[#allocation2 + $0x120] sm:$0xff]  ;;  %v5531_v22 = vld [vmem:[#allocation2 + $0x178] sm:$0x3] }
 0x1ba   : > { %v2245_v4 = vsel %vm1104_vm2, %v6801_v35, %v2244_v2  ;;  %v2099_v50 = vadd.f32 %v2067_v40, %v2031_v55  ;;  %v2624_v8 = vadd.f32 %v5419_v11, %v2585_v15  ;;  %v1160_v6 = vrot.slane %v5385_v5, 1  ;;  %v5467_v35 = vld [vmem:[#allocation2 + $0x150] sm:$0xff] }
 0x1bb   : > { %6799 = vst [vmem:[#allocation67_spill] sm:$0xff] %v5396_v10  ;;  %6802 = vst [vmem:[#allocation58_spill] sm:$0xff] %v5413_v42  ;;  %v2340_v2 = vadd.f32 %v2245_v4, %v6803_v46  ;;  %v2489_v38 = vsel %vm1349_vm3, %v6806_v52, %v2488_v63  ;;  %v5427_v37 = vmul.f32 %v6727_v61, %v918_v41  ;;  %v5441_v63 = vld [vmem:[#allocation2 + $0x128] sm:$0xff]  ;;  %v1161_v47 = vrot.slane %v1042_v16, 1  ;;  %v5469_v4 = vld [vmem:[#allocation2 + $0x138] sm:$0xff] }
 0x1bc   : > { %v5430_v39 = vmul.f32 %v6721_v31, %v918_v41  ;;  %v5434_v20 = vmul.f32 %v6731_v53, %v918_v41  ;;  %v5437_v54 = vmul.f32 %v6734_v33, %v918_v41  ;;  %3692 = vmatpush3.bf16.msra.mxu1 %v3691_v12  ;;  %v3694_v43 = vpack.c.bf16 %v2763_v32, %v2762_v25  ;;  %v5471_v16 = vld [vmem:[#allocation2 + $0x140] sm:$0xff]  ;;  %v5488_v52 = vld [vmem:[#allocation2 + $0x158] sm:$0xff] }
 0x1bd   : > { %v1163_v26 = vrot.slane %v1043_v1, 1  ;;  %v5444_v62 = vmul.f32 %v6727_v61, %v915_v49  ;;  %v5447_v56 = vmul.f32 %v6721_v31, %v915_v49  ;;  %3693 = vmatprep.subr.bf16.mxu1 %v6784_v3  ;;  %v5450_v29 = vadd.f32 %v2252_v57, %v2099_v50  ;;  %6818 = vst [vmem:[#allocation78_spill] sm:$0xff] %v5488_v52  ;;  %v6821_v57 = vld [vmem:[#allocation4_spill] sm:$0xff] }
 0x1be   : > { %6807 = vst [vmem:[#allocation59_spill] sm:$0xff] %v5430_v39  ;;  %6808 = vst [vmem:[#allocation68_spill] sm:$0xff] %v5434_v20  ;;  %v2656_v55 = vmax.f32 %v2624_v8, 0.0  ;;  %v5453_v15 = vmul.f32 %v6731_v53, %v915_v49  ;;  %v5456_v40 = vmul.f32 %v6734_v33, %v915_v49  ;;  %v5458_v5 = vadd.f32 %v2489_v38, %v2340_v2  ;;  %v5490_v38 = vld [vmem:[#allocation2 + $0x148] sm:$0x3] }
 0x1bf   : > { %6809 = vst [vmem:[#allocation69_spill] sm:$0xff] %v5437_v54  ;;  %6810 = vst [vmem:[#allocation70_spill] sm:$0xff] %v5447_v56  ;;  %v5463_v12 = vmul.f32 %v4872_v34, %v918_v41  ;;  %v1044_v1 = vmul.f32 %v3973_v45, %v5439_v0  ;;  %v1045_v25 = vmul.f32 %v3973_v45, %v5441_v63  ;;  %v6822_v24 = vrot.slane %v6821_v57, 1  ;;  %v5517_v57 = vld [vmem:[#allocation2 + $0x168] sm:$0xff]  ;;  %v6832_v56 = vld [vmem:[#allocation21_spill] sm:$0xff] }
 0x1c0   : > { %6811 = vst [vmem:[#allocation71_spill] sm:$0xff] %v5450_v29  ;;  %6812 = vst [vmem:[#allocation72_spill] sm:$0xff] %v5453_v15  ;;  %3695 = vmatpush3.bf16.msra.mxu1 %v3694_v43  ;;  %v1164_v41 = vsel %vm1104_vm2, %v1161_v47, %v1163_v26  ;;  %v5481_v46 = vmul.f32 %v4872_v34, %v915_v49  ;;  %v5484_v2 = vmin.f32 %v2656_v55, 6.0  ;;  %v5494_v26 = vld [vmem:[#allocation2 + $0x160] sm:$0x3]  ;;  %v6824_v8 = vrot.slane %v6823_v59, 1 }
 0x1c1   : > { %6813 = vst [vmem:[#allocation73_spill] sm:$0xff] %v5456_v40  ;;  %6814 = vst [vmem:[#allocation74_spill] sm:$0xff] %v5458_v5  ;;  %3696 = vmatprep.subr.bf16.mxu1 %v6784_v3  ;;  %v962_v43 = vmul.f32 %v6737_v21, %v5352_v58  ;;  %v963_v34 = vmul.f32 %v6737_v21, %v5373_v23  ;;  %v1047_v49 = vmul.f32 %v3973_v45, %v5469_v4  ;;  %v5519_v59 = vld [vmem:[#allocation2 + $0x170] sm:$0xff] }
 0x1c2   : > { %6815 = vst [vmem:[#allocation75_spill] sm:$0xff] %v5463_v12  ;;  %6816 = vst [vmem:[#allocation76_spill] sm:$0xff] %v5481_v46  ;;  %v1048_v55 = vmul.f32 %v3973_v45, %v5471_v16  ;;  %v1050_v44 = vmul.f32 %v3973_v45, %v5467_v35  ;;  %v1157_v51 = vsel %vm1104_vm2, %v6824_v8, %v6822_v24  ;;  %v1165_v13 = vrot.slane %v1044_v1, 1  ;;  %v6828_v8 = vld [vmem:[#allocation52_spill] sm:$0xff]  ;;  %v6830_v29 = vld [vmem:[#allocation35_spill] sm:$0xff] }
 0x1c3   : > { %6817 = vst [vmem:[#allocation77_spill] sm:$0xff] %v5484_v2  ;;  %6819 = vst [vmem:[#allocation79_spill] sm:$0xff] %v5490_v38  ;;  %v1162_v50 = vsel %vm1104_vm2, %v1160_v6, %v1161_v47  ;;  %v1166_v32 = vrot.slane %v1045_v25, 1  ;;  %v1049_v3 = vmul.f32 %v3973_v45, %v5490_v38  ;;  %v964_v2 = vmul.f32 %v6737_v21, %v5439_v0  ;;  %v6827_v25 = vld [vmem:[#allocation39_spill] sm:$0xff] }
 0x1c4   : > { %6820 = vst [vmem:[#allocation80_spill] sm:$0xff] %v5494_v26  ;;  %v1051_v12 = vmul.f32 %v3973_v45, %v5488_v52  ;;  %6825 = vst [vmem:[#allocation4_spill] sm:$0xff] %v5517_v57  ;;  %v965_v6 = vmul.f32 %v6737_v21, %v5441_v63  ;;  %v968_v47 = vmul.f32 %v6737_v21, %v5467_v35  ;;  %v1170_v46 = vrot.slane %v1047_v49, 1 }
 0x1c5   : > { %6826 = vst [vmem:[#allocation30_spill] sm:$0xff] %v5519_v59  ;;  %v1052_v1 = vmul.f32 %v3973_v45, %v5494_v26  ;;  %v5529_v24 = vadd.f32 %v6828_v8, %v6827_v25  ;;  %6829 = vst [vmem:[#allocation39_spill] sm:$0xff] %v5531_v22  ;;  %v1171_v14 = vrot.slane %v1048_v55, 1  ;;  %v5534_v30 = vadd.f32 %v1157_v51, %v6830_v29 }
 0x1c6   : > { %v5536_v11 = vadd.f32 %v1162_v50, %v962_v43  ;;  %v1167_v5 = vsel %vm1104_vm2, %v1165_v13, %v1166_v32  ;;  %v6831_v48 = vrot.slane %v5394_v27, 1  ;;  %v1175_v40 = vrot.slane %v1050_v44, 1 }
 0x1c7   : > { %v5542_v33 = vadd.f32 %v1164_v41, %v963_v34  ;;  %v1173_v25 = vrot.slane %v1049_v3, 1  ;;  %v1053_v8 = vmul.f32 %v3973_v45, %v5517_v57  ;;  %v1054_v49 = vmul.f32 %v3973_v45, %v5519_v59 }
 0x1c8   : > { %v1169_v54 = vsel %vm1104_vm2, %v1166_v32, %v6831_v48  ;;  %v1176_v29 = vrot.slane %v1051_v12, 1  ;;  %v966_v51 = vmul.f32 %v6737_v21, %v5469_v4  ;;  %v1055_v13 = vmul.f32 %v3973_v45, %v5531_v22 }
 0x1c9   : > { %v1178_v27 = vrot.slane %v1052_v1, 1  ;;  %v1286_v44 = vmul.f32 %v6727_v61, %v5352_v58  ;;  %v1294_v3 = vmul.f32 %v6727_v61, %v5490_v38  ;;  %v967_v48 = vmul.f32 %v6737_v21, %v5471_v16 }
 0x1ca   : > { %v969_v41 = vmul.f32 %v6737_v21, %v5488_v52  ;;  %v1172_v12 = vsel %vm1104_vm2, %v1170_v46, %v1171_v14  ;;  %v970_v32 = vmul.f32 %v6737_v21, %v5517_v57  ;;  %v971_v45 = vmul.f32 %v6737_v21, %v5519_v59 }
 0x1cb   : > { %v1241_v50 = vadd.f32 %v1167_v5, %v964_v2  ;;  %v1242_v43 = vadd.f32 %v1169_v54, %v965_v6  ;;  %v1174_v34 = vsel %vm1104_vm2, %v1171_v14, %v1173_v25  ;;  %v1177_v55 = vsel %vm1104_vm2, %v1175_v40, %v1176_v29 }
 0x1cc   : > { %v1180_v1 = vrot.slane %v1053_v8, 1  ;;  %v1181_v42 = vrot.slane %v1054_v49, 1  ;;  %v1179_v10 = vsel %vm1104_vm2, %v1176_v29, %v1178_v27  ;;  %v1183_v60 = vrot.slane %v1055_v13, 1 }
 0x1cd   : > { %v1243_v28 = vadd.f32 %v1172_v12, %v966_v51  ;;  %v1287_v46 = vmul.f32 %v6727_v61, %v5373_v23  ;;  %v1289_v9 = vmul.f32 %v6727_v61, %v5439_v0  ;;  %v1290_v21 = vmul.f32 %v6727_v61, %v5441_v63 }
 0x1ce   : > { %v1292_v14 = vmul.f32 %v6727_v61, %v5469_v4  ;;  %v1293_v54 = vmul.f32 %v6727_v61, %v5471_v16  ;;  %v1244_v40 = vadd.f32 %v1174_v34, %v967_v48  ;;  %v1295_v5 = vmul.f32 %v6727_v61, %v5467_v35 }
 0x1cf   : > { %v1296_v2 = vmul.f32 %v6727_v61, %v5488_v52  ;;  %v1297_v6 = vmul.f32 %v6727_v61, %v5494_v26  ;;  %v1182_v25 = vsel %vm1104_vm2, %v1180_v1, %v1181_v42  ;;  %v1245_v8 = vadd.f32 %v1177_v55, %v968_v47 }
 0x1d0   : > { %v1298_v49 = vmul.f32 %v6727_v61, %v5517_v57  ;;  %v1299_v29 = vmul.f32 %v6727_v61, %v5519_v59  ;;  %v1184_v51 = vsel %vm1104_vm2, %v1181_v42, %v1183_v60  ;;  %v1300_v13 = vmul.f32 %v6727_v61, %v5531_v22  ;;  %v6834_v60 = vld [vmem:[#allocation41_spill] sm:$0xff] }
 0x1d1   : > { %v1405_v27 = vrot.slane %v1286_v44, 2  ;;  %v1406_v48 = vrot.slane %v1287_v46, 2  ;;  %v1410_v12 = vrot.slane %v1289_v9, 2  ;;  %v1411_v34 = vrot.slane %v1290_v21, 2  ;;  %v6836_v44 = vld [vmem:[#allocation6_spill] sm:$0xff]  ;;  %v6838_v9 = vld [vmem:[#allocation31_spill] sm:$0xff] }
 0x1d2   : > { %v1415_v7 = vrot.slane %v1292_v14, 2  ;;  %v1416_v20 = vrot.slane %v1293_v54, 2  ;;  %v1418_v15 = vrot.slane %v1294_v3, 2  ;;  %v1420_v1 = vrot.slane %v1295_v5, 2 }
 0x1d3   : > { %v1421_v47 = vrot.slane %v1296_v2, 2  ;;  %v1423_v55 = vrot.slane %v1297_v6, 2  ;;  %v1246_v53 = vadd.f32 %v1179_v10, %v969_v41  ;;  %v1247_v36 = vadd.f32 %v1182_v25, %v970_v32 }
 0x1d4   : > { %v1425_v18 = vrot.slane %v1298_v49, 2  ;;  %v1426_v39 = vrot.slane %v1299_v29, 2  ;;  %v6833_v26 = vrot.slane %v6832_v56, 2  ;;  %v6835_v42 = vrot.slane %v6834_v60, 2  ;;  %v6844_v60 = vld [vmem:[#allocation9_spill] sm:$0xff] }
 0x1d5   : > { %v6837_v46 = vrot.slane %v6836_v44, 2  ;;  %v6839_v21 = vrot.slane %v6838_v9, 2  ;;  %v1407_v3 = vsel %vm1349_vm3, %v1405_v27, %v1406_v48  ;;  %v1428_v54 = vrot.slane %v1300_v13, 2  ;;  %v6846_v9 = vld [vmem:[#allocation7_spill] sm:$0xff] }
 0x1d6   : > { %v1397_v61 = vsel %vm1349_vm3, %v6835_v42, %v6833_v26  ;;  %v1248_v5 = vadd.f32 %v1184_v51, %v971_v45  ;;  %v6840_v10 = vrot.slane %v5444_v62, 2  ;;  %v1412_v56 = vsel %vm1349_vm3, %v1410_v12, %v1411_v34 }
 0x1d7   : > { %v1402_v14 = vsel %vm1349_vm3, %v6839_v21, %v6837_v46  ;;  %v6841_v32 = vrot.slane %v5427_v37, 2  ;;  %v1417_v2 = vsel %vm1349_vm3, %v1415_v7, %v1416_v20  ;;  %v1419_v6 = vsel %vm1349_vm3, %v1416_v20, %v1418_v15 }
 0x1d8   : > { %v1409_v41 = vsel %vm1349_vm3, %v1406_v48, %v6840_v10  ;;  %v1422_v25 = vsel %vm1349_vm3, %v1420_v1, %v1421_v47  ;;  %v1424_v49 = vsel %vm1349_vm3, %v1421_v47, %v1423_v55  ;;  %v1427_v45 = vsel %vm1349_vm3, %v1425_v18, %v1426_v39  ;;  %v5620_v48 = vld [vmem:[#allocation2 + $0x180] sm:$0xff]  ;;  %v5622_v1 = vld [vmem:[#allocation2 + $0x188] sm:$0xff] }
 0x1d9   : > { %v1414_v26 = vsel %vm1349_vm3, %v1411_v34, %v6841_v32  ;;  %v1480_v62 = vadd.f32 %v1397_v61, %v5529_v24  ;;  %v1482_v29 = vadd.f32 %v1402_v14, %v5534_v30  ;;  %v1484_v51 = vadd.f32 %v1407_v3, %v5536_v11  ;;  %6842 = vst [vmem:[#allocation52_spill] sm:$0xff] %v5620_v48  ;;  %v6845_v61 = vld [vmem:[#allocation37_spill] sm:$0xff] }
 0x1da   : > { %v1429_v37 = vsel %vm1349_vm3, %v1426_v39, %v1428_v54  ;;  %v1485_v13 = vadd.f32 %v1409_v41, %v5542_v33  ;;  %v1486_v27 = vadd.f32 %v1412_v56, %v1241_v50  ;;  %v1487_v7 = vadd.f32 %v1414_v26, %v1242_v43  ;;  %6843 = vst [vmem:[#allocation35_spill] sm:$0xff] %v5622_v1 }
 0x1db   : > { %v1488_v20 = vadd.f32 %v1417_v2, %v1243_v28  ;;  %v1489_v15 = vadd.f32 %v1419_v6, %v1244_v40  ;;  %v1490_v12 = vadd.f32 %v1422_v25, %v1245_v8  ;;  %v1491_v34 = vadd.f32 %v1424_v49, %v1246_v53  ;;  %v5654_v2 = vld [vmem:[#allocation2 + $0x190] sm:$0x3] }
 0x1dc   : > { %v1492_v18 = vadd.f32 %v1427_v45, %v1247_v36  ;;  %v1518_v30 = vmul.f32 %v4017_v19, %v5352_v58  ;;  %v1519_v11 = vmul.f32 %v4017_v19, %v5373_v23  ;;  %v1520_v33 = vmul.f32 %v4017_v19, %v5439_v0  ;;  %6847 = vst [vmem:[#allocation21_spill] sm:$0xff] %v5654_v2 }
 0x1dd   : > { %v1521_v39 = vmul.f32 %v4017_v19, %v5441_v63  ;;  %v1522_v28 = vmul.f32 %v4017_v19, %v5469_v4  ;;  %v1523_v53 = vmul.f32 %v4017_v19, %v5471_v16  ;;  %v1524_v36 = vmul.f32 %v4017_v19, %v5467_v35 }
 0x1de   : > { %v1525_v24 = vmul.f32 %v4017_v19, %v5488_v52  ;;  %v1526_v50 = vmul.f32 %v4017_v19, %v5517_v57  ;;  %v1527_v43 = vmul.f32 %v4017_v19, %v5519_v59  ;;  %v1528_v40 = vmul.f32 %v4017_v19, %v5620_v48 }
 0x1df   : > { %v1604_v8 = vmul.f32 %v6721_v31, %v5490_v38  ;;  %v1493_v47 = vadd.f32 %v1429_v37, %v1248_v5  ;;  %v1529_v55 = vmul.f32 %v4017_v19, %v5622_v1  ;;  %v1546_v42 = vadd.f32 %v6844_v60, %v5245_v17  ;;  %v6848_v37 = vld [vmem:[#allocation80_spill] sm:$0xff]  ;;  %v6851_v60 = vld [vmem:[#allocation23_spill] sm:$0xff] }
 0x1e0   : > { %v1548_v44 = vadd.f32 %v6845_v61, %v1480_v62  ;;  %v1550_v46 = vadd.f32 %v1518_v30, %v1482_v29  ;;  %v1551_v21 = vadd.f32 %v1519_v11, %v6846_v9  ;;  %v1552_v14 = vadd.f32 %v1520_v33, %v1484_v51 }
 0x1e1   : > { %v1553_v3 = vadd.f32 %v1521_v39, %v1485_v13  ;;  %v1554_v54 = vadd.f32 %v1522_v28, %v1486_v27  ;;  %v1555_v10 = vadd.f32 %v1523_v53, %v1487_v7  ;;  %v1556_v41 = vadd.f32 %v1524_v36, %v1488_v20 }
 0x1e2   : > { %v1557_v56 = vadd.f32 %v1525_v24, %v1489_v15  ;;  %v1558_v32 = vadd.f32 %v1526_v50, %v1490_v12  ;;  %v1559_v26 = vadd.f32 %v1527_v43, %v1491_v34  ;;  %v1560_v5 = vadd.f32 %v1528_v40, %v1492_v18 }
 0x1e3   : > { %v1596_v19 = vmul.f32 %v6721_v31, %v5352_v58  ;;  %v1597_v17 = vmul.f32 %v6721_v31, %v5373_v23  ;;  %v1599_v6 = vmul.f32 %v6721_v31, %v5439_v0  ;;  %v1600_v25 = vmul.f32 %v6721_v31, %v5441_v63 }
 0x1e4   : > { %v1561_v49 = vadd.f32 %v1529_v55, %v1493_v47  ;;  %v1602_v45 = vmul.f32 %v6721_v31, %v5469_v4  ;;  %v1603_v62 = vmul.f32 %v6721_v31, %v5471_v16  ;;  %v1605_v29 = vmul.f32 %v6721_v31, %v5467_v35  ;;  %v6849_v47 = vld [vmem:[#allocation22_spill] sm:$0xff] }
 0x1e5   : > { %v1606_v51 = vmul.f32 %v6721_v31, %v5488_v52  ;;  %v1607_v13 = vmul.f32 %v6721_v31, %v6848_v37  ;;  %v1608_v27 = vmul.f32 %v6721_v31, %v5517_v57  ;;  %v1609_v7 = vmul.f32 %v6721_v31, %v5519_v59 }
 0x1e6   : > { %v1610_v20 = vmul.f32 %v6721_v31, %v5531_v22  ;;  %v1611_v15 = vmul.f32 %v6721_v31, %v5620_v48  ;;  %v1612_v12 = vmul.f32 %v6721_v31, %v5622_v1  ;;  %v1613_v34 = vmul.f32 %v6721_v31, %v5654_v2 }
 0x1e7   : > { %v1712_v18 = vrot.slane %v1596_v19, 1  ;;  %v1713_v30 = vrot.slane %v1597_v17, 1  ;;  %v1717_v11 = vrot.slane %v1599_v6, 1  ;;  %v1718_v33 = vrot.slane %v1600_v25, 1  ;;  %v6853_v17 = vld [vmem:[#allocation43_spill] sm:$0xff]  ;;  %v6855_v25 = vld [vmem:[#allocation32_spill] sm:$0xff] }
 0x1e8   : > { %v1722_v39 = vrot.slane %v1602_v45, 1  ;;  %v1723_v28 = vrot.slane %v1603_v62, 1  ;;  %v1725_v53 = vrot.slane %v1604_v8, 1  ;;  %v1727_v36 = vrot.slane %v1605_v29, 1  ;;  %v6857_v29 = vld [vmem:[#allocation70_spill] sm:$0xff] }
 0x1e9   : > { %v1728_v24 = vrot.slane %v1606_v51, 1  ;;  %v1730_v50 = vrot.slane %v1607_v13, 1  ;;  %v1732_v43 = vrot.slane %v1608_v27, 1  ;;  %v1733_v40 = vrot.slane %v1609_v7, 1 }
 0x1ea   : > { %v6850_v55 = vrot.slane %v6849_v47, 1  ;;  %v6852_v61 = vrot.slane %v6851_v60, 1  ;;  %v1735_v1 = vrot.slane %v1610_v20, 1  ;;  %v1737_v31 = vrot.slane %v1611_v15, 1  ;;  %v6859_v47 = vld [vmem:[#allocation59_spill] sm:$0xff] }
 0x1eb   : > { %v1738_v19 = vrot.slane %v1612_v12, 1  ;;  %v6854_v6 = vrot.slane %v6853_v17, 1  ;;  %v6856_v45 = vrot.slane %v6855_v25, 1  ;;  %v1714_v62 = vsel %vm1104_vm2, %v1712_v18, %v1713_v30  ;;  %v6861_v17 = vld [vmem:[#allocation66_spill] sm:$0xff] }
 0x1ec   : > { %v1704_v9 = vsel %vm1104_vm2, %v6852_v61, %v6850_v55  ;;  %v6858_v51 = vrot.slane %v6857_v29, 1  ;;  %v1740_v27 = vrot.slane %v1613_v34, 1  ;;  %v1719_v7 = vsel %vm1104_vm2, %v1717_v11, %v1718_v33 }
 0x1ed   : > { %v1709_v8 = vsel %vm1104_vm2, %v6856_v45, %v6854_v6  ;;  %v6860_v55 = vrot.slane %v6859_v47, 1  ;;  %v1724_v15 = vsel %vm1104_vm2, %v1722_v39, %v1723_v28  ;;  %v1726_v12 = vsel %vm1104_vm2, %v1723_v28, %v1725_v53  ;;  %v6862_v6 = vld [vmem:[#allocation26_spill] sm:$0xff]  ;;  %v6863_v28 = vld [vmem:[#allocation55_spill] sm:$0xff] }
 0x1ee   : > { %v1716_v13 = vsel %vm1104_vm2, %v1713_v30, %v6858_v51  ;;  %v1729_v60 = vsel %vm1104_vm2, %v1727_v36, %v1728_v24  ;;  %v1731_v61 = vsel %vm1104_vm2, %v1728_v24, %v1730_v50  ;;  %v1734_v18 = vsel %vm1104_vm2, %v1732_v43, %v1733_v40  ;;  %v6864_v53 = vld [vmem:[#allocation19_spill] sm:$0xff] }
 0x1ef   : > { %v1721_v20 = vsel %vm1104_vm2, %v1718_v33, %v6860_v55  ;;  %v5711_v30 = vadd.f32 %v6862_v6, %v6861_v17  ;;  %v1736_v34 = vsel %vm1104_vm2, %v1733_v40, %v1735_v1  ;;  %v1739_v11 = vsel %vm1104_vm2, %v1737_v31, %v1738_v19 }
 0x1f0   : > { %v1790_v25 = vadd.f32 %v1704_v9, %v1546_v42  ;;  %v5715_v33 = vadd.f32 %v1709_v8, %v1548_v44  ;;  %v1741_v39 = vsel %vm1104_vm2, %v1738_v19, %v1740_v27  ;;  %v5720_v36 = vadd.f32 %v6864_v53, %v6863_v28 }
 0x1f1   : > { %v5722_v24 = vadd.f32 %v1714_v62, %v1550_v46  ;;  %v5724_v50 = vadd.f32 %v1716_v13, %v1551_v21  ;;  %v5726_v43 = vadd.f32 %v1719_v7, %v1552_v14  ;;  %v5728_v45 = vadd.f32 %v1721_v20, %v1553_v3  ;;  %v6865_v14 = vld [vmem:[#allocation13_spill] sm:$0xff]  ;;  %v6866_v13 = vld [vmem:[#allocation35_spill] sm:$0xff] }
 0x1f2   : > { %v5730_v1 = vadd.f32 %v1724_v15, %v1554_v54  ;;  %v5732_v40 = vadd.f32 %v1726_v12, %v1555_v10  ;;  %v5734_v42 = vadd.f32 %v1729_v60, %v1556_v41  ;;  %v5736_v44 = vadd.f32 %v1731_v61, %v1557_v56 }
 0x1f3   : > { %v5738_v9 = vadd.f32 %v1734_v18, %v1558_v32  ;;  %v5740_v31 = vadd.f32 %v1736_v34, %v1559_v26  ;;  %v5742_v46 = vadd.f32 %v1739_v11, %v1560_v5  ;;  %v5744_v21 = vadd.f32 %v1741_v39, %v1561_v49  ;;  %v6867_v34 = vld [vmem:[#allocation24_spill] sm:$0xff]  ;;  %v6869_v39 = vld [vmem:[#allocation15_spill] sm:$0xff] }
 0x1f4   : > { %v1840_v3 = vmul.f32 %v6865_v14, %v5352_v58  ;;  %v1841_v54 = vmul.f32 %v6865_v14, %v5373_v23  ;;  %v1843_v10 = vmul.f32 %v6865_v14, %v5439_v0  ;;  %v1844_v41 = vmul.f32 %v6865_v14, %v5441_v63 }
 0x1f5   : > { %v1846_v56 = vmul.f32 %v6865_v14, %v5469_v4  ;;  %v1847_v32 = vmul.f32 %v6865_v14, %v5471_v16  ;;  %v1848_v26 = vmul.f32 %v6865_v14, %v5490_v38  ;;  %v1849_v5 = vmul.f32 %v6865_v14, %v5467_v35 }
 0x1f6   : > { %v1850_v49 = vmul.f32 %v6865_v14, %v5488_v52  ;;  %v1851_v19 = vmul.f32 %v6865_v14, %v6848_v37  ;;  %v1852_v8 = vmul.f32 %v6865_v14, %v5517_v57  ;;  %v1853_v62 = vmul.f32 %v6865_v14, %v5519_v59 }
 0x1f7   : > { %v1854_v29 = vmul.f32 %v6865_v14, %v5531_v22  ;;  %v1855_v51 = vmul.f32 %v6865_v14, %v5620_v48  ;;  %v1856_v27 = vmul.f32 %v6865_v14, %v6866_v13  ;;  %v1857_v7 = vmul.f32 %v6865_v14, %v5654_v2  ;;  %v6871_v14 = vld [vmem:[#allocation12_spill] sm:$0xff] }
 0x1f8   : > { %v1956_v47 = vrot.slane %v1840_v3, 2  ;;  %v1957_v55 = vrot.slane %v1841_v54, 2  ;;  %v1961_v20 = vrot.slane %v1843_v10, 2  ;;  %v1962_v15 = vrot.slane %v1844_v41, 2  ;;  %v6873_v54 = vld [vmem:[#allocation33_spill] sm:$0xff] }
 0x1f9   : > { %v1966_v12 = vrot.slane %v1846_v56, 2  ;;  %v1967_v60 = vrot.slane %v1847_v32, 2  ;;  %v1969_v61 = vrot.slane %v1848_v26, 2  ;;  %v1971_v18 = vrot.slane %v1849_v5, 2 }
 0x1fa   : > { %v1972_v17 = vrot.slane %v1850_v49, 2  ;;  %v1974_v6 = vrot.slane %v1851_v19, 2  ;;  %v6868_v11 = vrot.slane %v6867_v34, 2  ;;  %v6870_v28 = vrot.slane %v6869_v39, 2  ;;  %v6875_v49 = vld [vmem:[#allocation72_spill] sm:$0xff] }
 0x1fb   : > { %v1976_v22 = vrot.slane %v1852_v8, 2  ;;  %v1977_v37 = vrot.slane %v1853_v62, 2  ;;  %v1979_v38 = vrot.slane %v1854_v29, 2  ;;  %v6872_v3 = vrot.slane %v6871_v14, 2  ;;  %v6877_v8 = vld [vmem:[#allocation68_spill] sm:$0xff] }
 0x1fc   : > { %v1948_v53 = vsel %vm1349_vm3, %v6870_v28, %v6868_v11  ;;  %v6874_v10 = vrot.slane %v6873_v54, 2  ;;  %v1981_v56 = vrot.slane %v1855_v51, 2  ;;  %v1982_v32 = vrot.slane %v1856_v27, 2  ;;  %v6880_v54 = vld [vmem:[#allocation64_spill] sm:$0xff] }
 0x1fd   : > { %v1984_v26 = vrot.slane %v1857_v7, 2  ;;  %v1958_v5 = vsel %vm1349_vm3, %v1956_v47, %v1957_v55  ;;  %v6876_v19 = vrot.slane %v6875_v49, 2  ;;  %v1963_v11 = vsel %vm1349_vm3, %v1961_v20, %v1962_v15 }
 0x1fe   : > { %v1953_v41 = vsel %vm1349_vm3, %v6874_v10, %v6872_v3  ;;  %v6878_v62 = vrot.slane %v6877_v8, 2  ;;  %v1968_v39 = vsel %vm1349_vm3, %v1966_v12, %v1967_v60  ;;  %v1970_v28 = vsel %vm1349_vm3, %v1967_v60, %v1969_v61  ;;  %v6881_v12 = vld [vmem:[#allocation54_spill] sm:$0xff]  ;;  %v6882_v61 = vld [vmem:[#allocation48_spill] sm:$0xff]  ;;  %v6885_v8 = vld [vmem:[#allocation67_spill] sm:$0xff] }
 0x1ff   : > { %v1960_v34 = vsel %vm1349_vm3, %v1957_v55, %v6876_v19  ;;  %v1973_v51 = vsel %vm1349_vm3, %v1971_v18, %v1972_v17  ;;  %v1975_v27 = vsel %vm1349_vm3, %v1972_v17, %v1974_v6  ;;  %v1978_v7 = vsel %vm1349_vm3, %v1976_v22, %v1977_v37  ;;  %v6879_v55 = vld [vmem:[#allocation62_spill] sm:$0xff] }
 0x200   : > { %v1965_v29 = vsel %vm1349_vm3, %v1962_v15, %v6878_v62  ;;  %v1980_v47 = vsel %vm1349_vm3, %v1977_v37, %v1979_v38  ;;  %v2032_v14 = vadd.f32 %v6879_v55, %v5711_v30  ;;  %v2034_v20 = vadd.f32 %v1948_v53, %v1790_v25  ;;  %v6886_v62 = vld [vmem:[#allocation25_spill] sm:$0xff] }
 0x201   : > { %v1983_v3 = vsel %vm1349_vm3, %v1981_v56, %v1982_v32  ;;  %v1985_v15 = vsel %vm1349_vm3, %v1982_v32, %v1984_v26  ;;  %v2035_v10 = vadd.f32 %v6881_v12, %v6880_v54  ;;  %v2036_v60 = vadd.f32 %v1953_v41, %v5715_v33  ;;  %v5823_v41 = vld [vmem:[#allocation2 + $0xf0] sm:$0xff] }
 0x202   : > { %v2037_v18 = vadd.f32 %v6882_v61, %v5720_v36  ;;  %v2038_v22 = vadd.f32 %v1958_v5, %v5722_v24  ;;  %v2039_v38 = vadd.f32 %v1960_v34, %v5724_v50  ;;  %v2040_v37 = vadd.f32 %v1963_v11, %v5726_v43  ;;  %v6883_v43 = vld [vmem:[#allocation14_spill] sm:$0xff]  ;;  %v6884_v34 = vld [vmem:[#allocation27_spill] sm:$0xff] }
 0x203   : > { %v2041_v30 = vadd.f32 %v1965_v29, %v5728_v45  ;;  %v2042_v25 = vadd.f32 %v1968_v39, %v5730_v1  ;;  %v2043_v17 = vadd.f32 %v1970_v28, %v5732_v40  ;;  %v2044_v6 = vadd.f32 %v1973_v51, %v5734_v42  ;;  %v5827_v1 = vld [vmem:[#allocation2 + $0xf8] sm:$0xff]  ;;  %v6888_v51 = vld [vmem:[#allocation58_spill] sm:$0xff] }
 0x204   : > { %v2045_v53 = vadd.f32 %v1975_v27, %v5736_v44  ;;  %v2046_v33 = vadd.f32 %v1978_v7, %v5738_v9  ;;  %v2047_v36 = vadd.f32 %v1980_v47, %v5740_v31  ;;  %v2048_v24 = vadd.f32 %v1983_v3, %v5742_v46  ;;  %v6887_v39 = vld [vmem:[#allocation16_spill] sm:$0xff]  ;;  %v6889_v27 = vld [vmem:[#allocation53_spill] sm:$0xff] }
 0x205   : > { %v2049_v50 = vadd.f32 %v1985_v15, %v5744_v21  ;;  %v2070_v45 = vmul.f32 %v5823_v41, %v6883_v43  ;;  %v2071_v40 = vmul.f32 %v5827_v1, %v6883_v43  ;;  %v2072_v42 = vmul.f32 %v6883_v43, %v5352_v58 }
 0x206   : > { %v2073_v44 = vmul.f32 %v6883_v43, %v5373_v23  ;;  %v2074_v9 = vmul.f32 %v6883_v43, %v5439_v0  ;;  %v2075_v31 = vmul.f32 %v6883_v43, %v5441_v63  ;;  %v2076_v46 = vmul.f32 %v6883_v43, %v5469_v4 }
 0x207   : > { %v2077_v21 = vmul.f32 %v6883_v43, %v5471_v16  ;;  %v2078_v56 = vmul.f32 %v6883_v43, %v5467_v35  ;;  %v2079_v32 = vmul.f32 %v6883_v43, %v5488_v52  ;;  %v2080_v26 = vmul.f32 %v6883_v43, %v5517_v57 }
 0x208   : > { %v2081_v5 = vmul.f32 %v6883_v43, %v5519_v59  ;;  %v2082_v49 = vmul.f32 %v6883_v43, %v5620_v48  ;;  %v2083_v19 = vmul.f32 %v6883_v43, %v6866_v13  ;;  %v2084_v11 = vmul.f32 %v6884_v34, %v6883_v43 }
 0x209   : > { %v5859_v29 = vadd.f32 %v6886_v62, %v6885_v8  ;;  %v5862_v28 = vadd.f32 %v6887_v39, %v2032_v14  ;;  %v5866_v7 = vadd.f32 %v6889_v27, %v6888_v51  ;;  %v5868_v47 = vadd.f32 %v2070_v45, %v2034_v20  ;;  %v6901_v62 = vld [vmem:[#allocation17_spill] sm:$0xff]  ;;  %v6903_v27 = vld [vmem:[#allocation38_spill] sm:$0xff] }
 0x20a   : > { %v5870_v55 = vadd.f32 %v2071_v40, %v2035_v10  ;;  %v5872_v3 = vadd.f32 %v2072_v42, %v2036_v60  ;;  %v5874_v15 = vadd.f32 %v2073_v44, %v2037_v18  ;;  %v5876_v54 = vadd.f32 %v2074_v9, %v2038_v22  ;;  %v6897_v42 = vld [vmem:[#allocation80_spill] sm:$0xff] }
 0x20b   : > { %v5878_v12 = vadd.f32 %v2075_v31, %v2039_v38  ;;  %v5880_v61 = vadd.f32 %v2076_v46, %v2040_v37  ;;  %v5882_v14 = vadd.f32 %v2077_v21, %v2041_v30  ;;  %v5884_v43 = vadd.f32 %v2078_v56, %v2042_v25  ;;  %v6894_v37 = vld [vmem:[#allocation11_spill] sm:$0xff] }
 0x20c   : > { %v5886_v8 = vadd.f32 %v2079_v32, %v2043_v17  ;;  %v5888_v20 = vadd.f32 %v2080_v26, %v2044_v6  ;;  %v5890_v10 = vadd.f32 %v2081_v5, %v2045_v53  ;;  %v5892_v60 = vadd.f32 %v2082_v49, %v2046_v33  ;;  %v5910_v33 = vld [vmem:[#allocation2 + $0x1a8] sm:$0x3]  ;;  %v6898_v46 = vld [vmem:[#allocation39_spill] sm:$0xff] }
 0x20d   : > { %v5894_v18 = vadd.f32 %v2083_v19, %v2047_v36  ;;  %v5896_v22 = vadd.f32 %v2084_v11, %v2048_v24  ;;  %v5898_v38 = vadd.f32 %v2084_v11, %v2049_v50  ;;  %v2149_v30 = vmul.f32 %v6894_v37, %v5352_v58  ;;  %6895 = vst [vmem:[#allocation37_spill] sm:$0xff] %v5910_v33  ;;  %v6896_v24 = vld [vmem:[#allocation79_spill] sm:$0xff]  ;;  %v6899_v19 = vld [vmem:[#allocation50_spill] sm:$0xff] }
 0x20e   : > { %6890 = vst [vmem:[#allocation41_spill] sm:$0xff] %v5892_v60  ;;  %v2150_v25 = vmul.f32 %v6894_v37, %v5373_v23  ;;  %v2152_v17 = vmul.f32 %v6894_v37, %v5439_v0  ;;  %v2153_v6 = vmul.f32 %v6894_v37, %v5441_v63  ;;  %v2155_v53 = vmul.f32 %v6894_v37, %v5469_v4 }
 0x20f   : > { %6891 = vst [vmem:[#allocation6_spill] sm:$0xff] %v5894_v18  ;;  %6892 = vst [vmem:[#allocation31_spill] sm:$0xff] %v5896_v22  ;;  %v2156_v36 = vmul.f32 %v6894_v37, %v5471_v16  ;;  %v2157_v50 = vmul.f32 %v6894_v37, %v6896_v24  ;;  %v2158_v45 = vmul.f32 %v6894_v37, %v5467_v35  ;;  %v6900_v11 = vrot.slane %v6899_v19, 1  ;;  %v6905_v22 = vld [vmem:[#allocation34_spill] sm:$0xff] }
 0x210   : > { %6893 = vst [vmem:[#allocation9_spill] sm:$0xff] %v5898_v38  ;;  %v2159_v40 = vmul.f32 %v6894_v37, %v5488_v52  ;;  %v2160_v44 = vmul.f32 %v6894_v37, %v6897_v42  ;;  %v2161_v9 = vmul.f32 %v6894_v37, %v5517_v57  ;;  %v2162_v31 = vmul.f32 %v6894_v37, %v5519_v59 }
 0x211   : > { %v2163_v21 = vmul.f32 %v6894_v37, %v6898_v46  ;;  %v2164_v56 = vmul.f32 %v6894_v37, %v5620_v48  ;;  %v2165_v32 = vmul.f32 %v6894_v37, %v6866_v13  ;;  %v2166_v26 = vmul.f32 %v6894_v37, %v5654_v2 }
 0x212   : > { %v5936_v5 = vmul.f32 %v6884_v34, %v6894_v37  ;;  %v2169_v49 = vmul.f32 %v6894_v37, %v5910_v33  ;;  %v6902_v39 = vrot.slane %v6901_v62, 1  ;;  %v6904_v38 = vrot.slane %v6903_v27, 1 }
 0x213   : > { %v6906_v18 = vrot.slane %v6905_v22, 1  ;;  %v2263_v2 = vrot.slane %v2149_v30, 1  ;;  %v2264_v13 = vrot.slane %v2150_v25, 1  ;;  %v2268_v48 = vrot.slane %v2152_v17, 1 }
 0x214   : > { %v2255_v51 = vsel %vm1104_vm2, %v6902_v39, %v6900_v11  ;;  %v2269_v34 = vrot.slane %v2153_v6, 1  ;;  %v2273_v46 = vrot.slane %v2155_v53, 1  ;;  %v2274_v59 = vrot.slane %v2156_v36, 1  ;;  %v6909_v53 = vld [vmem:[#allocation69_spill] sm:$0xff] }
 0x215   : > { %v2260_v60 = vsel %vm1104_vm2, %v6906_v18, %v6904_v38  ;;  %v2276_v57 = vrot.slane %v2157_v50, 1  ;;  %v2278_v37 = vrot.slane %v2158_v45, 1  ;;  %v2279_v33 = vrot.slane %v2159_v40, 1  ;;  %v6907_v38 = vld [vmem:[#allocation73_spill] sm:$0xff] }
 0x216   : > { %v2281_v19 = vrot.slane %v2160_v44, 1  ;;  %v2283_v42 = vrot.slane %v2161_v9, 1  ;;  %v2284_v62 = vrot.slane %v2162_v31, 1  ;;  %v2286_v52 = vrot.slane %v2163_v21, 1 }
 0x217   : > { %v2288_v11 = vrot.slane %v2164_v56, 1  ;;  %v2289_v39 = vrot.slane %v2165_v32, 1  ;;  %v2291_v27 = vrot.slane %v2166_v26, 1  ;;  %v2293_v22 = vrot.slane %v5936_v5, 1 }
 0x218   : > { %v2265_v18 = vsel %vm1104_vm2, %v2263_v2, %v2264_v13  ;;  %v6908_v30 = vrot.slane %v6907_v38, 1  ;;  %v2270_v17 = vsel %vm1104_vm2, %v2268_v48, %v2269_v34  ;;  %v2296_v6 = vrot.slane %v2169_v49, 1 }
 0x219   : > { %v6910_v36 = vrot.slane %v6909_v53, 1  ;;  %v2275_v45 = vsel %vm1104_vm2, %v2273_v46, %v2274_v59  ;;  %v2277_v40 = vsel %vm1104_vm2, %v2274_v59, %v2276_v57  ;;  %v2280_v44 = vsel %vm1104_vm2, %v2278_v37, %v2279_v33  ;;  %v6912_v59 = vld [vmem:[#allocation56_spill] sm:$0xff] }
 0x21a   : > { %v2267_v25 = vsel %vm1104_vm2, %v2264_v13, %v6908_v30  ;;  %v2282_v9 = vsel %vm1104_vm2, %v2279_v33, %v2281_v19  ;;  %v2285_v2 = vsel %vm1104_vm2, %v2283_v42, %v2284_v62  ;;  %v2287_v31 = vsel %vm1104_vm2, %v2284_v62, %v2286_v52  ;;  %v6911_v13 = vld [vmem:[#allocation63_spill] sm:$0xff] }
 0x21b   : > { %v2272_v50 = vsel %vm1104_vm2, %v2269_v34, %v6910_v36  ;;  %v2342_v48 = vadd.f32 %v6911_v13, %v5859_v29  ;;  %v5968_v21 = vsel %vm1104_vm2, %v2288_v11, %v2289_v39  ;;  %v5971_v56 = vsel %vm1104_vm2, %v2289_v39, %v2291_v27  ;;  %v6913_v29 = vld [vmem:[#allocation20_spill] sm:$0xff]  ;;  %v6918_v34 = vld [vmem:[#allocation49_spill] sm:$0xff] }
 0x21c   : > { %v2344_v46 = vadd.f32 %v2255_v51, %v5862_v28  ;;  %v5977_v57 = vsel %vm1104_vm2, %v2293_v22, %v2296_v6  ;;  %v2345_v33 = vadd.f32 %v6912_v59, %v5866_v7  ;;  %v2346_v52 = vadd.f32 %v2260_v60, %v5868_v47 }
 0x21d   : > { %v2347_v42 = vadd.f32 %v6913_v29, %v5870_v55  ;;  %v2348_v32 = vadd.f32 %v2265_v18, %v5872_v3  ;;  %v5986_v26 = vadd.f32 %v2267_v25, %v5874_v15  ;;  %v5989_v28 = vadd.f32 %v2270_v17, %v5876_v54  ;;  %v6914_v55 = vld [vmem:[#allocation74_spill] sm:$0xff]  ;;  %v6915_v3 = vld [vmem:[#allocation60_spill] sm:$0xff]  ;;  %v6920_v18 = vld [vmem:[#allocation51_spill] sm:$0xff] }
 0x21e   : > { %v5992_v49 = vadd.f32 %v2272_v50, %v5878_v12  ;;  %v5995_v51 = vadd.f32 %v2275_v45, %v5880_v61  ;;  %v5998_v7 = vadd.f32 %v2277_v40, %v5882_v14  ;;  %v6001_v47 = vadd.f32 %v2280_v44, %v5884_v43  ;;  %v6011_v54 = vld [vmem:[%s6509_s4 + $0x8] ss:$0 sm:$0xff]  ;;  %v6916_v14 = vld [vmem:[#allocation61_spill] sm:$0xff] }
 0x21f   : > { %v2623_v60 = vadd.f32 %v6915_v3, %v6914_v55  ;;  %v6006_v15 = vadd.f32 %v2282_v9, %v5886_v8  ;;  %v2390_v12 = vmul.f32 %v6011_v54, %v5823_v41  ;;  %v2391_v61 = vmul.f32 %v6011_v54, %v5827_v1  ;;  %v6925_v17 = vld [vmem:[#allocation65_spill] sm:$0xff]  ;;  %v6926_v40 = vld [vmem:[#allocation78_spill] sm:$0xff] }
 0x220   : > { %v6917_v43 = vrot.slane %v6916_v14, 2  ;;  %v6919_v37 = vrot.slane %v6918_v34, 2  ;;  %v6023_v8 = vadd.f32 %v2285_v2, %v5888_v20  ;;  %v6026_v62 = vadd.f32 %v2287_v31, %v5890_v10  ;;  %v6922_v20 = vld [vmem:[#allocation18_spill] sm:$0xff]  ;;  %v6928_v31 = vld [vmem:[#allocation4_spill] sm:$0xff] }
 0x221   : > { %v2393_v11 = vmul.f32 %v6011_v54, %v5352_v58  ;;  %v2394_v41 = vmul.f32 %v6011_v54, %v5373_v23  ;;  %v2396_v1 = vmul.f32 %v6011_v54, %v5439_v0  ;;  %v2397_v27 = vmul.f32 %v6011_v54, %v5441_v63  ;;  %v6924_v58 = vld [vmem:[#allocation71_spill] sm:$0xff] }
 0x222   : > { %v2494_v19 = vsel %vm1349_vm3, %v6919_v37, %v6917_v43  ;;  %v6921_v38 = vrot.slane %v6920_v18, 2  ;;  %v6923_v30 = vrot.slane %v6922_v20, 2  ;;  %v2399_v25 = vmul.f32 %v6011_v54, %v5469_v4  ;;  %v6927_v4 = vld [vmem:[#allocation80_spill] sm:$0xff]  ;;  %v6932_v37 = vld [vmem:[#allocation10_spill] sm:$0xff] }
 0x223   : > { %v2586_v39 = vadd.f32 %v2494_v19, %v2342_v48  ;;  %v2587_v6 = vadd.f32 %v6925_v17, %v6924_v58  ;;  %v2655_v23 = vmax.f32 %v2623_v60, 0.0  ;;  %v2400_v0 = vmul.f32 %v6011_v54, %v5471_v16  ;;  %v6935_v18 = vld [vmem:[#allocation8_spill] sm:$0xff]  ;;  %v6938_v17 = vld [vmem:[#allocation75_spill] sm:$0xff] }
 0x224   : > { %v2499_v10 = vsel %vm1349_vm3, %v6923_v30, %v6921_v38  ;;  %v2401_v63 = vmul.f32 %v6011_v54, %v6896_v24  ;;  %v2502_v36 = vrot.slane %v2390_v12, 2  ;;  %v2503_v50 = vrot.slane %v2391_v61, 2  ;;  %v6929_v24 = vld [vmem:[#allocation30_spill] sm:$0xff]  ;;  %v6931_v12 = vld [vmem:[#allocation39_spill] sm:$0xff]  ;;  %v6936_v30 = vld [vmem:[#allocation76_spill] sm:$0xff] }
 0x225   : > { %v2588_v53 = vadd.f32 %v2499_v10, %v2344_v46  ;;  %v2402_v45 = vmul.f32 %v6011_v54, %v5467_v35  ;;  %v6053_v44 = vmul.f32 %v6011_v54, %v6926_v40  ;;  %v6057_v9 = vmul.f32 %v6011_v54, %v6927_v4  ;;  %v6930_v46 = vld [vmem:[#allocation57_spill] sm:$0xff] }
 0x226   : > { %v2625_v2 = vadd.f32 %v6915_v3, %v2586_v39  ;;  %v6062_v16 = vmul.f32 %v6011_v54, %v6928_v31  ;;  %v6066_v13 = vmul.f32 %v6011_v54, %v6929_v24  ;;  %v2507_v48 = vrot.slane %v2393_v11, 2 }
 0x227   : > { %v2508_v35 = vrot.slane %v2394_v41, 2  ;;  %v2589_v59 = vadd.f32 %v6930_v46, %v2345_v33  ;;  %v2626_v29 = vadd.f32 %v6915_v3, %v2587_v6  ;;  %v2627_v55 = vadd.f32 %v6915_v3, %v2588_v53  ;;  %v6934_v41 = vld [vmem:[#allocation40_spill] sm:$0xff] }
 0x228   : > { %v6071_v60 = vmin.f32 %v2655_v23, 6.0  ;;  %v6075_v61 = vmul.f32 %v6011_v54, %v6931_v12  ;;  %v2504_v14 = vsel %vm1349_vm3, %v2502_v36, %v2503_v50  ;;  %v2512_v43 = vrot.slane %v2396_v1, 2 }
 0x229   : > { %v2513_v34 = vrot.slane %v2397_v27, 2  ;;  %v6933_v19 = vrot.slane %v6932_v37, 2  ;;  %v2590_v39 = vadd.f32 %v2504_v14, %v2346_v52  ;;  %v2657_v33 = vmax.f32 %v2625_v2, 0.0  ;;  %v6939_v52 = vld [vmem:[#allocation52_spill] sm:$0xff] }
 0x22a   : > { %v2717_v38 = vadd.f32 %v6935_v18, %v6934_v41  ;;  %v2509_v20 = vsel %vm1349_vm3, %v2507_v48, %v2508_v35  ;;  %v6937_v10 = vrot.slane %v6936_v30, 2  ;;  %v2515_v6 = vrot.slane %v6938_v17, 2 }
 0x22b   : > { %v2506_v11 = vsel %vm1349_vm3, %v2503_v50, %v6933_v19  ;;  %v2628_v1 = vadd.f32 %v6915_v3, %v2589_v59  ;;  %v2658_v27 = vmax.f32 %v2626_v29, 0.0  ;;  %v2659_v23 = vmax.f32 %v2627_v55, 0.0 }
 0x22c   : > { %v2511_v58 = vsel %vm1349_vm3, %v2508_v35, %v6937_v10  ;;  %v2591_v53 = vadd.f32 %v2506_v11, %v2347_v42  ;;  %v2718_v36 = vadd.f32 %v2717_v38, %v6071_v60  ;;  %v6092_v50 = vmul.f32 %v6011_v54, %v6939_v52  ;;  %v6940_v42 = vld [vmem:[#allocation77_spill] sm:$0xff] }
 0x22d   : > { %v2514_v40 = vsel %vm1349_vm3, %v2512_v43, %v2513_v34  ;;  %v2517_v4 = vrot.slane %v2399_v25, 2  ;;  %v2518_v2 = vrot.slane %v2400_v0, 2  ;;  %v2592_v31 = vadd.f32 %v2509_v20, %v2348_v32  ;;  %v6941_v25 = vld [vmem:[#allocation35_spill] sm:$0xff] }
 0x22e   : > { %v2629_v24 = vadd.f32 %v6915_v3, %v2590_v39  ;;  %v6096_v48 = vmin.f32 %v2657_v33, 6.0  ;;  %v2719_v35 = vadd.f32 %v2718_v36, %v6940_v42  ;;  %v2516_v46 = vsel %vm1349_vm3, %v2513_v34, %v2515_v6  ;;  %v6942_v33 = vld [vmem:[#allocation21_spill] sm:$0xff] }
 0x22f   : > { %v2520_v59 = vrot.slane %v2401_v63, 2  ;;  %v2593_v29 = vadd.f32 %v2511_v58, %v5986_v26  ;;  %v2630_v55 = vadd.f32 %v6915_v3, %v2591_v53  ;;  %v2660_v12 = vmax.f32 %v2628_v1, 0.0 }
 0x230   : > { %v6102_v14 = vmin.f32 %v2658_v27, 6.0  ;;  %v6104_v43 = vmin.f32 %v2659_v23, 6.0  ;;  %v2720_v32 = vadd.f32 %v2719_v35, %v6096_v48  ;;  %v2409_v0 = vmul.f32 %v6011_v54, %v6941_v25  ;;  %v6131_v23 = vld [vmem:[#allocation2] sm:$0xff] }
 0x231   : > { %v2519_v37 = vsel %vm1349_vm3, %v2517_v4, %v2518_v2  ;;  %v2522_v19 = vrot.slane %v2402_v45, 2  ;;  %v2523_v34 = vrot.slane %v6053_v44, 2  ;;  %v2594_v63 = vadd.f32 %v2514_v40, %v5989_v28 }
 0x232   : > { %v2631_v26 = vadd.f32 %v6915_v3, %v2592_v31  ;;  %v2661_v11 = vmax.f32 %v2629_v24, 0.0  ;;  %v2721_v39 = vadd.f32 %v2720_v32, %v6102_v14  ;;  %v2410_v18 = vmul.f32 %v6011_v54, %v6942_v33 }
 0x233   : > { %v2521_v38 = vsel %vm1349_vm3, %v2518_v2, %v2520_v59  ;;  %v2525_v20 = vrot.slane %v6057_v9, 2  ;;  %v2595_v30 = vadd.f32 %v2516_v46, %v5992_v49  ;;  %v2632_v45 = vadd.f32 %v6915_v3, %v2593_v29 }
 0x234   : > { %v2662_v10 = vmax.f32 %v2630_v55, 0.0  ;;  %v6120_v44 = vmin.f32 %v2660_v12, 6.0  ;;  %v2722_v28 = vadd.f32 %v2721_v39, %v6104_v43  ;;  %v2524_v58 = vsel %vm1349_vm3, %v2522_v19, %v2523_v34  ;;  %v6943_v55 = vld [vmem:[#allocation37_spill] sm:$0xff] }
 0x235   : > { %v2527_v17 = vrot.slane %v6062_v16, 2  ;;  %v2528_v6 = vrot.slane %v6066_v13, 2  ;;  %v2596_v53 = vadd.f32 %v2519_v37, %v5995_v51  ;;  %v2633_v1 = vadd.f32 %v6915_v3, %v2594_v63 }
 0x236   : > { %v2663_v9 = vmax.f32 %v2631_v26, 0.0  ;;  %v6128_v27 = vmin.f32 %v2661_v11, 6.0  ;;  %v2723_v49 = vadd.f32 %v2722_v28, %v6120_v44  ;;  %v2411_v36 = vmul.f32 %v6131_v23, %v6011_v54 }
 0x237   : > { %v2526_v52 = vsel %vm1349_vm3, %v2523_v34, %v2525_v20  ;;  %v2530_v16 = vrot.slane %v6075_v61, 2  ;;  %v2597_v13 = vadd.f32 %v2521_v38, %v5998_v7  ;;  %v2634_v51 = vadd.f32 %v6915_v3, %v2595_v30  ;;  %v6944_v34 = vld [vmem:[#allocation41_spill] sm:$0xff]  ;;  %v6945_v38 = vld [vmem:[#allocation6_spill] sm:$0xff] }
 0x238   : > { %v2664_v40 = vmax.f32 %v2632_v45, 0.0  ;;  %v6139_v4 = vmin.f32 %v2662_v10, 6.0  ;;  %v2724_v2 = vadd.f32 %v2723_v49, %v6128_v27  ;;  %v2529_v31 = vsel %vm1349_vm3, %v2527_v17, %v2528_v6  ;;  %v6946_v17 = vld [vmem:[#allocation31_spill] sm:$0xff] }
 0x239   : > { %v2532_v24 = vrot.slane %v6092_v50, 2  ;;  %v2533_v35 = vrot.slane %v2409_v0, 2  ;;  %v2598_v46 = vadd.f32 %v2524_v58, %v6001_v47  ;;  %v2635_v59 = vadd.f32 %v6915_v3, %v2596_v53  ;;  %v3756_v50 = vld [vmem:[%s6510_s5] ss:$0 sm:$0xff] }
 0x23a   : > { %v2665_v29 = vmax.f32 %v2633_v1, 0.0  ;;  %v6146_v61 = vmin.f32 %v2663_v9, 6.0  ;;  %v2725_v7 = vadd.f32 %v2724_v2, %v6139_v4  ;;  %v2413_v12 = vmul.f32 %v6011_v54, %v6943_v55 }
 0x23b   : > { %v2531_v32 = vsel %vm1349_vm3, %v2528_v6, %v2530_v16  ;;  %v2535_v25 = vrot.slane %v2410_v18, 2  ;;  %v2599_v37 = vadd.f32 %v2526_v52, %v6006_v15  ;;  %v2636_v47 = vadd.f32 %v3756_v50, %v2597_v13 }
 0x23c   : > { %v2666_v0 = vmax.f32 %v2634_v51, 0.0  ;;  %v6156_v3 = vmin.f32 %v2664_v40, 6.0  ;;  %v2726_v19 = vadd.f32 %v2725_v7, %v6146_v61  ;;  %v2358_v63 = vadd.f32 %v5968_v21, %v6944_v34 }
 0x23d   : > { %v2534_v54 = vsel %vm1349_vm3, %v2532_v24, %v2533_v35  ;;  %v2537_v26 = vrot.slane %v2411_v36, 2  ;;  %v2600_v11 = vadd.f32 %v2529_v31, %v6023_v8  ;;  %v2637_v39 = vadd.f32 %v3756_v50, %v2598_v46  ;;  %v6947_v36 = vld [vmem:[#allocation9_spill] sm:$0xff] }
 0x23e   : > { %v2667_v15 = vmax.f32 %v2635_v59, 0.0  ;;  %v6163_v33 = vmin.f32 %v2665_v29, 6.0  ;;  %v2727_v18 = vadd.f32 %v2726_v19, %v6156_v3  ;;  %v2359_v20 = vadd.f32 %v5971_v56, %v6945_v38 }
 0x23f   : > { %v2536_v30 = vsel %vm1349_vm3, %v2533_v35, %v2535_v25  ;;  %v2540_v45 = vrot.slane %v2413_v12, 2  ;;  %v2601_v10 = vadd.f32 %v2531_v32, %v6026_v62  ;;  %v2638_v21 = vadd.f32 %v3756_v50, %v2599_v37 }
 0x240   : > { %v2668_v28 = vmax.f32 %v2636_v47, 0.0  ;;  %v6170_v58 = vmin.f32 %v2666_v0, 6.0  ;;  %v2728_v8 = vadd.f32 %v2727_v18, %v6163_v33  ;;  %v2360_v6 = vadd.f32 %v2293_v22, %v6946_v17  ;;  %v2836_v17 = vld [vmem:[%s6512_s7 + $0x8] sm:$0xff] }
 0x241   : > { %v2602_v53 = vadd.f32 %v2534_v54, %v2358_v63  ;;  %v2639_v1 = vadd.f32 %v3756_v50, %v2600_v11  ;;  %v2669_v9 = vmax.f32 %v2637_v39, 0.0  ;;  %v6176_v49 = vmin.f32 %v2667_v15, 6.0 }
 0x242   : > { %v2729_v56 = vadd.f32 %v2728_v8, %v6170_v58  ;;  %v2361_v62 = vadd.f32 %v5977_v57, %v6947_v36  ;;  %v2541_v52 = vsel %vm1349_vm3, %v2537_v26, %v2540_v45  ;;  %v2603_v16 = vadd.f32 %v2536_v30, %v2359_v20  ;;  %v2835_v8 = vld [vmem:[%s6512_s7] sm:$0xff] }
 0x243   : > { %v2640_v13 = vadd.f32 %v3756_v50, %v2601_v10  ;;  %v2670_v51 = vmax.f32 %v2638_v21, 0.0  ;;  %v6182_v40 = vmin.f32 %v2668_v28, 6.0  ;;  %v2604_v22 = vadd.f32 %v2537_v26, %v2360_v6 }
 0x244   : > { %v2730_v5 = vadd.f32 %v2729_v56, %v6176_v49  ;;  %v2641_v2 = vadd.f32 %v3756_v50, %v2602_v53  ;;  %v2671_v31 = vmax.f32 %v2639_v1, 0.0  ;;  %v6185_v24 = vmin.f32 %v2669_v9, 6.0  ;;  %v2837_v9 = vld [vmem:[%s6512_s7 + $0x10] sm:$0xff]  ;;  %v2838_v56 = vld [vmem:[%s6512_s7 + $0x18] sm:$0xff] }
 0x245   : > { %v2605_v46 = vadd.f32 %v2541_v52, %v2361_v62  ;;  %v2642_v59 = vadd.f32 %v3756_v50, %v2603_v16  ;;  %v2672_v29 = vmax.f32 %v2640_v13, 0.0  ;;  %v6188_v57 = vmin.f32 %v2670_v51, 6.0  ;;  %v2839_v52 = vld [vmem:[%s6512_s7 + $0x20] sm:$0xff]  ;;  %v2840_v16 = vld [vmem:[%s6512_s7 + $0x28] sm:$0xff]  ;;  %v2841_v51 = vld [vmem:[%s6512_s7 + $0x30] sm:$0xff] }
 0x246   : > { %v2731_v35 = vadd.f32 %v2730_v5, %v6182_v40  ;;  %v2643_v55 = vadd.f32 %v3756_v50, %v2604_v22  ;;  %v2673_v12 = vmax.f32 %v2641_v2, 0.0  ;;  %v6191_v32 = vmin.f32 %v2671_v31, 6.0  ;;  %v2843_v22 = vld [vmem:[%s6512_s7 + $0x40] sm:$0xff]  ;;  %v2844_v2 = vld [vmem:[%s6512_s7 + $0x48] sm:$0xff] }
 0x247   : > { %v2644_v37 = vadd.f32 %v3756_v50, %v2605_v46  ;;  %v2674_v47 = vmax.f32 %v2642_v59, 0.0  ;;  %v6194_v0 = vmin.f32 %v2672_v29, 6.0  ;;  %v3697_v53 = vpack.c.bf16 %v2836_v17, %v2835_v8  ;;  %v2846_v46 = vld [vmem:[%s6512_s7 + $0x58] sm:$0xff]  ;;  %v2847_v29 = vld [vmem:[%s6512_s7 + $0x60] sm:$0xff] }
 0x248   : > { %v2732_v7 = vadd.f32 %v2731_v35, %v6185_v24  ;;  %v2675_v34 = vmax.f32 %v2643_v55, 0.0  ;;  %v6197_v63 = vmin.f32 %v2673_v12, 6.0  ;;  %v3700_v36 = vpack.c.bf16 %v2838_v56, %v2837_v9  ;;  %v2845_v35 = vld [vmem:[%s6512_s7 + $0x50] sm:$0xff]  ;;  %v6951_v56 = vld [vmem:[#allocation28_spill] sm:$0xff] }
 0x249   : > { %v2676_v26 = vmax.f32 %v2644_v37, 0.0  ;;  %v6200_v11 = vmin.f32 %v2674_v47, 6.0  ;;  %v6948_v62 = vmov 0.0|0.0   ;;  %v3703_v13 = vpack.c.bf16 %v2840_v16, %v2839_v52  ;;  %v2849_v12 = vld [vmem:[%s6512_s7 + $0x70] sm:$0xff]  ;;  %v6953_v16 = vld [vmem:[#allocation42_spill] sm:$0xff] }
 0x24a   : > { %v2733_v25 = vadd.f32 %v2732_v7, %v6188_v57  ;;  %v6203_v15 = vmin.f32 %v2675_v34, 6.0  ;;  %v3709_v31 = vpack.c.bf16 %v2844_v2, %v2843_v22  ;;  %v3712_v59 = vpack.c.bf16 %v2846_v46, %v2845_v35  ;;  %v2848_v7 = vld [vmem:[%s6512_s7 + $0x68] sm:$0xff] }
 0x24b   : > { %v6206_v50 = vmin.f32 %v2676_v26, 6.0  ;;  %v3715_v55 = vpack.c.bf16 %v2848_v7, %v2847_v29  ;;  %v3736_v26 = vld [vmem:[%s6513_s8 + $0x8] sm:$0xff]   ;;  %v6957_v29 = vld [vmem:[#allocation5_spill] sm:$0xff] }
 0x24c   : > { %v2734_v19 = vadd.f32 %v2733_v25, %v6191_v32  ;;  %v2850_v25 = vld [vmem:[%s6512_s7 + $0x78] sm:$0xff]  ;;  %v6956_v2 = vld [vmem:[#allocation46_spill] sm:$0xff] }
 0x24d   : > { %v3718_v37 = vpack.c.bf16 %v2850_v25, %v2849_v12  ;;  %v6959_v25 = vld [vmem:[#allocation47_spill] sm:$0xff] }
 0x24e   : > { %v2735_v54 = vadd.f32 %v2734_v19, %v6194_v0 }
 0x250   : > { %v2736_v39 = vadd.f32 %v2735_v54, %v6197_v63  ;;  %v3735_v54 = vld [vmem:[%s6513_s8] sm:$0xff]  }
 0x251   : > { %3624 = vmatprep.subr.bf16.mxu0 %v3735_v54 }
 0x252   : > { %v2737_v18 = vadd.f32 %v2736_v39, %v6200_v11  ;;  %3625 = vmatpush3.bf16.msra.mxu0 %v3735_v54  ;;  %v3737_v39 = vld [vmem:[%s6513_s8 + $0x10] sm:$0xff]  }
 0x253   : > { %3626 = vmatprep.subr.bf16.mxu0 %v3736_v26 }
 0x254   : > { %v2738_v38 = vadd.f32 %v2737_v18, %v6203_v15  ;;  %v3738_v18 = vld [vmem:[%s6513_s8 + $0x18] sm:$0xff]  }
 0x256   : > { %v2739_v20 = vadd.f32 %v2738_v38, %v6206_v50  ;;  %3627 = vmatpush3.bf16.msra.mxu0 %v3736_v26  ;;  %v3739_v38 = vld [vmem:[%s6513_s8 + $0x20] sm:$0xff]  }
 0x257   : > { %3628 = vmatprep.subr.bf16.mxu0 %v3737_v39 }
 0x258   : > { %v2740_v30 = vrot.slane %v2739_v20, 4 }
 0x25a   : > { %v2741_v45 = vadd.f32 %v2740_v30, %v2739_v20  ;;  %3629 = vmatpush3.bf16.msra.mxu0 %v3737_v39  ;;  %v3740_v20 = vld [vmem:[%s6513_s8 + $0x28] sm:$0xff]   ;;  %v3741_v30 = vld [vmem:[%s6513_s8 + $0x30] sm:$0xff]  }
 0x25b   : > { %3630 = vmatprep.subr.bf16.mxu0 %v3738_v18 }
 0x25c   : > { %v2742_v10 = vrot.slane %v2741_v45, 2 }
 0x25e   : > { %v2743_v21 = vadd.f32 %v2742_v10, %v2741_v45  ;;  %3631 = vmatpush3.bf16.msra.mxu0 %v3738_v18  ;;  %v3742_v45 = vld [vmem:[%s6513_s8 + $0x38] sm:$0xff]  }
 0x25f   : > { %3632 = vmatprep.subr.bf16.mxu0 %v3739_v38 }
 0x260   : > { %v2744_v28 = vrot.slane %v2743_v21, 1 }
 0x262   : > { %v2745_v6 = vadd.f32 %v2744_v28, %v2743_v21  ;;  %3633 = vmatpush3.bf16.msra.mxu0 %v3739_v38 }
 0x263   : > { %3634 = vmatprep.subr.bf16.mxu0 %v3740_v20 }
 0x264   : > { %v2747_v1 = vmul.f32 0.00390625, %v2745_v6 }
 0x266   : > { %3587 = vmatmul.mubr.f32.vlgmr.msra.gmra.mrb[16].mxu1 %v2747_v1  ;;  %3635 = vmatpush3.bf16.msra.mxu0 %v3740_v20 }
 0x267   : > { %3698 = vmatpush3.bf16.msra.mxu1 %v3697_v53  ;;  %3621 = vmatprep.mubr.msk.f32.mxu1 %vm3799_vm4, %v6131_v23  ;;  %v2842_v23 = vld [vmem:[%s6512_s7 + $0x38] sm:$0xff]  ;;  %v6949_v53 = vld [vmem:[#allocation3_spill] sm:$0xff] }
 0x268   : > { %3699 = vmatprep.subr.bf16.mxu1 %v6948_v62  ;;  %v3706_v5 = vpack.c.bf16 %v2842_v23, %v2841_v51  ;;  %3636 = vmatprep.subr.bf16.mxu0 %v3741_v30  ;;  %v6950_v1 = vsub.s32 0, %v6949_v53  ;;  %v6954_v51 = vld [vmem:[#allocation36_spill] sm:$0xff] }
 0x26a   : > { %3637 = vmatpush3.bf16.msra.mxu0 %v3741_v30 }
 0x26b   : > { %3701 = vmatpush3.bf16.msra.mxu1 %v3700_v36  ;;  %3638 = vmatprep.subr.bf16.mxu0 %v3742_v45 }
 0x26c   : > { %3702 = vmatprep.subr.bf16.mxu1 %v6948_v62 }
 0x26e   : > { %3639 = vmatpush3.bf16.msra.mxu0 %v3742_v45 }
 0x26f   : > { %3704 = vmatpush3.bf16.msra.mxu1 %v3703_v13 }
 0x270   : > { %3705 = vmatprep.subr.bf16.mxu1 %v6948_v62 }
 0x273   : > { %3707 = vmatpush3.bf16.msra.mxu1 %v3706_v5  ;;  %v6955_v5 = vld [vmem:[#allocation45_spill] sm:$0xff] }
 0x274   : > { %3708 = vmatprep.subr.bf16.mxu1 %v6948_v62 }
 0x277   : > { %3710 = vmatpush3.bf16.msra.mxu1 %v3709_v31 }
 0x278   : > { %3711 = vmatprep.subr.bf16.mxu1 %v6948_v62 }
 0x27b   : > { %3713 = vmatpush3.bf16.msra.mxu1 %v3712_v59 }
 0x27c   : > { %3714 = vmatprep.subr.bf16.mxu1 %v6948_v62 }
 0x27f   : > { %3716 = vmatpush3.bf16.msra.mxu1 %v3715_v55  ;;  %v6958_v55 = vld [vmem:[#allocation44_spill] sm:$0xff] }
 0x280   : > { %3717 = vmatprep.subr.bf16.mxu1 %v6948_v62  ;;  %v6952_v62 = vld [vmem:[#allocation29_spill] sm:$0xff] }
 0x283   : > { %3719 = vmatpush3.bf16.msra.mxu1 %v3718_v37 }
 0x339   : > { %v2830_v47 = vpop.f32.mrb[16].mxu1 }
 0x33a   : > { %v2834_v19 = vmax.f32 %v2830_v47, 0.0  ;;  %v3588_v34 = vpop.f32.mrb[17].mxu1 }
 0x33c   : > { %3622 = vmatmul.mubr.f32.vlgmr.msra.gmra.mrb[18].mxu1 %v2834_v19 }
 0x40f   : > { %v2917_v10 = vpop.f32.mrb[18].mxu1 }
 0x410   : > { %v3430_v21 = vmul.f32 -1.442695, %v2917_v10  ;;  %v3623_v28 = vpop.f32.mrb[19].mxu1 }
 0x412   : > { %3743 = vpow2.f32 %v3430_v21 }
 0x41c   : > { %v3744_v8 = vpop.eup %3743 }
 0x41d   : > { %v2924_v17 = vadd.f32 1.0, %v3744_v8 }
 0x41f   : > { %3745 = vrcp.f32 %v2924_v17 }
 0x429   : > { %v3746_v6 = vpop.eup %3745 }
 0x42a   : > { %v2930_v9 = vrot.slane %v3746_v6, %v6950_v1 }
 0x42c   : > { %v2931_v36 = vmul.f32 %v2930_v9, %v6951_v56  ;;  %v2932_v52 = vmul.f32 %v2930_v9, %v6952_v62  ;;  %v2933_v13 = vmul.f32 %v2930_v9, %v6953_v16  ;;  %v2934_v23 = vmul.f32 %v2930_v9, %v6954_v51 }
 0x42d   : > { %v2935_v22 = vmul.f32 %v2930_v9, %v6955_v5  ;;  %v2936_v31 = vmul.f32 %v2930_v9, %v6956_v2  ;;  %v2937_v7 = vmul.f32 %v2930_v9, %v6957_v29  ;;  %v2938_v12 = vmul.f32 %v2930_v9, %v6958_v55  ;;  %v3758_v5 = vld [vmem:[%s3879_s24] sm:$0xff] }
 0x42e   : > { %v2963_v35 = vpack.c.bf16 %v2932_v52, %v2931_v36  ;;  %v2964_v46 = vpack.c.bf16 %v2934_v23, %v2933_v13  ;;  %v2939_v37 = vmul.f32 %v2930_v9, %v6959_v25  ;;  %v2940_v47 = vmul.f32 %v2930_v9, %v6934_v41  ;;  %v3757_v13 = vld [vmem:[%s3879_s24 + $0x10] sm:$0xff] }
 0x42f   : > { %v2965_v59 = vpack.c.bf16 %v2936_v31, %v2935_v22  ;;  %v2966_v19 = vpack.c.bf16 %v2938_v12, %v2937_v7  ;;  %v2941_v54 = vmul.f32 %v2930_v9, %v6071_v60  ;;  %v2942_v26 = vmul.f32 %v2930_v9, %v6940_v42  ;;  %v3759_v31 = vld [vmem:[%s3879_s24 + $0x18] sm:$0xff] }
 0x430   : > { %3640 = vmatprep.mubr.bf16.mxu0 %v2963_v35  ;;  %v2967_v34 = vpack.c.bf16 %v2940_v47, %v2939_v37  ;;  %v2943_v39 = vmul.f32 %v2930_v9, %v6096_v48  ;;  %v2944_v18 = vmul.f32 %v2930_v9, %v6102_v14  ;;  %v2945_v30 = vmul.f32 %v2930_v9, %v6104_v43 }
 0x431   : > { %3641 = vmatmul.mubr.bf16.vlgmr.msra.gmra.mrb[16].mxu0 %v2964_v46  ;;  %v2968_v38 = vpack.c.bf16 %v2942_v26, %v2941_v54  ;;  %v2946_v41 = vmul.f32 %v2930_v9, %v6120_v44  ;;  %v2947_v45 = vmul.f32 %v2930_v9, %v6128_v27  ;;  %v2948_v10 = vmul.f32 %v2930_v9, %v6139_v4  ;;  %v3760_v46 = vld [vmem:[%s3879_s24 + $0x8] sm:$0xff]  ;;  %v3761_v26 = vld [vmem:[%s3879_s24 + $0x30] sm:$0xff] }
 0x432   : > { %3644 = vmatprep.mubr.bf16.mxu0 %v2965_v59  ;;  %v2969_v20 = vpack.c.bf16 %v2944_v18, %v2943_v39  ;;  %v2949_v48 = vmul.f32 %v2930_v9, %v6146_v61  ;;  %v2950_v42 = vmul.f32 %v2930_v9, %v6156_v3  ;;  %v2951_v14 = vmul.f32 %v2930_v9, %v6163_v33 }
 0x433   : > { %v2970_v21 = vpack.c.bf16 %v2946_v41, %v2945_v30  ;;  %v2971_v60 = vpack.c.bf16 %v2948_v10, %v2947_v45  ;;  %v2952_v28 = vmul.f32 %v2930_v9, %v6170_v58  ;;  %v2953_v44 = vmul.f32 %v2930_v9, %v6176_v49  ;;  %v3763_v41 = vld [vmem:[%s3879_s24 + $0x38] sm:$0xff]  ;;  %v3764_v10 = vld [vmem:[%s3879_s24 + $0x28] sm:$0xff] }
 0x434   : > { %v2972_v8 = vpack.c.bf16 %v2950_v42, %v2949_v48  ;;  %v2954_v27 = vmul.f32 %v2930_v9, %v6182_v40  ;;  %v2955_v4 = vmul.f32 %v2930_v9, %v6185_v24  ;;  %v2956_v17 = vmul.f32 %v2930_v9, %v6188_v57 }
 0x435   : > { %v2973_v43 = vpack.c.bf16 %v2952_v28, %v2951_v14  ;;  %v2957_v3 = vmul.f32 %v2930_v9, %v6191_v32  ;;  %v2958_v33 = vmul.f32 %v2930_v9, %v6194_v0  ;;  %v2959_v58 = vmul.f32 %v2930_v9, %v6197_v63  ;;  %v6328_v32 = vld [vmem:[%s6514_s9] ss:$0 sm:$0xff] }
 0x436   : > { %v2974_v6 = vpack.c.bf16 %v2954_v27, %v2953_v44  ;;  %v2975_v61 = vpack.c.bf16 %v2956_v17, %v2955_v4  ;;  %v2960_v53 = vmul.f32 %v2930_v9, %v6200_v11  ;;  %v2961_v40 = vmul.f32 %v2930_v9, %v6203_v15  ;;  %v6333_v63 = vld [vmem:[%s6515_s10] ss:$0 sm:$0xff]  ;;  %v3765_v17 = vld [vmem:[%s3879_s24 + $0x50] sm:$0xff] }
 0x437   : > { %v2976_v1 = vpack.c.bf16 %v2958_v33, %v2957_v3  ;;  %v2962_v24 = vmul.f32 %v2930_v9, %v6206_v50  ;;  %v3766_v3 = vld [vmem:[%s3879_s24 + $0x40] sm:$0xff] }
 0x438   : > { %v2977_v49 = vpack.c.bf16 %v2960_v53, %v2959_v58  ;;  %v3767_v53 = vld [vmem:[%s3879_s24 + $0x58] sm:$0xff] }
 0x439   : > { %3645 = vmatmul.mubr.bf16.gmra.mrb[20].mxu0 %v2966_v19  ;;  %v2978_v57 = vpack.c.bf16 %v2962_v24, %v2961_v40 }
 0x43a   : > { %3648 = vmatprep.mubr.bf16.mxu0 %v2967_v34 }
 0x441   : > { %3649 = vmatmul.mubr.bf16.gmra.mrb[24].mxu0 %v2968_v38  ;;  %v3762_v38 = vld [vmem:[%s3879_s24 + $0x20] sm:$0xff] }
 0x442   : > { %3652 = vmatprep.mubr.bf16.mxu0 %v2969_v20 }
 0x449   : > { %3653 = vmatmul.mubr.bf16.gmra.mrb[28].mxu0 %v2970_v21 }
 0x44a   : > { %3656 = vmatprep.mubr.bf16.mxu0 %v2971_v60 }
 0x451   : > { %3657 = vmatmul.mubr.bf16.gmra.mrb[32].mxu0 %v2972_v8 }
 0x452   : > { %3660 = vmatprep.mubr.bf16.mxu0 %v2973_v43 }
 0x459   : > { %3661 = vmatmul.mubr.bf16.gmra.mrb[36].mxu0 %v2974_v6 }
 0x45a   : > { %3664 = vmatprep.mubr.bf16.mxu0 %v2975_v61 }
 0x461   : > { %3665 = vmatmul.mubr.bf16.gmra.mrb[40].mxu0 %v2976_v1 }
 0x462   : > { %3668 = vmatprep.mubr.bf16.mxu0 %v2977_v49  ;;  %v3768_v49 = vld [vmem:[%s3879_s24 + $0x48] sm:$0xff] }
 0x469   : > { %3669 = vmatmul.mubr.bf16.gmra.mrb[44].mxu0 %v2978_v57 }
 0x504   : > { %v3642_v0 = vpop.f32.mrb[16].mxu0 }
 0x505   : > { %v3213_v11 = vmul.f32 %v3642_v0, %v6328_v32  ;;  %v3077_v15 = vpop.f32.mrb[17].mxu0 }
 0x506   : > { %v3211_v50 = vmul.f32 %v6328_v32, %v3077_v15  ;;  %v3643_v9 = vpop.f32.mrb[18].mxu0 }
 0x507   : > { %v3252_v56 = vadd.f32 %v6333_v63, %v3213_v11  ;;  %v3214_v36 = vmul.f32 %v3643_v9, %v6328_v32  ;;  %v3080_v62 = vpop.f32.mrb[19].mxu0 }
 0x508   : > { %v3250_v52 = vadd.f32 %v6333_v63, %v3211_v50  ;;  %v3212_v16 = vmul.f32 %v6328_v32, %v3080_v62 }
 0x509   : > { %v3284_v51 = vadd.f32 %v3757_v13, %v3252_v56  ;;  %v3253_v23 = vadd.f32 %v6333_v63, %v3214_v36 }
 0x50a   : > { %v3282_v22 = vadd.f32 %v3758_v5, %v3250_v52  ;;  %v3251_v2 = vadd.f32 %v6333_v63, %v3212_v16  ;;  %v3769_v52 = vld [vmem:[%s3879_s24 + $0x70] sm:$0xff] }
 0x50b   : > { %3316 = vst.msk [vmem:[%s6344_s28 + $0x10] sm:$0xff] %vm437_vm1, %v3284_v51  ;;  %v3285_v35 = vadd.f32 %v3759_v31, %v3253_v23  ;;  %v3770_v51 = vld [vmem:[%s3879_s24 + $0x60] sm:$0xff]  ;;  %v3772_v31 = vld [vmem:[%s3879_s24 + $0x68] sm:$0xff] }
 0x50c   : > { %3314 = vst.msk [vmem:[%s6344_s28] sm:$0xff] %vm437_vm1, %v3282_v22  ;;  %v3283_v59 = vadd.f32 %v3760_v46, %v3251_v2  ;;  %v3646_v29 = vpop.f32.mrb[20].mxu0  ;;  %v3771_v22 = vld [vmem:[%s3879_s24 + $0x78] sm:$0xff] }
 0x50d   : > { %3317 = vst.msk [vmem:[%s6344_s28 + $0x18] sm:$0xff] %vm437_vm1, %v3285_v35  ;;  %v3217_v7 = vmul.f32 %v3646_v29, %v6328_v32  ;;  %v3093_v55 = vpop.f32.mrb[21].mxu0 }
 0x50e   : > { %3315 = vst.msk [vmem:[%s6344_s28 + $0x8] sm:$0xff] %vm437_vm1, %v3283_v59  ;;  %v3215_v12 = vmul.f32 %v6328_v32, %v3093_v55  ;;  %v3647_v25 = vpop.f32.mrb[22].mxu0 }
 0x50f   : > { %v3256_v37 = vadd.f32 %v6333_v63, %v3217_v7  ;;  %v3218_v47 = vmul.f32 %v3647_v25, %v6328_v32  ;;  %v3096_v19 = vpop.f32.mrb[23].mxu0 }
 0x510   : > { %v3254_v34 = vadd.f32 %v6333_v63, %v3215_v12  ;;  %v3216_v54 = vmul.f32 %v6328_v32, %v3096_v19 }
 0x511   : > { %v3288_v39 = vadd.f32 %v3761_v26, %v3256_v37  ;;  %v3257_v18 = vadd.f32 %v6333_v63, %v3218_v47 }
 0x512   : > { %v3286_v20 = vadd.f32 %v3762_v38, %v3254_v34  ;;  %v3255_v30 = vadd.f32 %v6333_v63, %v3216_v54  ;;  %v3773_v34 = vld [vmem:[%s3879_s24 + $0x90] sm:$0xff] }
 0x513   : > { %3320 = vst.msk [vmem:[%s6344_s28 + $0x30] sm:$0xff] %vm437_vm1, %v3288_v39  ;;  %v3289_v45 = vadd.f32 %v3763_v41, %v3257_v18  ;;  %v3774_v39 = vld [vmem:[%s3879_s24 + $0x80] sm:$0xff]  ;;  %v3776_v41 = vld [vmem:[%s3879_s24 + $0x88] sm:$0xff] }
 0x514   : > { %3318 = vst.msk [vmem:[%s6344_s28 + $0x20] sm:$0xff] %vm437_vm1, %v3286_v20  ;;  %v3287_v21 = vadd.f32 %v3764_v10, %v3255_v30  ;;  %v3650_v60 = vpop.f32.mrb[24].mxu0  ;;  %v3775_v20 = vld [vmem:[%s3879_s24 + $0x98] sm:$0xff] }
 0x515   : > { %3321 = vst.msk [vmem:[%s6344_s28 + $0x38] sm:$0xff] %vm437_vm1, %v3289_v45  ;;  %v3221_v48 = vmul.f32 %v3650_v60, %v6328_v32  ;;  %v3109_v42 = vpop.f32.mrb[25].mxu0 }
 0x516   : > { %3319 = vst.msk [vmem:[%s6344_s28 + $0x28] sm:$0xff] %vm437_vm1, %v3287_v21  ;;  %v3219_v14 = vmul.f32 %v6328_v32, %v3109_v42  ;;  %v3651_v28 = vpop.f32.mrb[26].mxu0 }
 0x517   : > { %v3260_v8 = vadd.f32 %v6333_v63, %v3221_v48  ;;  %v3222_v43 = vmul.f32 %v3651_v28, %v6328_v32  ;;  %v3112_v44 = vpop.f32.mrb[27].mxu0 }
 0x518   : > { %v3258_v27 = vadd.f32 %v6333_v63, %v3219_v14  ;;  %v3220_v4 = vmul.f32 %v6328_v32, %v3112_v44 }
 0x519   : > { %v3292_v6 = vadd.f32 %v3765_v17, %v3260_v8  ;;  %v3261_v61 = vadd.f32 %v6333_v63, %v3222_v43 }
 0x51a   : > { %v3290_v33 = vadd.f32 %v3766_v3, %v3258_v27  ;;  %v3259_v58 = vadd.f32 %v6333_v63, %v3220_v4  ;;  %v3777_v27 = vld [vmem:[%s3879_s24 + $0xb0] sm:$0xff] }
 0x51b   : > { %3324 = vst.msk [vmem:[%s6344_s28 + $0x50] sm:$0xff] %vm437_vm1, %v3292_v6  ;;  %v3293_v1 = vadd.f32 %v3767_v53, %v3261_v61  ;;  %v3778_v6 = vld [vmem:[%s3879_s24 + $0xa0] sm:$0xff]  ;;  %v3780_v53 = vld [vmem:[%s3879_s24 + $0xa8] sm:$0xff] }
 0x51c   : > { %3322 = vst.msk [vmem:[%s6344_s28 + $0x40] sm:$0xff] %vm437_vm1, %v3290_v33  ;;  %v3291_v40 = vadd.f32 %v3768_v49, %v3259_v58  ;;  %v3654_v24 = vpop.f32.mrb[28].mxu0  ;;  %v3779_v33 = vld [vmem:[%s3879_s24 + $0xb8] sm:$0xff] }
 0x51d   : > { %3325 = vst.msk [vmem:[%s6344_s28 + $0x58] sm:$0xff] %vm437_vm1, %v3293_v1  ;;  %v3225_v57 = vmul.f32 %v3654_v24, %v6328_v32  ;;  %v3125_v0 = vpop.f32.mrb[29].mxu0 }
 0x51e   : > { %3323 = vst.msk [vmem:[%s6344_s28 + $0x48] sm:$0xff] %vm437_vm1, %v3291_v40  ;;  %v3223_v11 = vmul.f32 %v6328_v32, %v3125_v0  ;;  %v3655_v15 = vpop.f32.mrb[30].mxu0 }
 0x51f   : > { %v3264_v50 = vadd.f32 %v6333_v63, %v3225_v57  ;;  %v3226_v9 = vmul.f32 %v3655_v15, %v6328_v32  ;;  %v3128_v56 = vpop.f32.mrb[31].mxu0 }
 0x520   : > { %v3262_v36 = vadd.f32 %v6333_v63, %v3223_v11  ;;  %v3224_v62 = vmul.f32 %v6328_v32, %v3128_v56 }
 0x521   : > { %v3296_v16 = vadd.f32 %v3769_v52, %v3264_v50  ;;  %v3265_v13 = vadd.f32 %v6333_v63, %v3226_v9 }
 0x522   : > { %v3294_v23 = vadd.f32 %v3770_v51, %v3262_v36  ;;  %v3263_v5 = vadd.f32 %v6333_v63, %v3224_v62  ;;  %v3781_v36 = vld [vmem:[%s3879_s24 + $0xd0] sm:$0xff] }
 0x523   : > { %3328 = vst.msk [vmem:[%s6344_s28 + $0x70] sm:$0xff] %vm437_vm1, %v3296_v16  ;;  %v3297_v2 = vadd.f32 %v3771_v22, %v3265_v13  ;;  %v3782_v16 = vld [vmem:[%s3879_s24 + $0xc0] sm:$0xff]  ;;  %v3784_v22 = vld [vmem:[%s3879_s24 + $0xc8] sm:$0xff] }
 0x524   : > { %3326 = vst.msk [vmem:[%s6344_s28 + $0x60] sm:$0xff] %vm437_vm1, %v3294_v23  ;;  %v3295_v35 = vadd.f32 %v3772_v31, %v3263_v5  ;;  %v3658_v46 = vpop.f32.mrb[32].mxu0  ;;  %v3783_v23 = vld [vmem:[%s3879_s24 + $0xd8] sm:$0xff] }
 0x525   : > { %3329 = vst.msk [vmem:[%s6344_s28 + $0x78] sm:$0xff] %vm437_vm1, %v3297_v2  ;;  %v3229_v59 = vmul.f32 %v3658_v46, %v6328_v32  ;;  %v3141_v29 = vpop.f32.mrb[33].mxu0 }
 0x526   : > { %3327 = vst.msk [vmem:[%s6344_s28 + $0x68] sm:$0xff] %vm437_vm1, %v3295_v35  ;;  %v3227_v7 = vmul.f32 %v6328_v32, %v3141_v29  ;;  %v3659_v55 = vpop.f32.mrb[34].mxu0 }
 0x527   : > { %v3268_v12 = vadd.f32 %v6333_v63, %v3229_v59  ;;  %v3230_v25 = vmul.f32 %v3659_v55, %v6328_v32  ;;  %v3144_v37 = vpop.f32.mrb[35].mxu0 }
 0x528   : > { %v3266_v47 = vadd.f32 %v6333_v63, %v3227_v7  ;;  %v3228_v19 = vmul.f32 %v6328_v32, %v3144_v37 }
 0x529   : > { %v3300_v54 = vadd.f32 %v3773_v34, %v3268_v12  ;;  %v3269_v26 = vadd.f32 %v6333_v63, %v3230_v25 }
 0x52a   : > { %v3298_v18 = vadd.f32 %v3774_v39, %v3266_v47  ;;  %v3267_v38 = vadd.f32 %v6333_v63, %v3228_v19  ;;  %v3785_v47 = vld [vmem:[%s3879_s24 + $0xf0] sm:$0xff] }
 0x52b   : > { %3332 = vst.msk [vmem:[%s6344_s28 + $0x90] sm:$0xff] %vm437_vm1, %v3300_v54  ;;  %v3301_v30 = vadd.f32 %v3775_v20, %v3269_v26  ;;  %v3786_v54 = vld [vmem:[%s3879_s24 + $0xe0] sm:$0xff]  ;;  %v3788_v20 = vld [vmem:[%s3879_s24 + $0xe8] sm:$0xff] }
 0x52c   : > { %3330 = vst.msk [vmem:[%s6344_s28 + $0x80] sm:$0xff] %vm437_vm1, %v3298_v18  ;;  %v3299_v45 = vadd.f32 %v3776_v41, %v3267_v38  ;;  %v3662_v10 = vpop.f32.mrb[36].mxu0  ;;  %v3787_v18 = vld [vmem:[%s3879_s24 + $0xf8] sm:$0xff] }
 0x52d   : > { %3333 = vst.msk [vmem:[%s6344_s28 + $0x98] sm:$0xff] %vm437_vm1, %v3301_v30  ;;  %v3233_v21 = vmul.f32 %v3662_v10, %v6328_v32  ;;  %v3157_v60 = vpop.f32.mrb[37].mxu0 }
 0x52e   : > { %3331 = vst.msk [vmem:[%s6344_s28 + $0x88] sm:$0xff] %vm437_vm1, %v3299_v45  ;;  %v3231_v48 = vmul.f32 %v6328_v32, %v3157_v60  ;;  %v3663_v42 = vpop.f32.mrb[38].mxu0 }
 0x52f   : > { %v3272_v14 = vadd.f32 %v6333_v63, %v3233_v21  ;;  %v3234_v28 = vmul.f32 %v3663_v42, %v6328_v32  ;;  %v3160_v8 = vpop.f32.mrb[39].mxu0 }
 0x530   : > { %v3270_v43 = vadd.f32 %v6333_v63, %v3231_v48  ;;  %v3232_v44 = vmul.f32 %v6328_v32, %v3160_v8 }
 0x531   : > { %v3304_v4 = vadd.f32 %v3777_v27, %v3272_v14  ;;  %v3273_v17 = vadd.f32 %v6333_v63, %v3234_v28 }
 0x532   : > { %v3302_v61 = vadd.f32 %v3778_v6, %v3270_v43  ;;  %v3271_v3 = vadd.f32 %v6333_v63, %v3232_v44 }
 0x533   : > { %3336 = vst.msk [vmem:[%s6344_s28 + $0xb0] sm:$0xff] %vm437_vm1, %v3304_v4  ;;  %v3305_v58 = vadd.f32 %v3779_v33, %v3273_v17 }
 0x534   : > { %3334 = vst.msk [vmem:[%s6344_s28 + $0xa0] sm:$0xff] %vm437_vm1, %v3302_v61  ;;  %v3303_v1 = vadd.f32 %v3780_v53, %v3271_v3  ;;  %v3666_v49 = vpop.f32.mrb[40].mxu0 }
 0x535   : > { %3337 = vst.msk [vmem:[%s6344_s28 + $0xb8] sm:$0xff] %vm437_vm1, %v3305_v58  ;;  %v3237_v40 = vmul.f32 %v3666_v49, %v6328_v32  ;;  %v3173_v24 = vpop.f32.mrb[41].mxu0 }
 0x536   : > { %3335 = vst.msk [vmem:[%s6344_s28 + $0xa8] sm:$0xff] %vm437_vm1, %v3303_v1  ;;  %v3235_v57 = vmul.f32 %v6328_v32, %v3173_v24  ;;  %v3667_v0 = vpop.f32.mrb[42].mxu0 }
 0x537   : > { %v3276_v11 = vadd.f32 %v6333_v63, %v3237_v40  ;;  %v3238_v15 = vmul.f32 %v3667_v0, %v6328_v32  ;;  %v3176_v50 = vpop.f32.mrb[43].mxu0 }
 0x538   : > { %v3274_v9 = vadd.f32 %v6333_v63, %v3235_v57  ;;  %v3236_v56 = vmul.f32 %v6328_v32, %v3176_v50 }
 0x539   : > { %v3308_v62 = vadd.f32 %v3781_v36, %v3276_v11  ;;  %v3277_v52 = vadd.f32 %v6333_v63, %v3238_v15 }
 0x53a   : > { %v3306_v13 = vadd.f32 %v3782_v16, %v3274_v9  ;;  %v3275_v51 = vadd.f32 %v6333_v63, %v3236_v56 }
 0x53b   : > { %3340 = vst.msk [vmem:[%s6344_s28 + $0xd0] sm:$0xff] %vm437_vm1, %v3308_v62  ;;  %v3309_v5 = vadd.f32 %v3783_v23, %v3277_v52 }
 0x53c   : > { %3338 = vst.msk [vmem:[%s6344_s28 + $0xc0] sm:$0xff] %vm437_vm1, %v3306_v13  ;;  %v3307_v2 = vadd.f32 %v3784_v22, %v3275_v51  ;;  %v3670_v31 = vpop.f32.mrb[44].mxu0 }
 0x53d   : > { %3341 = vst.msk [vmem:[%s6344_s28 + $0xd8] sm:$0xff] %vm437_vm1, %v3309_v5  ;;  %v3241_v35 = vmul.f32 %v3670_v31, %v6328_v32  ;;  %v3189_v46 = vpop.f32.mrb[45].mxu0 }
 0x53e   : > { %3339 = vst.msk [vmem:[%s6344_s28 + $0xc8] sm:$0xff] %vm437_vm1, %v3307_v2  ;;  %v3239_v59 = vmul.f32 %v6328_v32, %v3189_v46  ;;  %v3671_v29 = vpop.f32.mrb[46].mxu0 }
 0x53f   : > { %v3280_v7 = vadd.f32 %v6333_v63, %v3241_v35  ;;  %v3242_v55 = vmul.f32 %v3671_v29, %v6328_v32  ;;  %v3192_v12 = vpop.f32.mrb[47].mxu0 }
 0x540   : > { %v3278_v25 = vadd.f32 %v6333_v63, %v3239_v59  ;;  %v3240_v37 = vmul.f32 %v6328_v32, %v3192_v12 }
 0x541   : > { %v3312_v19 = vadd.f32 %v3785_v47, %v3280_v7  ;;  %v3281_v34 = vadd.f32 %v6333_v63, %v3242_v55 }
 0x542   : > { %v3310_v26 = vadd.f32 %v3786_v54, %v3278_v25  ;;  %v3279_v39 = vadd.f32 %v6333_v63, %v3240_v37 }
 0x543   : > { %3344 = vst.msk [vmem:[%s6344_s28 + $0xf0] sm:$0xff] %vm437_vm1, %v3312_v19  ;;  %v3313_v38 = vadd.f32 %v3787_v18, %v3281_v34 }
 0x544   : > { %3342 = vst.msk [vmem:[%s6344_s28 + $0xe0] sm:$0xff] %vm437_vm1, %v3310_v26  ;;  %v3311_v30 = vadd.f32 %v3788_v20, %v3279_v39 }
 0x545   : > { %3345 = vst.msk [vmem:[%s6344_s28 + $0xf8] sm:$0xff] %vm437_vm1, %v3313_v38 }
 0x546   : > { %3343 = vst.msk [vmem:[%s6344_s28 + $0xe8] sm:$0xff] %vm437_vm1, %v3311_v30 }
 0x547 PF: > { %s21_s17 = sadd.s32 1, %s3795_s17  }
 0x548   : > { %p18_p4 = scmp.ge.s32.totalorder %s21_s17, 4  }
 0x54a   :  { %20 = sbr.rel (!%p18_p4) target bundleno = 1 (0x1), region = 95 }

</bundles_post_ra>
